<compile_context>
chip_gen: v7x
topology: tpu7x:2x2x1
jax: 0.10.0
libtpu: 0.0.40
codegen_flags: <defaults>
</compile_context>

<pallas_src>
import jax
import jax.numpy as jnp
from jax.experimental import pallas as pl
from jax.experimental.pallas import tpu as pltpu


def plastic_chunk_kernel(eta_ref,        # (1,)            SMEM
                         yin_rows_ref,   # (TB, N)         VMEM, per time-chunk
                         yin_cols_ref,   # (N, TB)         VMEM, per time-chunk
                         base_ref,       # (TB, col_tile)  VMEM, per chunk & col tile
                         alpha_ref,      # (N, col_tile)   VMEM, resident across time
                         hebb0_ref,      # (N, col_tile)   VMEM, resident (read at c==0)
                         yout_ref,       # (TB, col_tile)  VMEM out, per chunk & tile
                         hebb_ref):      # (N, col_tile)   VMEM out, accumulator
    c = pl.program_id(1)

    # Initialize the resident Hebbian-trace accumulator for this column tile at
    # the first time chunk.
    @pl.when(c == 0)
    def _():
        hebb_ref[...] = hebb0_ref[...]

    eta = eta_ref[0]
    one_minus_eta = 1.0 - eta
    tb = yin_rows_ref.shape[0]  # static chunk length

    # Static (fully unrolled) inner time loop: all slices below are static, so
    # they are zero-cost ref views; the hebb_ref read->write chain enforces the
    # recurrent ordering.
    for s in range(tb):
        yin_row = yin_rows_ref[pl.ds(s, 1), :]                       # (1, N)

        # Effective plastic weights for this column tile (w already folded into
        # `base` by the wrapper).
        m = alpha_ref[...] * hebb_ref[...]                           # (N, TN)

        # yout = tanh(yin @ (alpha*hebb) + (yin @ w + input))
        pre = jnp.dot(yin_row, m, preferred_element_type=jnp.float32)  # (1, TN)
        yout = jnp.tanh(pre + base_ref[pl.ds(s, 1), :])                # (1, TN)
        yout_ref[pl.ds(s, 1), :] = yout

        # Hebbian trace: hebb = (1-eta)*hebb + eta*outer(yin, yout).
        # yin arrives pre-transposed per chunk (no in-kernel relayout); eta is
        # folded into the cheap (1, TN) row.
        yin_col = yin_cols_ref[:, pl.ds(s, 1)]                        # (N, 1)
        hebb_ref[...] = one_minus_eta * hebb_ref[...] + yin_col * (eta * yout)


def network_forward_fused(inp_seq, yin_seq, hebb, w, alpha, eta,
                          *, col_tile=None, time_block=None):
    """Run T plastic steps (with externally supplied yin sequence) in one pallas_call.

    inp_seq, yin_seq : (T, 1, N) float32
    hebb             : (N, N)    float32  initial Hebbian trace
    w, alpha         : (N, N)    float32
    eta              : (1,)      float32
    Returns (yout_seq (T, 1, N), hebb_final (N, N)).
    """
    T, _, n = inp_seq.shape
    assert n % 8 == 0, "pad N to a multiple of 8 (e.g. 1001 -> 1024) with zeros"

    if col_tile is None:
        # >= 2 column tiles (v7x megacore) but big enough tiles to beat grid overhead.
        col_tile = n if n < 256 else max(128, min(512, n // 2))
    assert col_tile % 128 == 0 and n % col_tile == 0

    if time_block is None:
        time_block = next(d for d in (8, 4, 2, 1) if T % d == 0)
    tb = time_block
    assert T % tb == 0
    num_chunks = T // tb

    # Hoist yin @ w + input out of the kernel: one MXU-shaped (T,N)@(N,N) matmul.
    yin_flat = yin_seq.reshape(T, n)
    base = (jnp.dot(yin_flat, w, preferred_element_type=jnp.float32)
            + inp_seq.reshape(T, n))                                   # (T, N)

    # Chunked time layout: rows for the matmul, columns for the outer product.
    yin_rows = yin_flat.reshape(num_chunks, tb, n)                     # (C, TB, N)
    yin_cols = jnp.swapaxes(yin_rows, 1, 2)                            # (C, N, TB)
    base_chunks = base.reshape(num_chunks, tb, n)                      # (C, TB, N)

    grid = (n // col_tile, num_chunks)  # (column tiles: parallel, time chunks: arbitrary)

    in_specs = [
        # eta: whole (1,) array in SMEM.
        pl.BlockSpec(memory_space=pltpu.MemorySpace.SMEM),
        # yin rows / columns for the current time chunk (coalesced DMA per chunk).
        pl.BlockSpec((None, tb, n), lambda j, c: (c, 0, 0)),
        pl.BlockSpec((None, n, tb), lambda j, c: (c, 0, 0)),
        # Pre-computed yin@w + input, per chunk & per column tile.
        pl.BlockSpec((None, tb, col_tile), lambda j, c: (c, 0, j)),
        # alpha / initial hebb: constant in the time axis -> fetched once per
        # column tile and resident in VMEM across the whole time loop.
        pl.BlockSpec((n, col_tile), lambda j, c: (0, j)),
        pl.BlockSpec((n, col_tile), lambda j, c: (0, j)),
    ]
    out_specs = (
        # yout: (TB, col_tile) lane/sublane-dense block writeback per chunk.
        pl.BlockSpec((None, tb, col_tile), lambda j, c: (c, 0, j)),
        # hebb: block index constant in time -> VMEM accumulator, one HBM
        # writeback per column tile.
        pl.BlockSpec((n, col_tile), lambda j, c: (0, j)),
    )

    yout_chunks, hebb_final = pl.pallas_call(
        plastic_chunk_kernel,
        grid=grid,
        in_specs=in_specs,
        out_specs=out_specs,
        out_shape=(
            jax.ShapeDtypeStruct((num_chunks, tb, n), jnp.float32),
            jax.ShapeDtypeStruct((n, n), jnp.float32),
        ),
        compiler_params=pltpu.CompilerParams(
            # Column tiles are independent (megacore-shardable on v7x); the
            # carried time axis must be "arbitrary" and last.
            dimension_semantics=("parallel", "arbitrary"),
        ),
    )(eta, yin_rows, yin_cols, base_chunks, alpha, hebb)

    return yout_chunks.reshape(T, 1, n), hebb_final


def network_forward(inp, yin, hebb, w, alpha, eta):
    """Exact single-step equivalent of Network.forward (valid for true recurrence)."""
    yout_seq, hebb_new = network_forward_fused(
        inp[None], yin[None], hebb, w, alpha, eta, time_block=1)
    return yout_seq[0], hebb_new


# ----------------------------- pure-JAX reference -----------------------------

def network_forward_ref(inp, yin, hebb, w, alpha, eta):
    yout = jnp.tanh(yin @ (w + alpha * hebb) + inp)
    hebb_new = (1.0 - eta[0]) * hebb + eta[0] * (yin[0][:, None] * yout[0][None, :])
    return yout, hebb_new


def network_forward_fused_ref(inp_seq, yin_seq, hebb, w, alpha, eta):
    youts = []
    for t in range(inp_seq.shape[0]):
        yout, hebb = network_forward_ref(inp_seq[t], yin_seq[t], hebb, w, alpha, eta)
        youts.append(yout)
    return jnp.stack(youts), hebb


if __name__ == "__main__":
    N = 256        # small stand-in for NBNEUR = PATTERN_SIZE + 1 = 1001 (pad to 1024)
    T = 8          # recurrent steps fused into one kernel launch
    TB = 4         # time-chunk length per grid step

    # Deterministic parameter init matching Network.__init__.
    w = jnp.full((N, N), 0.01, dtype=jnp.float32)
    alpha = jnp.full((N, N), 0.01, dtype=jnp.float32)
    eta = jnp.array([0.01], dtype=jnp.float32)

    key = jax.random.PRNGKey(0)
    k_inp, k_yin = jax.random.split(key)
    inp_seq = jax.random.normal(k_inp, (T, 1, N), dtype=jnp.float32)
    yin_seq = jax.random.normal(k_yin, (T, 1, N), dtype=jnp.float32)
    hebb0 = jnp.zeros((N, N), dtype=jnp.float32)     # Network.initial_hebb()

    # Fused T-step run (alpha / hebb stay resident in VMEM across the time loop).
    yout_seq, hebb_final = network_forward_fused(
        inp_seq, yin_seq, hebb0, w, alpha, eta, col_tile=128, time_block=TB)
    jax.block_until_ready((yout_seq, hebb_final))

    # Correctness vs a pure-JAX step-by-step reference.
    ref_yout_seq, ref_hebb = network_forward_fused_ref(
        inp_seq, yin_seq, hebb0, w, alpha, eta)
    assert jnp.allclose(yout_seq, ref_yout_seq, atol=1e-4, rtol=1e-4), \
        float(jnp.max(jnp.abs(yout_seq - ref_yout_seq)))
    assert jnp.allclose(hebb_final, ref_hebb, atol=1e-4, rtol=1e-4), \
        float(jnp.max(jnp.abs(hebb_final - ref_hebb)))

    # Single-step path mirrors the PyTorch module's forward signature exactly
    # (this is the drop-in path for true yout -> yin recurrence).
    y1, h1 = network_forward(inp_seq[0], yin_seq[0], hebb0, w, alpha, eta)
    ry1, rh1 = network_forward_ref(inp_seq[0], yin_seq[0], hebb0, w, alpha, eta)
    assert jnp.allclose(y1, ry1, atol=1e-4, rtol=1e-4)
    assert jnp.allclose(h1, rh1, atol=1e-4, rtol=1e-4)

    print("KERNEL_OK")
</pallas_src>

<mosaic_0001>
module attributes {stable_mosaic.version = 11 : i64} {
  func.func @plastic_chunk_kernel(%arg0: i32, %arg1: i32, %arg2: memref<1xf32, #tpu.memory_space<smem>>, %arg3: memref<1x4x256xf32, #tpu.memory_space<vmem>>, %arg4: memref<1x256x4xf32, #tpu.memory_space<vmem>>, %arg5: memref<1x4x128xf32, #tpu.memory_space<vmem>>, %arg6: memref<256x128xf32, #tpu.memory_space<vmem>>, %arg7: memref<256x128xf32, #tpu.memory_space<vmem>>, %arg8: memref<1x4x128xf32, #tpu.memory_space<vmem>>, %arg9: memref<256x128xf32, #tpu.memory_space<vmem>>) attributes {dimension_semantics = [#tpu.dimension_semantics<parallel>, #tpu.dimension_semantics<arbitrary>], iteration_bounds = array<i64: 2, 2>, scalar_prefetch = 0 : i64, scratch_operands = 0 : i64, tpu.core_type = #tpu.core_type<tc>, window_params = [{transform_indices = @transform_0, window_bounds = array<i64: 1>}, {transform_indices = @transform_1, window_bounds = array<i64: 1, 4, 256>}, {transform_indices = @transform_2, window_bounds = array<i64: 1, 256, 4>}, {transform_indices = @transform_3, window_bounds = array<i64: 1, 4, 128>}, {transform_indices = @transform_4, window_bounds = array<i64: 256, 128>}, {transform_indices = @transform_5, window_bounds = array<i64: 256, 128>}, {transform_indices = @transform_6, window_bounds = array<i64: 1, 4, 128>}, {transform_indices = @transform_7, window_bounds = array<i64: 256, 128>}]} {
    %c0_i32 = arith.constant 0 : i32
    %0 = arith.cmpi eq, %arg1, %c0_i32 : i32
    %1 = arith.extui %0 : i1 to i32
    %c0_i32_0 = arith.constant 0 : i32
    %2 = arith.cmpi ne, %1, %c0_i32_0 : i32
    scf.if %2 {
      %c0_82 = arith.constant 0 : index
      %c0_83 = arith.constant 0 : index
      %105 = vector.load %arg7[%c0_82, %c0_83] : memref<256x128xf32, #tpu.memory_space<vmem>>, vector<256x128xf32>
      %c0_84 = arith.constant 0 : index
      %c0_85 = arith.constant 0 : index
      %106 = vector.load %arg9[%c0_84, %c0_85] : memref<256x128xf32, #tpu.memory_space<vmem>>, vector<256x128xf32>
      tpu.vector_store %arg9[%c0_84, %c0_85], %105 {strides = array<i32>} : memref<256x128xf32, #tpu.memory_space<vmem>>, vector<256x128xf32>,
    } else {
    }
    %c0 = arith.constant 0 : index
    %3 = memref.load %arg2[%c0] : memref<1xf32, #tpu.memory_space<smem>>
    %cst = arith.constant 1.000000e+00 : f32
    %4 = arith.subf %cst, %3 : f32
    %c0_1 = arith.constant 0 : index
    %c0_2 = arith.constant 0 : index
    %c0_3 = arith.constant 0 : index
    %5 = vector.load %arg3[%c0_1, %c0_2, %c0_3] : memref<1x4x256xf32, #tpu.memory_space<vmem>>, vector<1x1x256xf32>
    %6 = vector.shape_cast %5 : vector<1x1x256xf32> to vector<1x256xf32>
    %c0_4 = arith.constant 0 : index
    %c0_5 = arith.constant 0 : index
    %7 = vector.load %arg6[%c0_4, %c0_5] : memref<256x128xf32, #tpu.memory_space<vmem>>, vector<256x128xf32>
    %c0_6 = arith.constant 0 : index
    %c0_7 = arith.constant 0 : index
    %8 = vector.load %arg9[%c0_6, %c0_7] : memref<256x128xf32, #tpu.memory_space<vmem>>, vector<256x128xf32>
    %9 = arith.mulf %7, %8 : vector<256x128xf32>
    %cst_8 = arith.constant dense<0.000000e+00> : vector<1x128xf32>
    %10 = tpu.matmul %6, %9, %cst_8 {dimension_numbers = #tpu.dot_dimension_numbers<[1], [0], [0], [1], [0, 0, 1, 1], [], []>} : vector<1x256xf32>, vector<256x128xf32>, vector<1x128xf32> -> vector<1x128xf32>
    %c0_9 = arith.constant 0 : index
    %c0_10 = arith.constant 0 : index
    %c0_11 = arith.constant 0 : index
    %11 = vector.load %arg5[%c0_9, %c0_10, %c0_11] : memref<1x4x128xf32, #tpu.memory_space<vmem>>, vector<1x1x128xf32>
    %12 = vector.shape_cast %11 : vector<1x1x128xf32> to vector<1x128xf32>
    %13 = arith.addf %10, %12 : vector<1x128xf32>
    %14 = math.tanh %13 : vector<1x128xf32>
    %c0_12 = arith.constant 0 : index
    %c0_13 = arith.constant 0 : index
    %c0_14 = arith.constant 0 : index
    %15 = vector.load %arg8[%c0_12, %c0_13, %c0_14] : memref<1x4x128xf32, #tpu.memory_space<vmem>>, vector<1x1x128xf32>
    %16 = vector.shape_cast %15 : vector<1x1x128xf32> to vector<1x128xf32>
    %17 = vector.shape_cast %14 : vector<1x128xf32> to vector<1x1x128xf32>
    tpu.vector_store %arg8[%c0_12, %c0_13, %c0_14], %17 {strides = array<i32>} : memref<1x4x128xf32, #tpu.memory_space<vmem>>, vector<1x1x128xf32>,
    %c0_15 = arith.constant 0 : index
    %c0_16 = arith.constant 0 : index
    %c0_17 = arith.constant 0 : index
    %18 = vector.load %arg4[%c0_15, %c0_16, %c0_17] : memref<1x256x4xf32, #tpu.memory_space<vmem>>, vector<1x256x1xf32>
    %19 = vector.shape_cast %18 : vector<1x256x1xf32> to vector<256x1xf32>
    %c0_18 = arith.constant 0 : index
    %c0_19 = arith.constant 0 : index
    %20 = vector.load %arg9[%c0_18, %c0_19] : memref<256x128xf32, #tpu.memory_space<vmem>>, vector<256x128xf32>
    %21 = vector.broadcast %4 : f32 to vector<256x128xf32>
    %22 = arith.mulf %21, %20 : vector<256x128xf32>
    %23 = vector.broadcast %3 : f32 to vector<1x128xf32>
    %24 = arith.mulf %23, %14 : vector<1x128xf32>
    %25 = vector.broadcast %19 : vector<256x1xf32> to vector<256x128xf32>
    %26 = vector.broadcast %24 : vector<1x128xf32> to vector<256x128xf32>
    %27 = arith.mulf %25, %26 : vector<256x128xf32>
    %28 = arith.addf %22, %27 : vector<256x128xf32>
    %c0_20 = arith.constant 0 : index
    %c0_21 = arith.constant 0 : index
    %29 = vector.load %arg9[%c0_20, %c0_21] : memref<256x128xf32, #tpu.memory_space<vmem>>, vector<256x128xf32>
    tpu.vector_store %arg9[%c0_20, %c0_21], %28 {strides = array<i32>} : memref<256x128xf32, #tpu.memory_space<vmem>>, vector<256x128xf32>,
    %c0_22 = arith.constant 0 : index
    %c1 = arith.constant 1 : index
    %c0_23 = arith.constant 0 : index
    %30 = vector.load %arg3[%c0_22, %c1, %c0_23] : memref<1x4x256xf32, #tpu.memory_space<vmem>>, vector<1x1x256xf32>
    %31 = vector.shape_cast %30 : vector<1x1x256xf32> to vector<1x256xf32>
    %c0_24 = arith.constant 0 : index
    %c0_25 = arith.constant 0 : index
    %32 = vector.load %arg6[%c0_24, %c0_25] : memref<256x128xf32, #tpu.memory_space<vmem>>, vector<256x128xf32>
    %c0_26 = arith.constant 0 : index
    %c0_27 = arith.constant 0 : index
    %33 = vector.load %arg9[%c0_26, %c0_27] : memref<256x128xf32, #tpu.memory_space<vmem>>, vector<256x128xf32>
    %34 = arith.mulf %32, %33 : vector<256x128xf32>
    %cst_28 = arith.constant dense<0.000000e+00> : vector<1x128xf32>
    %35 = tpu.matmul %31, %34, %cst_28 {dimension_numbers = #tpu.dot_dimension_numbers<[1], [0], [0], [1], [0, 0, 1, 1], [], []>} : vector<1x256xf32>, vector<256x128xf32>, vector<1x128xf32> -> vector<1x128xf32>
    %c0_29 = arith.constant 0 : index
    %c1_30 = arith.constant 1 : index
    %c0_31 = arith.constant 0 : index
    %36 = vector.load %arg5[%c0_29, %c1_30, %c0_31] : memref<1x4x128xf32, #tpu.memory_space<vmem>>, vector<1x1x128xf32>
    %37 = vector.shape_cast %36 : vector<1x1x128xf32> to vector<1x128xf32>
    %38 = arith.addf %35, %37 : vector<1x128xf32>
    %39 = math.tanh %38 : vector<1x128xf32>
    %c0_32 = arith.constant 0 : index
    %c1_33 = arith.constant 1 : index
    %c0_34 = arith.constant 0 : index
    %40 = vector.load %arg8[%c0_32, %c1_33, %c0_34] : memref<1x4x128xf32, #tpu.memory_space<vmem>>, vector<1x1x128xf32>
    %41 = vector.shape_cast %40 : vector<1x1x128xf32> to vector<1x128xf32>
    %42 = vector.shape_cast %39 : vector<1x128xf32> to vector<1x1x128xf32>
    tpu.vector_store %arg8[%c0_32, %c1_33, %c0_34], %42 {strides = array<i32>} : memref<1x4x128xf32, #tpu.memory_space<vmem>>, vector<1x1x128xf32>,
    %c0_35 = arith.constant 0 : index
    %c0_36 = arith.constant 0 : index
    %c1_37 = arith.constant 1 : index
    %43 = vector.load %arg4[%c0_35, %c0_36, %c1_37] : memref<1x256x4xf32, #tpu.memory_space<vmem>>, vector<1x256x1xf32>
    %44 = vector.shape_cast %43 : vector<1x256x1xf32> to vector<256x1xf32>
    %c0_38 = arith.constant 0 : index
    %c0_39 = arith.constant 0 : index
    %45 = vector.load %arg9[%c0_38, %c0_39] : memref<256x128xf32, #tpu.memory_space<vmem>>, vector<256x128xf32>
    %46 = vector.broadcast %4 : f32 to vector<256x128xf32>
    %47 = arith.mulf %46, %45 : vector<256x128xf32>
    %48 = vector.broadcast %3 : f32 to vector<1x128xf32>
    %49 = arith.mulf %48, %39 : vector<1x128xf32>
    %50 = vector.broadcast %44 : vector<256x1xf32> to vector<256x128xf32>
    %51 = vector.broadcast %49 : vector<1x128xf32> to vector<256x128xf32>
    %52 = arith.mulf %50, %51 : vector<256x128xf32>
    %53 = arith.addf %47, %52 : vector<256x128xf32>
    %c0_40 = arith.constant 0 : index
    %c0_41 = arith.constant 0 : index
    %54 = vector.load %arg9[%c0_40, %c0_41] : memref<256x128xf32, #tpu.memory_space<vmem>>, vector<256x128xf32>
    tpu.vector_store %arg9[%c0_40, %c0_41], %53 {strides = array<i32>} : memref<256x128xf32, #tpu.memory_space<vmem>>, vector<256x128xf32>,
    %c0_42 = arith.constant 0 : index
    %c2 = arith.constant 2 : index
    %c0_43 = arith.constant 0 : index
    %55 = vector.load %arg3[%c0_42, %c2, %c0_43] : memref<1x4x256xf32, #tpu.memory_space<vmem>>, vector<1x1x256xf32>
    %56 = vector.shape_cast %55 : vector<1x1x256xf32> to vector<1x256xf32>
    %c0_44 = arith.constant 0 : index
    %c0_45 = arith.constant 0 : index
    %57 = vector.load %arg6[%c0_44, %c0_45] : memref<256x128xf32, #tpu.memory_space<vmem>>, vector<256x128xf32>
    %c0_46 = arith.constant 0 : index
    %c0_47 = arith.constant 0 : index
    %58 = vector.load %arg9[%c0_46, %c0_47] : memref<256x128xf32, #tpu.memory_space<vmem>>, vector<256x128xf32>
    %59 = arith.mulf %57, %58 : vector<256x128xf32>
    %cst_48 = arith.constant dense<0.000000e+00> : vector<1x128xf32>
    %60 = tpu.matmul %56, %59, %cst_48 {dimension_numbers = #tpu.dot_dimension_numbers<[1], [0], [0], [1], [0, 0, 1, 1], [], []>} : vector<1x256xf32>, vector<256x128xf32>, vector<1x128xf32> -> vector<1x128xf32>
    %c0_49 = arith.constant 0 : index
    %c2_50 = arith.constant 2 : index
    %c0_51 = arith.constant 0 : index
    %61 = vector.load %arg5[%c0_49, %c2_50, %c0_51] : memref<1x4x128xf32, #tpu.memory_space<vmem>>, vector<1x1x128xf32>
    %62 = vector.shape_cast %61 : vector<1x1x128xf32> to vector<1x128xf32>
    %63 = arith.addf %60, %62 : vector<1x128xf32>
    %64 = math.tanh %63 : vector<1x128xf32>
    %c0_52 = arith.constant 0 : index
    %c2_53 = arith.constant 2 : index
    %c0_54 = arith.constant 0 : index
    %65 = vector.load %arg8[%c0_52, %c2_53, %c0_54] : memref<1x4x128xf32, #tpu.memory_space<vmem>>, vector<1x1x128xf32>
    %66 = vector.shape_cast %65 : vector<1x1x128xf32> to vector<1x128xf32>
    %67 = vector.shape_cast %64 : vector<1x128xf32> to vector<1x1x128xf32>
    tpu.vector_store %arg8[%c0_52, %c2_53, %c0_54], %67 {strides = array<i32>} : memref<1x4x128xf32, #tpu.memory_space<vmem>>, vector<1x1x128xf32>,
    %c0_55 = arith.constant 0 : index
    %c0_56 = arith.constant 0 : index
    %c2_57 = arith.constant 2 : index
    %68 = vector.load %arg4[%c0_55, %c0_56, %c2_57] : memref<1x256x4xf32, #tpu.memory_space<vmem>>, vector<1x256x1xf32>
    %69 = vector.shape_cast %68 : vector<1x256x1xf32> to vector<256x1xf32>
    %c0_58 = arith.constant 0 : index
    %c0_59 = arith.constant 0 : index
    %70 = vector.load %arg9[%c0_58, %c0_59] : memref<256x128xf32, #tpu.memory_space<vmem>>, vector<256x128xf32>
    %71 = vector.broadcast %4 : f32 to vector<256x128xf32>
    %72 = arith.mulf %71, %70 : vector<256x128xf32>
    %73 = vector.broadcast %3 : f32 to vector<1x128xf32>
    %74 = arith.mulf %73, %64 : vector<1x128xf32>
    %75 = vector.broadcast %69 : vector<256x1xf32> to vector<256x128xf32>
    %76 = vector.broadcast %74 : vector<1x128xf32> to vector<256x128xf32>
    %77 = arith.mulf %75, %76 : vector<256x128xf32>
    %78 = arith.addf %72, %77 : vector<256x128xf32>
    %c0_60 = arith.constant 0 : index
    %c0_61 = arith.constant 0 : index
    %79 = vector.load %arg9[%c0_60, %c0_61] : memref<256x128xf32, #tpu.memory_space<vmem>>, vector<256x128xf32>
    tpu.vector_store %arg9[%c0_60, %c0_61], %78 {strides = array<i32>} : memref<256x128xf32, #tpu.memory_space<vmem>>, vector<256x128xf32>,
    %c0_62 = arith.constant 0 : index
    %c3 = arith.constant 3 : index
    %c0_63 = arith.constant 0 : index
    %80 = vector.load %arg3[%c0_62, %c3, %c0_63] : memref<1x4x256xf32, #tpu.memory_space<vmem>>, vector<1x1x256xf32>
    %81 = vector.shape_cast %80 : vector<1x1x256xf32> to vector<1x256xf32>
    %c0_64 = arith.constant 0 : index
    %c0_65 = arith.constant 0 : index
    %82 = vector.load %arg6[%c0_64, %c0_65] : memref<256x128xf32, #tpu.memory_space<vmem>>, vector<256x128xf32>
    %c0_66 = arith.constant 0 : index
    %c0_67 = arith.constant 0 : index
    %83 = vector.load %arg9[%c0_66, %c0_67] : memref<256x128xf32, #tpu.memory_space<vmem>>, vector<256x128xf32>
    %84 = arith.mulf %82, %83 : vector<256x128xf32>
    %cst_68 = arith.constant dense<0.000000e+00> : vector<1x128xf32>
    %85 = tpu.matmul %81, %84, %cst_68 {dimension_numbers = #tpu.dot_dimension_numbers<[1], [0], [0], [1], [0, 0, 1, 1], [], []>} : vector<1x256xf32>, vector<256x128xf32>, vector<1x128xf32> -> vector<1x128xf32>
    %c0_69 = arith.constant 0 : index
    %c3_70 = arith.constant 3 : index
    %c0_71 = arith.constant 0 : index
    %86 = vector.load %arg5[%c0_69, %c3_70, %c0_71] : memref<1x4x128xf32, #tpu.memory_space<vmem>>, vector<1x1x128xf32>
    %87 = vector.shape_cast %86 : vector<1x1x128xf32> to vector<1x128xf32>
    %88 = arith.addf %85, %87 : vector<1x128xf32>
    %89 = math.tanh %88 : vector<1x128xf32>
    %c0_72 = arith.constant 0 : index
    %c3_73 = arith.constant 3 : index
    %c0_74 = arith.constant 0 : index
    %90 = vector.load %arg8[%c0_72, %c3_73, %c0_74] : memref<1x4x128xf32, #tpu.memory_space<vmem>>, vector<1x1x128xf32>
    %91 = vector.shape_cast %90 : vector<1x1x128xf32> to vector<1x128xf32>
    %92 = vector.shape_cast %89 : vector<1x128xf32> to vector<1x1x128xf32>
    tpu.vector_store %arg8[%c0_72, %c3_73, %c0_74], %92 {strides = array<i32>} : memref<1x4x128xf32, #tpu.memory_space<vmem>>, vector<1x1x128xf32>,
    %c0_75 = arith.constant 0 : index
    %c0_76 = arith.constant 0 : index
    %c3_77 = arith.constant 3 : index
    %93 = vector.load %arg4[%c0_75, %c0_76, %c3_77] : memref<1x256x4xf32, #tpu.memory_space<vmem>>, vector<1x256x1xf32>
    %94 = vector.shape_cast %93 : vector<1x256x1xf32> to vector<256x1xf32>
    %c0_78 = arith.constant 0 : index
    %c0_79 = arith.constant 0 : index
    %95 = vector.load %arg9[%c0_78, %c0_79] : memref<256x128xf32, #tpu.memory_space<vmem>>, vector<256x128xf32>
    %96 = vector.broadcast %4 : f32 to vector<256x128xf32>
    %97 = arith.mulf %96, %95 : vector<256x128xf32>
    %98 = vector.broadcast %3 : f32 to vector<1x128xf32>
    %99 = arith.mulf %98, %89 : vector<1x128xf32>
    %100 = vector.broadcast %94 : vector<256x1xf32> to vector<256x128xf32>
    %101 = vector.broadcast %99 : vector<1x128xf32> to vector<256x128xf32>
    %102 = arith.mulf %100, %101 : vector<256x128xf32>
    %103 = arith.addf %97, %102 : vector<256x128xf32>
    %c0_80 = arith.constant 0 : index
    %c0_81 = arith.constant 0 : index
    %104 = vector.load %arg9[%c0_80, %c0_81] : memref<256x128xf32, #tpu.memory_space<vmem>>, vector<256x128xf32>
    tpu.vector_store %arg9[%c0_80, %c0_81], %103 {strides = array<i32>} : memref<256x128xf32, #tpu.memory_space<vmem>>, vector<256x128xf32>,
    return
  }
  func.func @transform_0(%arg0: i32, %arg1: i32) -> i32 {
    %c0_i32 = arith.constant 0 : i32
    %c0_i32_0 = arith.constant 0 : i32
    return %c0_i32 : i32
  }
  func.func @transform_1(%arg0: i32, %arg1: i32) -> (i32, i32, i32) {
    %c0_i32 = arith.constant 0 : i32
    %c0_i32_0 = arith.constant 0 : i32
    %c0_i32_1 = arith.constant 0 : i32
    return %arg1, %c0_i32, %c0_i32_0 : i32, i32, i32
  }
  func.func @transform_2(%arg0: i32, %arg1: i32) -> (i32, i32, i32) {
    %c0_i32 = arith.constant 0 : i32
    %c0_i32_0 = arith.constant 0 : i32
    %c0_i32_1 = arith.constant 0 : i32
    return %arg1, %c0_i32, %c0_i32_0 : i32, i32, i32
  }
  func.func @transform_3(%arg0: i32, %arg1: i32) -> (i32, i32, i32) {
    %c0_i32 = arith.constant 0 : i32
    %c0_i32_0 = arith.constant 0 : i32
    return %arg1, %c0_i32, %arg0 : i32, i32, i32
  }
  func.func @transform_4(%arg0: i32, %arg1: i32) -> (i32, i32) {
    %c0_i32 = arith.constant 0 : i32
    %c0_i32_0 = arith.constant 0 : i32
    return %c0_i32, %arg0 : i32, i32
  }
  func.func @transform_5(%arg0: i32, %arg1: i32) -> (i32, i32) {
    %c0_i32 = arith.constant 0 : i32
    %c0_i32_0 = arith.constant 0 : i32
    return %c0_i32, %arg0 : i32, i32
  }
  func.func @transform_6(%arg0: i32, %arg1: i32) -> (i32, i32, i32) {
    %c0_i32 = arith.constant 0 : i32
    %c0_i32_0 = arith.constant 0 : i32
    return %arg1, %c0_i32, %arg0 : i32, i32, i32
  }
  func.func @transform_7(%arg0: i32, %arg1: i32) -> (i32, i32) {
    %c0_i32 = arith.constant 0 : i32
    %c0_i32_0 = arith.constant 0 : i32
    return %c0_i32, %arg0 : i32, i32
  }
}

</mosaic_0001>

<bundles_post_ra>
// kernel: tpu_custom_call.1
= control target key start
LH: loop header
LB: loop body
LE: loop exit
PB: predicated region body
PF: predicated region fallthrough
CT: control target
= control target key end

     0   :  { %s6144_s0 = inlined_call_operand.<no memory space> [shape: f32[1], index: 0, kind: input, shape index: {}]   ;;  %s6145_s1 = inlined_call_operand.vmem [shape: f32[2,4,256], index: 1, kind: input, shape index: {}]   ;;  %s6146_s2 = inlined_call_operand.vmem [shape: f32[2,256,4], index: 2, kind: input, shape index: {}]   ;;  %s6147_s3 = inlined_call_operand.hbm [shape: f32[2,4,256], index: 3, kind: input, shape index: {}]   ;;  %s6148_s4 = inlined_call_operand.vmem [shape: f32[256,256], index: 4, kind: input, shape index: {}]   ;;  %s6149_s5 = inlined_call_operand.hbm [shape: f32[256,256], index: 5, kind: input, shape index: {}]   ;;  %s6150_s6 = inlined_call_operand.hbm [shape: f32[2,4,256], index: 6, kind: output, shape index: {0}]   ;;  %s6151_s7 = inlined_call_operand.hbm [shape: f32[256,256], index: 7, kind: output, shape index: {1}]  }
   0x1   :  { %6282 = sst [smem:[#allocation95_spill]] %s6147_s3 }
   0x2   :  { %6283 = sst [smem:[#allocation96_spill]] %s6148_s4 }
   0x3   :  { %6284 = sst [smem:[#allocation97_spill]] %s6150_s6 }
   0x4   :  { %6285 = sst [smem:[#allocation98_spill]] %s6151_s7 }
   0x5   :  { %13 = sst [smem:[#allocation2]] %s6144_s0 }
   0x6   :  { %14 = vsyncpa [#allocation4], 0 }
   0x7   :  { %16 = vsyncpa [#allocation4 + $0x1], 0 }
   0x8   :  { %17 = vsyncpa [#allocation8], 0 }
   0x9   :  { %19 = vsyncpa [#allocation8 + $0x1], 0 }
   0xa   :  { %20 = vsyncpa [#allocation5], 0 }
   0xb   :  { %22 = vsyncpa [#allocation5 + $0x1], 0 }
   0xc   :  { %23 = vsyncpa [#allocation11], 0 }
   0xd   :  { %25 = vsyncpa [#allocation11 + $0x1], 0  ;;  %s3731_s26 = smov 0   ;;  %s3733_s27 = smov 0  }
   0xe   :  { %s3735_s28 = smov 0   ;;  %s3737_s29 = smov 0  }
   0xf   :  { %s3739_s30 = smov 0   ;;  %s3741_s8 = smov 0  }
  0x10   :  { %s3743_s0 = smov 0   ;;  %s3745_s9 = smov 0  }
  0x11   :  { %s3747_s10 = smov 0   ;;  %s3749_s11 = smov 0  }
  0x12   :  { %s3751_s12 = smov 0  }
  0x13 LB: > { %6286 = sst [smem:[#allocation16_spill]] %s3632_s26  ;;  %s3026_s13 = sadd.s32 4294967295, %s3672_s12   ;;  %s3672_s12 = sphi %s3751_s12, %s31_s12   ;;  %s3668_s11 = sphi %s3749_s11, %s6657_s11   ;;  %s3664_s10 = sphi %s3747_s10, %s6656_s10   ;;  %s3660_s9 = sphi %s3745_s9, %s6655_s9   ;;  %s3656_s0 = sphi %s3743_s0, %s6646_s0   ;;  %s3652_s8 = sphi %s3741_s8, %s6654_s8   ;;  %s3648_s30 = sphi %s3739_s30, %s6653_s30   ;;  %s3644_s29 = sphi %s3737_s29, %s6652_s29   ;;  %s3640_s28 = sphi %s3735_s28, %s6651_s28   ;;  %s3636_s27 = sphi %s3733_s27, %s6650_s27   ;;  %s3632_s26 = sphi %s3731_s26, %s6649_s26  }
  0x14   : > { %6287 = sst [smem:[#allocation17_spill]] %s3644_s29  ;;  %s3027_s14 = sadd.s32 4294967294, %s3672_s12  }
  0x15   : > { %6288 = sst [smem:[#allocation18_spill]] %s3664_s10  ;;  %s40_s15 = sadd.s32 1, %s3664_s10 }
  0x16   : > { %s43_s16 = sadd.s32 1, %s3668_s11  ;;  %p41_p0 = scmp.ge.s32.totalorder %s40_s15, 2 }
  0x17   : > { %s125_s17 = sadd.s32 1, %s3652_s8  ;;  %p132_p1 = scmp.ne.s32.totalorder %s3652_s8, %s3648_s30 }
  0x18   : > { %p133_p2 = scmp.eq.s32.totalorder %s3672_s12, 0  ;;  %s6659_s15 = smov (%p41_p0, %s40_s15), 0 }
  0x19   : > { %6289 = sst [smem:[#allocation19_spill]] %s6659_s15  ;;  %s6661_s16 = smov (!%p41_p0, %s43_s16), %s3668_s11 }
  0x1a   : > { %s120_s18 = ssub.s32 %s3664_s10, %s6659_s15  ;;  %p3804_p3 = por %p133_p2, %p132_p1 }
  0x1b   : > { %p45_p4 = scmp.ge.s32.totalorder %s6661_s16, 2  ;;  %p6155_p5 = scmp.ne.s32.totalorder %s3648_s30, %s3644_s29 }
  0x1c   : > { %p3810_p6 = scmp.eq.s32.totalorder %s3026_s13, 0  ;;  %s151_s21 = sadd.s32 1, %s3640_s28 }
  0x1d   : > { %s6663_s16 = smov (%p45_p4, %s6661_s16), 0  ;;  %p158_p8 = scmp.ne.s32.totalorder %s3640_s28, %s3636_s27 }
  0x1e   : > { %6292 = sst [smem:[#allocation20_spill]] %s6663_s16  ;;  %p3822_p7 = por %p3810_p6, %p6155_p5 }
  0x1f   : > { %s121_s23 = ssub.s32 %s3668_s11, %s6663_s16  ;;  %p190_p9 = scmp.ne.s32.totalorder %s3636_s27, %s3632_s26 }
  0x20   : > { %s6293_s22 = scalar_select %p3822_p7, 1, 0 }
  0x21   : > { %s122_s24 = sor.u32 %s121_s23, %s120_s18  ;;  %p149_p10 = scmp.eq.s32.totalorder %s121_s23, 0 }
  0x22   : > { %p123_p11 = scmp.eq.s32.totalorder %s122_s24, 0  ;;  %p3837_p12 = por %p158_p8, %p133_p2 }
  0x23   : > { %s3842_s15 = scalar_select %p149_p10, %s3640_s28, %s151_s21  }
  0x24   : > { %s6294_s25 = scalar_select %p3837_p12, 1, 0 }
  0x25   : > { %6295 = sst [smem:[#allocation21_spill]] %s3842_s15  ;;  %p3852_p13 = por %p190_p9, %p3810_p6 }
  0x26   : > { %s3845_s7 = scalar_select %p123_p11, %s3652_s8, %s125_s17  }
  0x27   : > { %s6297_s6 = scalar_select %p3852_p13, 1, 0 }
  0x28   : > { %6296 = sst [smem:[#allocation22_spill]] %s3845_s7  ;;  %p216_p0 = scmp.eq.s32.totalorder %s3026_s13, 3 }
  0x29   : > { %p222_p4 = scmp.eq.s32.totalorder %s3027_s14, 3  ;;  %p6301_p10 = scmp.ne.s32.totalorder %s3648_s30, %s3644_s29 }
  0x2a   : > { %p3859_p5 = por %p216_p0, %p132_p1  ;;  %p3866_p2 = por %p216_p0, %p158_p8 }
  0x2b   : > { %p3873_p11 = por %p222_p4, %p6301_p10  ;;  %p3880_p6 = por %p222_p4, %p190_p9 }
  0x2c   : > { %s6298_s18 = scalar_select %p3859_p5, 1, 0 }
  0x2d   : > { %s6299_s23 = scalar_select %p3866_p2, 1, 0 }
  0x2e   : > { %s6302_s17 = scalar_select %p3873_p11, 1, 0 }
  0x2f   : > { %6300 = sst [smem:[#allocation23_spill]] %s6299_s23  ;;  %p3029_p1 = scmp.ge.s32.totalorder %s3672_s12, 4 }
  0x30   : > { %6303 = sst [smem:[#allocation24_spill]] %s6302_s17  ;;  %s287_s13 = sand.u32 (!%p3029_p1), 1, %s3652_s8  }
  0x31   : > { %s6304_s20 = scalar_select %p3880_p6, 1, 0 }
  0x32   : > { %267 = sbr.rel (%p3029_p1) target bundleno = 137 (0x89), region = 20  ;;  %s3031_s14 = sshll.u32 (!%p3029_p1), %s3664_s10, 1 }
  0x33   : > { %6305 = sst [smem:[#allocation25_spill]] %s6304_s20  ;;  %s3030_s21 = sshll.u32 (!%p3029_p1), %s287_s13, 2 }
  0x34   : > { %s296_s24 = sadd.s32 (!%p3029_p1), %s3668_s11, %s3031_s14  ;;  %s291_s7 = scalar_lea.vmem (!%p3029_p1), [#allocation3], %s3030_s21 }
  0x35   : > { %s3032_s16 = sshll.u32 (!%p3029_p1), %s296_s24, 6  ;;  %s300_s15 = sshll.u32 (!%p3029_p1), %s291_s7, 4  ;;  %s301_s15 = int_to_ptr.vmem [resolvable:$true] %s300_s15 }
  0x36   : > { %s6306_s3 = sld [smem:[#allocation95_spill]] (!%p3029_p1)  ;;  %s288_s20 = scalar_lea.sflag (!%p3029_p1), [#allocation4], %s287_s13 }
  0x3c   : > { %s3891_s29 = scalar_lea.hbm %s6306_s3, %s3032_s16  ;;  %s3462_s7 = scalar_lea.hbm %s6306_s3, 256 }
  0x3d   : > { %s3458_s23 = scalar_lea.hbm %s3891_s29, 64  ;;  %p3463_p4 = scmp.lt.u32.totalorder %s3891_s29, %s6306_s3 }
  0x3e   : > { %p3459_p8 = scmp.ne.s32.totalorder %s3891_s29, %s3458_s23  ;;  %p3464_p10 = scmp.lt.u32.totalorder %s3462_s7, %s3458_s23 }
  0x3f   : > { %p3466_p6 = scmp.lt.u32.totalorder %s3458_s23, %s3891_s29 }
  0x40   : > { %p3460_p9 = pnand %p3459_p8, %p3804_p3  ;;  %p3465_p1 = por %p3464_p10, %p3463_p4 }
  0x42   : > { %p3461_p0 = pneg %p3460_p9  ;;  %p3467_p11 = por %p3466_p6, %p3465_p1 }
  0x44   : > { %p3468_p2 = pnand %p3467_p11, %p3461_p0 }
  0x46   : > { %3471 = shalt.err (!%p3468_p2)
}
  0x47   : > { %s3472_s26 = scalar_lea.vmem %s301_s15, 64  ;;  %s3674_s16 = smov [#allocation3]  }
  0x48   : > { %p3473_p5 = scmp.ne.s32.totalorder %s301_s15, %s3472_s26  ;;  %s3476_s17 = sshll.u32 %s3674_s16, 4  ;;  %s3477_s17 = int_to_ptr.vmem [resolvable:$false] %s3476_s17 }
  0x49   : > { %s3478_s13 = scalar_lea.vmem %s3477_s17, 128  ;;  %p3479_p13 = scmp.lt.s32.totalorder %s301_s15, %s3477_s17 }
  0x4a   : > { %p3474_p8 = pnand %p3473_p5, %p3804_p3  ;;  %p3480_p7 = scmp.lt.s32.totalorder %s3478_s13, %s3472_s26 }
  0x4c   : > { %p3475_p9 = pneg %p3474_p8  ;;  %p3481_p12 = por %p3480_p7, %p3479_p13 }
  0x4e   : > { %p3482_p4 = pnand %p3481_p12, %p3475_p9 }
  0x50   : > { %3485 = shalt.err (!%p3482_p4)
}
  0x51   : > { %3328 = dma.hbm_to_vmem [thread:$0]  (%p3804_p3), %s3891_s29, 64, %s301_s15, %s288_s20  }
  0x52   : > { %p6307_p2 = scmp.ne.s32.totalorder %s6294_s25, 0 }
  0x53   : > { %s308_s10 = sand.u32 (%p6307_p2), 1, %s3640_s28   ;;  %s3034_s23 = sshll.u32 (%p6307_p2), %s3668_s11, 3 }
  0x54   : > { %306 = sbr.rel (!%p6307_p2) target bundleno = 109 (0x6d), region = 36  ;;  %s3033_s14 = sshll.u32 (%p6307_p2), %s308_s10, 8 }
  0x55   : > { %s6308_s4 = sld [smem:[#allocation96_spill]] (%p6307_p2)  ;;  %s3922_s29 = scalar_lea.vmem (%p6307_p2), [#allocation6], %s3033_s14 }
  0x5b   : > { %s3917_s21 = scalar_lea.vmem %s6308_s4, %s3034_s23 }
  0x5c   : > { %v402_v0 = vld [vmem:[%s3917_s21] sm:$0xff]  ;;  %v404_v1 = vld [vmem:[%s3917_s21 + $0x10] sm:$0xff] }
  0x5d   : > { %v406_v2 = vld [vmem:[%s3917_s21 + $0x20] sm:$0xff]  ;;  %403 = vst [vmem:[%s3922_s29] sm:$0xff] %v402_v0  ;;  %405 = vst [vmem:[%s3922_s29 + $0x8] sm:$0xff] %v404_v1  ;;  %v408_v3 = vld [vmem:[%s3917_s21 + $0x30] sm:$0xff] }
  0x5e   : > { %407 = vst [vmem:[%s3922_s29 + $0x10] sm:$0xff] %v406_v2  ;;  %v410_v4 = vld [vmem:[%s3917_s21 + $0x40] sm:$0xff]  ;;  %v412_v5 = vld [vmem:[%s3917_s21 + $0x50] sm:$0xff]  ;;  %409 = vst [vmem:[%s3922_s29 + $0x18] sm:$0xff] %v408_v3 }
  0x5f   : > { %411 = vst [vmem:[%s3922_s29 + $0x20] sm:$0xff] %v410_v4  ;;  %413 = vst [vmem:[%s3922_s29 + $0x28] sm:$0xff] %v412_v5  ;;  %v414_v6 = vld [vmem:[%s3917_s21 + $0x60] sm:$0xff]  ;;  %v416_v7 = vld [vmem:[%s3917_s21 + $0x70] sm:$0xff] }
  0x60   : > { %v418_v8 = vld [vmem:[%s3917_s21 + $0x80] sm:$0xff]  ;;  %415 = vst [vmem:[%s3922_s29 + $0x30] sm:$0xff] %v414_v6  ;;  %417 = vst [vmem:[%s3922_s29 + $0x38] sm:$0xff] %v416_v7  ;;  %v420_v9 = vld [vmem:[%s3917_s21 + $0x90] sm:$0xff] }
  0x61   : > { %419 = vst [vmem:[%s3922_s29 + $0x40] sm:$0xff] %v418_v8  ;;  %v422_v10 = vld [vmem:[%s3917_s21 + $0xa0] sm:$0xff]  ;;  %v424_v11 = vld [vmem:[%s3917_s21 + $0xb0] sm:$0xff]  ;;  %421 = vst [vmem:[%s3922_s29 + $0x48] sm:$0xff] %v420_v9 }
  0x62   : > { %423 = vst [vmem:[%s3922_s29 + $0x50] sm:$0xff] %v422_v10  ;;  %425 = vst [vmem:[%s3922_s29 + $0x58] sm:$0xff] %v424_v11  ;;  %v426_v12 = vld [vmem:[%s3917_s21 + $0xc0] sm:$0xff]  ;;  %v428_v13 = vld [vmem:[%s3917_s21 + $0xd0] sm:$0xff] }
  0x63   : > { %v430_v14 = vld [vmem:[%s3917_s21 + $0xe0] sm:$0xff]  ;;  %427 = vst [vmem:[%s3922_s29 + $0x60] sm:$0xff] %v426_v12  ;;  %429 = vst [vmem:[%s3922_s29 + $0x68] sm:$0xff] %v428_v13  ;;  %v432_v15 = vld [vmem:[%s3917_s21 + $0xf0] sm:$0xff] }
  0x64   : > { %431 = vst [vmem:[%s3922_s29 + $0x70] sm:$0xff] %v430_v14  ;;  %v434_v16 = vld [vmem:[%s3917_s21 + $0x100] sm:$0xff]  ;;  %v436_v17 = vld [vmem:[%s3917_s21 + $0x110] sm:$0xff]  ;;  %433 = vst [vmem:[%s3922_s29 + $0x78] sm:$0xff] %v432_v15 }
  0x65   : > { %435 = vst [vmem:[%s3922_s29 + $0x80] sm:$0xff] %v434_v16  ;;  %437 = vst [vmem:[%s3922_s29 + $0x88] sm:$0xff] %v436_v17  ;;  %v438_v18 = vld [vmem:[%s3917_s21 + $0x120] sm:$0xff]  ;;  %v440_v19 = vld [vmem:[%s3917_s21 + $0x130] sm:$0xff] }
  0x66   : > { %v442_v20 = vld [vmem:[%s3917_s21 + $0x140] sm:$0xff]  ;;  %439 = vst [vmem:[%s3922_s29 + $0x90] sm:$0xff] %v438_v18  ;;  %441 = vst [vmem:[%s3922_s29 + $0x98] sm:$0xff] %v440_v19  ;;  %v444_v21 = vld [vmem:[%s3917_s21 + $0x150] sm:$0xff] }
  0x67   : > { %443 = vst [vmem:[%s3922_s29 + $0xa0] sm:$0xff] %v442_v20  ;;  %v446_v22 = vld [vmem:[%s3917_s21 + $0x160] sm:$0xff]  ;;  %v448_v23 = vld [vmem:[%s3917_s21 + $0x170] sm:$0xff]  ;;  %445 = vst [vmem:[%s3922_s29 + $0xa8] sm:$0xff] %v444_v21 }
  0x68   : > { %447 = vst [vmem:[%s3922_s29 + $0xb0] sm:$0xff] %v446_v22  ;;  %449 = vst [vmem:[%s3922_s29 + $0xb8] sm:$0xff] %v448_v23  ;;  %v450_v24 = vld [vmem:[%s3917_s21 + $0x180] sm:$0xff]  ;;  %v452_v25 = vld [vmem:[%s3917_s21 + $0x190] sm:$0xff] }
  0x69   : > { %v454_v26 = vld [vmem:[%s3917_s21 + $0x1a0] sm:$0xff]  ;;  %451 = vst [vmem:[%s3922_s29 + $0xc0] sm:$0xff] %v450_v24  ;;  %453 = vst [vmem:[%s3922_s29 + $0xc8] sm:$0xff] %v452_v25  ;;  %v456_v27 = vld [vmem:[%s3917_s21 + $0x1b0] sm:$0xff] }
  0x6a   : > { %455 = vst [vmem:[%s3922_s29 + $0xd0] sm:$0xff] %v454_v26  ;;  %v458_v28 = vld [vmem:[%s3917_s21 + $0x1c0] sm:$0xff]  ;;  %v460_v29 = vld [vmem:[%s3917_s21 + $0x1d0] sm:$0xff]  ;;  %457 = vst [vmem:[%s3922_s29 + $0xd8] sm:$0xff] %v456_v27 }
  0x6b   : > { %459 = vst [vmem:[%s3922_s29 + $0xe0] sm:$0xff] %v458_v28  ;;  %461 = vst [vmem:[%s3922_s29 + $0xe8] sm:$0xff] %v460_v29  ;;  %v462_v30 = vld [vmem:[%s3917_s21 + $0x1e0] sm:$0xff]  ;;  %v464_v31 = vld [vmem:[%s3917_s21 + $0x1f0] sm:$0xff] }
  0x6c   : > { %463 = vst [vmem:[%s3922_s29 + $0xf0] sm:$0xff] %v462_v30  ;;  %465 = vst [vmem:[%s3922_s29 + $0xf8] sm:$0xff] %v464_v31 }
  0x6d PF: > { %s472_s15 = sand.u32 1, %s3640_s28   ;;  %s3036_s19 = sshll.u32 %s3668_s11, 7 }
  0x6e   : > { %s3035_s20 = sshll.u32 %s472_s15, 8  ;;  %s3990_s17 = scalar_lea.hbm %s6149_s5, %s3036_s19 }
  0x6f   : > { %s476_s13 = scalar_lea.vmem [#allocation7], %s3035_s20  ;;  %s3994_s23 = scalar_lea.sflag [#allocation8], %s472_s15 }
  0x70   : > { %s482_s10 = sshll.u32 %s476_s13, 4  ;;  %s3486_s14 = scalar_lea.hbm %s3990_s17, 4096  ;;  %s3992_s10 = int_to_ptr.vmem [resolvable:$true] %s482_s10 }
  0x71   : > { %p3487_p3 = scmp.ne.s32.totalorder %s3990_s17, %s3486_s14  ;;  %p6309_p5 = scmp.ne.s32.totalorder %s6294_s25, 0 }
  0x72   : > { %s3490_s21 = scalar_lea.hbm %s6149_s5, 8192  ;;  %p3491_p13 = scmp.lt.u32.totalorder %s3990_s17, %s6149_s5 }
  0x73   : > { %p3488_p7 = pnand %p3487_p3, %p6309_p5  ;;  %p3492_p11 = scmp.lt.u32.totalorder %s3490_s21, %s3486_s14 }
  0x74   : > { %p3494_p0 = scmp.lt.u32.totalorder %s3486_s14, %s3990_s17 }
  0x75   : > { %p3489_p12 = pneg %p3488_p7  ;;  %p3493_p6 = por %p3492_p11, %p3491_p13 }
  0x77   : > { %p3495_p10 = por %p3494_p0, %p3493_p6 }
  0x79   : > { %p3496_p1 = pnand %p3495_p10, %p3489_p12 }
  0x7b   : > { %3499 = shalt.err (!%p3496_p1)
}
  0x7c   : > { %s3500_s15 = scalar_lea.vmem %s3992_s10, 4096  ;;  %s3675_s20 = smov [#allocation7]  }
  0x7d   : > { %p3501_p8 = scmp.ne.s32.totalorder %s3992_s10, %s3500_s15  ;;  %s3504_s26 = sshll.u32 %s3675_s20, 4  ;;  %s3505_s26 = int_to_ptr.vmem [resolvable:$false] %s3504_s26 }
  0x7e   : > { %s3506_s16 = scalar_lea.vmem %s3505_s26, 8192  ;;  %p3507_p2 = scmp.lt.s32.totalorder %s3992_s10, %s3505_s26 }
  0x7f   : > { %p3502_p9 = pnand %p3501_p8, %p6309_p5  ;;  %p3508_p3 = scmp.lt.s32.totalorder %s3506_s16, %s3500_s15 }
  0x81   : > { %p3503_p4 = pneg %p3502_p9  ;;  %p3509_p7 = por %p3508_p3, %p3507_p2 }
  0x83   : > { %p3510_p13 = pnand %p3509_p7, %p3503_p4 }
  0x85   : > { %3513 = shalt.err (!%p3510_p13)
}
  0x86   : > { %s3676_s13 = smov 256   ;;  %s3677_s14 = smov 128  }
  0x87   : > { %s3678_s24 = smov 8  }
  0x88   : > { %3329 = dma.hbm_to_vmem [thread:$0]  (%p6309_p5), %s3990_s17, 4096, %s3992_s10, %s3994_s23, %s3676_s13, %s3677_s14, %s3678_s24  }
  0x89 PF: > { %p3037_p12 = scmp.ge.s32.totalorder %s3672_s12, 1  ;;  %p490_p11 = scmp.lt.s32.totalorder %s3672_s12, 5 }
  0x8b   : > { %p491_p6 = pnand %p3037_p12, %p490_p11 }
  0x8d   : > { %494 = sbr.rel (%p491_p6) target bundleno = 1352 (0x548), region = 78 }
  0x94   : > { %s4021_s7 = sand.u32 1, %s3648_s30   ;;  %p6310_p0 = scmp.ne.s32.totalorder %s6293_s22, 0 }
  0x95   : > { %s3038_s21 = sshll.u32 %s4021_s7, 2  ;;  %s497_s29 = scalar_lea.sflag [#allocation4], %s4021_s7 }
  0x96   : > { %s4025_s19 = scalar_lea.vmem [#allocation3], %s3038_s21 }
  0x97   : > { %3615 = dma.done.wait (%p6310_p0), %s497_s29, 64  }
  0x98   : > { %3617 = vsyncadd (%p6310_p0), %s497_s29, 4294967232  ;;  %s4032_s25 = sand.u32 1, %s3636_s27   ;;  %p6311_p5 = scmp.ne.s32.totalorder %s6297_s6, 0 }
  0x99   : > { %s3039_s17 = sshll.u32 %s4032_s25, 8  ;;  %s513_s23 = scalar_lea.sflag [#allocation8], %s4032_s25 }
  0x9a   : > { %s4035_s10 = scalar_lea.vmem [#allocation6], %s3039_s17  ;;  %s4038_s15 = scalar_lea.vmem [#allocation7], %s3039_s17 }
  0x9b   : > { %3619 = dma.done.wait (%p6311_p5), %s513_s23, 4096  }
  0x9c   : > { %3621 = vsyncadd (%p6311_p5), %s513_s23, 4294963200  ;;  %p571_p10 = scmp.lt.s32.totalorder %s3656_s0, 1  ;;  %s4056_s4 = scalar_lea.vmem [#allocation9], %s3038_s21 }
  0x9d   : > { %s4058_s6 = scalar_lea.vmem [#allocation10], %s3039_s17  ;;  %p3047_p1 = scmp.ne.s32.totalorder %s3656_s0, 0 }
  0x9e   : > { %s572_s22 = scalar_select %p571_p10, %s3656_s0, 1 }
  0x9f   : > { %584 = sbr.rel (%p3047_p1) target bundleno = 176 (0xb0), region = 94  ;;  %v585_v32 = vld [vmem:[%s4038_s15] sm:$0xff] (!%p3047_p1)  ;;  %v586_v33 = vld [vmem:[%s4038_s15 + $0x8] sm:$0xff] (!%p3047_p1)  ;;  %v587_v34 = vld [vmem:[%s4038_s15 + $0x10] sm:$0xff] (!%p3047_p1) }
  0xa0   : > { %s3058_s20 = sshll.u32 %s572_s22, 3  ;;  %s3059_s26 = sshll.u32 %s572_s22, 8  ;;  %617 = vst [vmem:[%s4058_s6] sm:$0xff] (!%p3047_p1), %v585_v32  ;;  %618 = vst [vmem:[%s4058_s6 + $0x8] sm:$0xff] (!%p3047_p1), %v586_v33  ;;  %v588_v35 = vld [vmem:[%s4038_s15 + $0x18] sm:$0xff] (!%p3047_p1)  ;;  %v589_v36 = vld [vmem:[%s4038_s15 + $0x20] sm:$0xff] (!%p3047_p1) }
  0xa1   : > { %s4049_s14 = scalar_lea.vmem %s6145_s1, %s3058_s20  ;;  %s4054_s3 = scalar_lea.vmem %s6146_s2, %s3059_s26  ;;  %619 = vst [vmem:[%s4058_s6 + $0x10] sm:$0xff] (!%p3047_p1), %v587_v34  ;;  %v590_v37 = vld [vmem:[%s4038_s15 + $0x28] sm:$0xff] (!%p3047_p1)  ;;  %620 = vst [vmem:[%s4058_s6 + $0x18] sm:$0xff] (!%p3047_p1), %v588_v35  ;;  %v591_v38 = vld [vmem:[%s4038_s15 + $0x30] sm:$0xff] (!%p3047_p1) }
  0xa2   : > { %621 = vst [vmem:[%s4058_s6 + $0x20] sm:$0xff] (!%p3047_p1), %v589_v36  ;;  %622 = vst [vmem:[%s4058_s6 + $0x28] sm:$0xff] (!%p3047_p1), %v590_v37  ;;  %v592_v39 = vld [vmem:[%s4038_s15 + $0x38] sm:$0xff] (!%p3047_p1)  ;;  %v593_v40 = vld [vmem:[%s4038_s15 + $0x40] sm:$0xff] (!%p3047_p1) }
  0xa3   : > { %623 = vst [vmem:[%s4058_s6 + $0x30] sm:$0xff] (!%p3047_p1), %v591_v38  ;;  %624 = vst [vmem:[%s4058_s6 + $0x38] sm:$0xff] (!%p3047_p1), %v592_v39  ;;  %v594_v41 = vld [vmem:[%s4038_s15 + $0x48] sm:$0xff] (!%p3047_p1)  ;;  %v595_v42 = vld [vmem:[%s4038_s15 + $0x50] sm:$0xff] (!%p3047_p1) }
  0xa4   : > { %625 = vst [vmem:[%s4058_s6 + $0x40] sm:$0xff] (!%p3047_p1), %v593_v40  ;;  %v596_v43 = vld [vmem:[%s4038_s15 + $0x58] sm:$0xff] (!%p3047_p1)  ;;  %626 = vst [vmem:[%s4058_s6 + $0x48] sm:$0xff] (!%p3047_p1), %v594_v41  ;;  %v597_v44 = vld [vmem:[%s4038_s15 + $0x60] sm:$0xff] (!%p3047_p1) }
  0xa5   : > { %627 = vst [vmem:[%s4058_s6 + $0x50] sm:$0xff] (!%p3047_p1), %v595_v42  ;;  %628 = vst [vmem:[%s4058_s6 + $0x58] sm:$0xff] (!%p3047_p1), %v596_v43  ;;  %v598_v45 = vld [vmem:[%s4038_s15 + $0x68] sm:$0xff] (!%p3047_p1)  ;;  %v599_v46 = vld [vmem:[%s4038_s15 + $0x70] sm:$0xff] (!%p3047_p1) }
  0xa6   : > { %629 = vst [vmem:[%s4058_s6 + $0x60] sm:$0xff] %v597_v44  ;;  %630 = vst [vmem:[%s4058_s6 + $0x68] sm:$0xff] %v598_v45  ;;  %v600_v47 = vld [vmem:[%s4038_s15 + $0x78] sm:$0xff]  ;;  %v601_v48 = vld [vmem:[%s4038_s15 + $0x80] sm:$0xff] }
  0xa7   : > { %631 = vst [vmem:[%s4058_s6 + $0x70] sm:$0xff] %v599_v46  ;;  %v602_v49 = vld [vmem:[%s4038_s15 + $0x88] sm:$0xff]  ;;  %632 = vst [vmem:[%s4058_s6 + $0x78] sm:$0xff] %v600_v47  ;;  %v603_v50 = vld [vmem:[%s4038_s15 + $0x90] sm:$0xff] }
  0xa8   : > { %633 = vst [vmem:[%s4058_s6 + $0x80] sm:$0xff] %v601_v48  ;;  %634 = vst [vmem:[%s4058_s6 + $0x88] sm:$0xff] %v602_v49  ;;  %v604_v51 = vld [vmem:[%s4038_s15 + $0x98] sm:$0xff]  ;;  %v605_v52 = vld [vmem:[%s4038_s15 + $0xa0] sm:$0xff] }
  0xa9   : > { %635 = vst [vmem:[%s4058_s6 + $0x90] sm:$0xff] %v603_v50  ;;  %636 = vst [vmem:[%s4058_s6 + $0x98] sm:$0xff] %v604_v51  ;;  %v606_v53 = vld [vmem:[%s4038_s15 + $0xa8] sm:$0xff]  ;;  %v607_v54 = vld [vmem:[%s4038_s15 + $0xb0] sm:$0xff] }
  0xaa   : > { %637 = vst [vmem:[%s4058_s6 + $0xa0] sm:$0xff] %v605_v52  ;;  %v608_v55 = vld [vmem:[%s4038_s15 + $0xb8] sm:$0xff]  ;;  %638 = vst [vmem:[%s4058_s6 + $0xa8] sm:$0xff] %v606_v53  ;;  %v609_v56 = vld [vmem:[%s4038_s15 + $0xc0] sm:$0xff] }
  0xab   : > { %639 = vst [vmem:[%s4058_s6 + $0xb0] sm:$0xff] %v607_v54  ;;  %640 = vst [vmem:[%s4058_s6 + $0xb8] sm:$0xff] %v608_v55  ;;  %v610_v57 = vld [vmem:[%s4038_s15 + $0xc8] sm:$0xff]  ;;  %v611_v58 = vld [vmem:[%s4038_s15 + $0xd0] sm:$0xff] }
  0xac   : > { %641 = vst [vmem:[%s4058_s6 + $0xc0] sm:$0xff] %v609_v56  ;;  %642 = vst [vmem:[%s4058_s6 + $0xc8] sm:$0xff] %v610_v57  ;;  %v612_v59 = vld [vmem:[%s4038_s15 + $0xd8] sm:$0xff]  ;;  %v613_v60 = vld [vmem:[%s4038_s15 + $0xe0] sm:$0xff] }
  0xad   : > { %643 = vst [vmem:[%s4058_s6 + $0xd0] sm:$0xff] %v611_v58  ;;  %v614_v61 = vld [vmem:[%s4038_s15 + $0xe8] sm:$0xff]  ;;  %644 = vst [vmem:[%s4058_s6 + $0xd8] sm:$0xff] %v612_v59  ;;  %v615_v62 = vld [vmem:[%s4038_s15 + $0xf0] sm:$0xff] }
  0xae   : > { %645 = vst [vmem:[%s4058_s6 + $0xe0] sm:$0xff] %v613_v60  ;;  %646 = vst [vmem:[%s4058_s6 + $0xe8] sm:$0xff] %v614_v61  ;;  %v616_v63 = vld [vmem:[%s4038_s15 + $0xf8] sm:$0xff] }
  0xaf   : > { %647 = vst [vmem:[%s4058_s6 + $0xf0] sm:$0xff] %v615_v62  ;;  %648 = vst [vmem:[%s4058_s6 + $0xf8] sm:$0xff] %v616_v63 }
  0xb0 PF: > { %v4126_v0 = vld [vmem:[%s4035_s10 + $0x80] sm:$0xff]  ;;  %v4129_v1 = vld [vmem:[%s4035_s10 + $0x88] sm:$0xff]  ;;  %v4135_v3 = vld [vmem:[%s4058_s6 + $0x88] sm:$0xff]  ;;  %v3679_v7 = vmov 0   ;;  %v750_v53 = vlaneseq  ;;  %s649_s21 = sld [smem:[#allocation2]]  ;;  %s2829_s23 = sshll.u32 %s4056_s4, 4  ;;  %s5880_s23 = int_to_ptr.vmem [resolvable:$true] %s2829_s23 }
  0xb1   : > { %v4132_v2 = vld [vmem:[%s4058_s6 + $0x80] sm:$0xff]  ;;  %v4140_v5 = vld [vmem:[%s4035_s10] sm:$0xff]  ;;  %3443 = vset.pattern.permute.xlu1 %v3679_v7  ;;  %3442 = vset.pattern.permute.xlu0 %v3679_v7  ;;  %v733_v8 = vmul.f32 %v4135_v3, %v4129_v1  ;;  %v4151_v10 = vld [vmem:[%s4058_s6 + $0x8] sm:$0xff]  ;;  %s6608_s22 = sld [smem:[#allocation97_spill]]  ;;  %s2809_s26 = scalar_lea.sflag [#allocation5], %s4021_s7 }
  0xb2   : > { %v732_v4 = vmul.f32 %v4132_v2, %v4126_v0  ;;  %v4143_v6 = vld [vmem:[%s4035_s10 + $0x8] sm:$0xff]  ;;  %v4154_v11 = vld [vmem:[%s4035_s10 + $0x90] sm:$0xff]  ;;  %v4161_v14 = vld [vmem:[%s4035_s10 + $0x98] sm:$0xff]  ;;  %s3514_s16 = scalar_lea.vmem %s5880_s23, 64  ;;  %p6613_p9 = scmp.ne.s32.totalorder %s6298_s18, 0 }
  0xb3   : > { %6312 = vst [vmem:[#allocation26_spill] sm:$0xff] %v4143_v6  ;;  %v4148_v9 = vld [vmem:[%s4058_s6] sm:$0xff]  ;;  %6313 = vst [vmem:[#allocation27_spill] sm:$0xff] %v4154_v11  ;;  %v717_v13 = vmul.f32 %v4151_v10, %v4143_v6  ;;  %v4164_v15 = vld [vmem:[%s4058_s6 + $0x90] sm:$0xff]  ;;  %v3680_v6 = vmov 1   ;;  %p3515_p8 = scmp.ne.s32.totalorder %s5880_s23, %s3514_s16 }
  0xb4   : > { %v716_v12 = vmul.f32 %v4148_v9, %v4140_v5  ;;  %6314 = vst [vmem:[#allocation28_spill] sm:$0xff] %v4161_v14  ;;  %v4167_v16 = vld [vmem:[%s4058_s6 + $0x98] sm:$0xff]  ;;  %v3200_v17 = vpack.c.bf16 %v733_v8, %v732_v4  ;;  %v734_v18 = vmul.f32 %v4164_v15, %v4154_v11  ;;  %v4174_v20 = vld [vmem:[%s4035_s10 + $0x10] sm:$0xff]  ;;  %v4177_v21 = vld [vmem:[%s4035_s10 + $0x18] sm:$0xff] }
  0xb5   : > { %v735_v19 = vmul.f32 %v4167_v16, %v4161_v14  ;;  %6315 = vst [vmem:[#allocation29_spill] sm:$0xff] %v4174_v20  ;;  %6316 = vst [vmem:[#allocation30_spill] sm:$0xff] %v4177_v21  ;;  %v4180_v22 = vld [vmem:[%s4058_s6 + $0x10] sm:$0xff]  ;;  %v4183_v24 = vld [vmem:[%s4058_s6 + $0x18] sm:$0xff]  ;;  %p3516_p4 = pnand %p3515_p8, %p6613_p9 }
  0xb6   : > { %v3202_v23 = vpack.c.bf16 %v717_v13, %v716_v12  ;;  %v718_v25 = vmul.f32 %v4180_v22, %v4174_v20  ;;  %v4188_v26 = vld [vmem:[%s4035_s10 + $0xa0] sm:$0xff]  ;;  %v4191_v27 = vld [vmem:[%s4035_s10 + $0xa8] sm:$0xff]  ;;  %3201 = vmatprep.subr.bf16.mxu0 %v3200_v17  ;;  %v719_v29 = vmul.f32 %v4183_v24, %v4177_v21  ;;  %v4199_v31 = vld [vmem:[%s4058_s6 + $0xa8] sm:$0xff]  ;;  %s650_s17 = ssub.f32 1.0, %s649_s21 }
  0xb7   : > { %6317 = vst [vmem:[#allocation31_spill] sm:$0xff] %v4188_v26  ;;  %6318 = vst [vmem:[#allocation32_spill] sm:$0xff] %v4191_v27  ;;  %v3204_v28 = vpack.c.bf16 %v735_v19, %v734_v18  ;;  %v4196_v30 = vld [vmem:[%s4058_s6 + $0xa0] sm:$0xff]  ;;  %v4202_v32 = vld [vmem:[%s4035_s10 + $0x20] sm:$0xff]  ;;  %v737_v34 = vmul.f32 %v4199_v31, %v4191_v27  ;;  %v4293_v19 = vshrl.u32 %v750_v53, 7  ;;  %p3517_p2 = pneg %p3516_p4 }
  0xb8   : > { %6319 = vst [vmem:[#allocation33_spill] sm:$0xff] %v4202_v32  ;;  %3203 = vmatpush3.bf16.msra.mxu0 %v3202_v23  ;;  %v736_v33 = vmul.f32 %v4196_v30, %v4188_v26  ;;  %v4209_v35 = vld [vmem:[%s4035_s10 + $0x28] sm:$0xff]  ;;  %v4215_v37 = vld [vmem:[%s4058_s6 + $0x28] sm:$0xff]  ;;  %v3206_v38 = vpack.c.bf16 %v719_v29, %v718_v25  ;;  %v4225_v42 = vld [vmem:[%s4035_s10 + $0xb8] sm:$0xff] }
  0xb9   : > { %6320 = vst [vmem:[#allocation34_spill] sm:$0xff] %v4209_v35  ;;  %v4212_v36 = vld [vmem:[%s4058_s6 + $0x20] sm:$0xff]  ;;  %3205 = vmatprep.subr.bf16.mxu0 %v3204_v28  ;;  %v721_v40 = vmul.f32 %v4215_v37, %v4209_v35  ;;  %v4222_v41 = vld [vmem:[%s4035_s10 + $0xb0] sm:$0xff]  ;;  %6322 = vst [vmem:[#allocation36_spill] sm:$0xff] %v4225_v42 }
  0xba   : > { %v720_v39 = vmul.f32 %v4212_v36, %v4202_v32  ;;  %6321 = vst [vmem:[#allocation35_spill] sm:$0xff] %v4222_v41  ;;  %v4228_v43 = vld [vmem:[%s4058_s6 + $0xb0] sm:$0xff]  ;;  %v3208_v44 = vpack.c.bf16 %v737_v34, %v736_v33  ;;  %v4231_v45 = vld [vmem:[%s4058_s6 + $0xb8] sm:$0xff]  ;;  %v4236_v47 = vld [vmem:[%s4035_s10 + $0x30] sm:$0xff] }
  0xbb   : > { %v738_v46 = vmul.f32 %v4228_v43, %v4222_v41  ;;  %6323 = vst [vmem:[#allocation37_spill] sm:$0xff] %v4236_v47  ;;  %v4239_v48 = vld [vmem:[%s4035_s10 + $0x38] sm:$0xff]  ;;  %v739_v49 = vmul.f32 %v4231_v45, %v4225_v42  ;;  %v4247_v51 = vld [vmem:[%s4058_s6 + $0x38] sm:$0xff]  ;;  %v4257_v57 = vld [vmem:[%s4035_s10 + $0xc8] sm:$0xff] }
  0xbc   : > { %6324 = vst [vmem:[#allocation38_spill] sm:$0xff] %v4239_v48  ;;  %v4244_v50 = vld [vmem:[%s4058_s6 + $0x30] sm:$0xff]  ;;  %v4250_v52 = vld [vmem:[%s4035_s10 + $0xc0] sm:$0xff]  ;;  %3207 = vmatpush3.bf16.msra.mxu0 %v3206_v38  ;;  %v3210_v54 = vpack.c.bf16 %v721_v40, %v720_v39  ;;  %v723_v56 = vmul.f32 %v4247_v51, %v4239_v48  ;;  %6326 = vst [vmem:[#allocation40_spill] sm:$0xff] %v4257_v57 }
  0xbd   : > { %6325 = vst [vmem:[#allocation39_spill] sm:$0xff] %v4250_v52  ;;  %v722_v55 = vmul.f32 %v4244_v50, %v4236_v47  ;;  %v4260_v58 = vld [vmem:[%s4058_s6 + $0xc0] sm:$0xff]  ;;  %v4263_v59 = vld [vmem:[%s4058_s6 + $0xc8] sm:$0xff]  ;;  %3209 = vmatprep.subr.bf16.mxu0 %v3208_v44  ;;  %v3212_v60 = vpack.c.bf16 %v739_v49, %v738_v46  ;;  %v4270_v63 = vld [vmem:[%s4035_s10 + $0x40] sm:$0xff] }
  0xbe   : > { %v740_v61 = vmul.f32 %v4260_v58, %v4250_v52  ;;  %v741_v62 = vmul.f32 %v4263_v59, %v4257_v57  ;;  %6327 = vst [vmem:[#allocation41_spill] sm:$0xff] %v4270_v63  ;;  %v4273_v4 = vld [vmem:[%s4035_s10 + $0x48] sm:$0xff]  ;;  %v4279_v8 = vld [vmem:[%s4058_s6 + $0x48] sm:$0xff]  ;;  %v4285_v13 = vld [vmem:[%s4035_s10 + $0xd8] sm:$0xff] }
  0xbf   : > { %6328 = vst [vmem:[#allocation42_spill] sm:$0xff] %v4273_v4  ;;  %v4276_v7 = vld [vmem:[%s4058_s6 + $0x40] sm:$0xff]  ;;  %v4282_v12 = vld [vmem:[%s4035_s10 + $0xd0] sm:$0xff]  ;;  %6330 = vst [vmem:[#allocation44_spill] sm:$0xff] %v4285_v13  ;;  %v3214_v23 = vpack.c.bf16 %v723_v56, %v722_v55  ;;  %v725_v28 = vmul.f32 %v4279_v8, %v4273_v4  ;;  %v4331_v56 = vsub.s32 1, %v4293_v19 }
  0xc0   : > { %6329 = vst [vmem:[#allocation43_spill] sm:$0xff] %v4282_v12  ;;  %v4288_v17 = vld [vmem:[%s4058_s6 + $0xd0] sm:$0xff]  ;;  %v4291_v18 = vld [vmem:[%s4058_s6 + $0xd8] sm:$0xff]  ;;  %3211 = vmatpush3.bf16.msra.mxu0 %v3210_v54  ;;  %v724_v25 = vmul.f32 %v4276_v7, %v4270_v63  ;;  %v4300_v29 = vld [vmem:[%s4035_s10 + $0x50] sm:$0xff]  ;;  %v3216_v34 = vpack.c.bf16 %v741_v62, %v740_v61 }
  0xc1   : > { %6331 = vst [vmem:[#allocation45_spill] sm:$0xff] %v4300_v29  ;;  %v4303_v33 = vld [vmem:[%s4035_s10 + $0x58] sm:$0xff]  ;;  %3213 = vmatprep.subr.bf16.mxu0 %v3212_v60  ;;  %v742_v38 = vmul.f32 %v4288_v17, %v4282_v12  ;;  %v743_v39 = vmul.f32 %v4291_v18, %v4285_v13  ;;  %v4313_v44 = vld [vmem:[%s4058_s6 + $0x58] sm:$0xff]  ;;  %v4319_v49 = vld [vmem:[%s4035_s10 + $0xe8] sm:$0xff] }
  0xc2   : > { %6332 = vst [vmem:[#allocation46_spill] sm:$0xff] %v4303_v33  ;;  %v4310_v40 = vld [vmem:[%s4058_s6 + $0x50] sm:$0xff]  ;;  %v4316_v46 = vld [vmem:[%s4035_s10 + $0xe0] sm:$0xff]  ;;  %6334 = vst [vmem:[#allocation48_spill] sm:$0xff] %v4319_v49  ;;  %v3218_v60 = vpack.c.bf16 %v725_v28, %v724_v25  ;;  %v727_v62 = vmul.f32 %v4313_v44, %v4303_v33 }
  0xc3   : > { %6333 = vst [vmem:[#allocation47_spill] sm:$0xff] %v4316_v46  ;;  %v4322_v53 = vld [vmem:[%s4058_s6 + $0xe0] sm:$0xff]  ;;  %v4325_v54 = vld [vmem:[%s4058_s6 + $0xe8] sm:$0xff]  ;;  %v4328_v55 = vld [vmem:[%s4035_s10 + $0x60] sm:$0xff]  ;;  %v726_v61 = vmul.f32 %v4310_v40, %v4300_v29  ;;  %v3220_v63 = vpack.c.bf16 %v743_v39, %v742_v38 }
  0xc4   : > { %6335 = vst [vmem:[#allocation49_spill] sm:$0xff] %v4322_v53  ;;  %6336 = vst [vmem:[#allocation50_spill] sm:$0xff] %v4325_v54  ;;  %3215 = vmatpush3.bf16.msra.mxu0 %v3214_v23  ;;  %v4338_v13 = vld [vmem:[%s4035_s10 + $0x68] sm:$0xff]  ;;  %v4344_v4 = vld [vmem:[%s4058_s6 + $0x68] sm:$0xff]  ;;  %v744_v23 = vmul.f32 %v4322_v53, %v4316_v46  ;;  %v745_v25 = vmul.f32 %v4325_v54, %v4319_v49 }
  0xc5   : > { %6337 = vst [vmem:[#allocation51_spill] sm:$0xff] %v4328_v55  ;;  %6338 = vst [vmem:[#allocation52_spill] sm:$0xff] %v4331_v56  ;;  %v4341_v12 = vld [vmem:[%s4058_s6 + $0x60] sm:$0xff]  ;;  %3217 = vmatprep.subr.bf16.mxu0 %v3216_v34  ;;  %v4351_v28 = vld [vmem:[%s4035_s10 + $0xf0] sm:$0xff]  ;;  %v3222_v49 = vpack.c.bf16 %v727_v62, %v726_v61  ;;  %v729_v48 = vmul.f32 %v4344_v4, %v4338_v13 }
  0xc6   : > { %6339 = vst [vmem:[#allocation53_spill] sm:$0xff] %v4338_v13  ;;  %6340 = vst [vmem:[#allocation54_spill] sm:$0xff] %v4341_v12  ;;  %v4354_v33 = vld [vmem:[%s4035_s10 + $0xf8] sm:$0xff]  ;;  %v4360_v57 = vld [vmem:[%s4058_s6 + $0xf8] sm:$0xff]  ;;  %v728_v46 = vmul.f32 %v4341_v12, %v4328_v55  ;;  %v3224_v35 = vpack.c.bf16 %v745_v25, %v744_v23 }
  0xc7   : > { %6341 = vst [vmem:[#allocation55_spill] sm:$0xff] %v4344_v4  ;;  %6342 = vst [vmem:[#allocation56_spill] sm:$0xff] %v4351_v28  ;;  %v4357_v29 = vld [vmem:[%s4058_s6 + $0xf0] sm:$0xff]  ;;  %v4376_v47 = vld [vmem:[%s4035_s10 + $0x70] sm:$0xff]  ;;  %v747_v61 = vmul.f32 %v4360_v57, %v4354_v33 }
  0xc8   : > { %6343 = vst [vmem:[#allocation57_spill] sm:$0xff] %v4354_v33  ;;  %6344 = vst [vmem:[#allocation58_spill] sm:$0xff] %v4357_v29  ;;  %v651_v52 = vld [vmem:[%s4049_s14] ss:$4 sm:$0x3]  ;;  %3219 = vmatpush3.bf16.msra.mxu0 %v3218_v60  ;;  %v4383_v41 = vld [vmem:[%s4054_s3 + $0x88] sm:$0xff]  ;;  %v746_v60 = vmul.f32 %v4357_v29, %v4351_v28 }
  0xc9   : > { %6345 = vst [vmem:[#allocation59_spill] sm:$0xff] %v4360_v57  ;;  %v4364_v34 = vld [vmem:[%s4054_s3 + $0x80] sm:$0xff]  ;;  %v757_v38 = vrot.slane %v651_v52, %v4331_v56  ;;  %6346 = vst [vmem:[#allocation60_spill] sm:$0xff] %v4376_v47  ;;  %3221 = vmatprep.subr.bf16.mxu0 %v3220_v63  ;;  %v4393_v13 = vld [vmem:[%s4058_s6 + $0x78] sm:$0xff]  ;;  %v3226_v63 = vpack.c.bf16 %v729_v48, %v728_v46 }
  0xca   : > { %1013 = vperm.xlu0 %3442, %v4364_v34   ;;  %v4369_v39 = vld [vmem:[%s4054_s3] sm:$0xff]  ;;  %6349 = vst [vmem:[#allocation63_spill] sm:$0xff] %v4393_v13  ;;  %v4396_v55 = vld [vmem:[%s4054_s3 + $0x8] sm:$0xff]  ;;  %v4405_v33 = vld [vmem:[%s4054_s3 + $0x90] sm:$0xff] }
  0xcb   : > { %v4379_v42 = vld [vmem:[%s4035_s10 + $0x78] sm:$0xff]  ;;  %933 = vperm.xlu1 %3443, %v4369_v39   ;;  %824 = vmatprep.mubr.f32.mxu0 %v757_v38  ;;  %v3228_v38 = vpack.c.bf16 %v747_v61, %v746_v60  ;;  %v4408_v28 = vld [vmem:[%s4054_s3 + $0x98] sm:$0xff]  ;;  %v4416_v46 = vld [vmem:[%s4054_s3 + $0x10] sm:$0xff] }
  0xcc   : > { %6347 = vst [vmem:[#allocation61_spill] sm:$0xff] %v4379_v42  ;;  %v4390_v62 = vld [vmem:[%s4058_s6 + $0x70] sm:$0xff]  ;;  %3223 = vmatpush3.bf16.msra.mxu0 %v3222_v49  ;;  %v731_v25 = vmul.f32 %v4393_v13, %v4379_v42  ;;  %v4411_v49 = vsub.s32 0, %v4293_v19  ;;  %v853_v61 = vld [vmem:[%s4054_s3 + $0xa8] sm:$0xff]  ;;  %v859_v57 = vld [vmem:[%s4054_s3 + $0xd8] sm:$0xff] }
  0xcd   : > { %6348 = vst [vmem:[#allocation62_spill] sm:$0xff] %v4390_v62  ;;  %v730_v23 = vmul.f32 %v4390_v62, %v4376_v47  ;;  %3225 = vmatprep.subr.bf16.mxu0 %v3224_v35  ;;  %v4419_v35 = vld [vmem:[%s4054_s3 + $0x18] sm:$0xff]  ;;  %v4425_v19 = vld [vmem:[%s4054_s3 + $0xa0] sm:$0xff]  ;;  %v857_v42 = vld [vmem:[%s4054_s3 + $0xc8] sm:$0xff] }
  0xce   : > { %1018 = vperm.xlu0 %3442, %v4383_v41   ;;  %6350 = vst [vmem:[#allocation64_spill] sm:$0xff] %v4411_v49  ;;  %v753_v60 = vrot.slane %v651_v52, %v4411_v49  ;;  %v854_v52 = vld [vmem:[%s4054_s3 + $0xb0] sm:$0xff]  ;;  %v840_v47 = vld [vmem:[%s4054_s3 + $0x40] sm:$0xff]  ;;  %v841_v13 = vld [vmem:[%s4054_s3 + $0x48] sm:$0xff] }
  0xcf   : > { %938 = vperm.xlu1 %3443, %v4396_v55   ;;  %v3230_v48 = vpack.c.bf16 %v731_v25, %v730_v23  ;;  %v837_v23 = vld [vmem:[%s4054_s3 + $0x28] sm:$0xff]  ;;  %v855_v25 = vld [vmem:[%s4054_s3 + $0xb8] sm:$0xff]  ;;  %v858_v62 = vld [vmem:[%s4054_s3 + $0xd0] sm:$0xff] }
  0xd0   : > { %3227 = vmatpush3.bf16.msra.mxu0 %v3226_v63  ;;  %v836_v63 = vld [vmem:[%s4054_s3 + $0x20] sm:$0xff]  ;;  %v842_v29 = vld [vmem:[%s4054_s3 + $0x50] sm:$0xff]  ;;  %v843_v4 = vld [vmem:[%s4054_s3 + $0x58] sm:$0xff] }
  0xd1   : > { %3229 = vmatprep.subr.bf16.mxu0 %v3228_v38  ;;  %v838_v38 = vld [vmem:[%s4054_s3 + $0x30] sm:$0xff]  ;;  %v860_v12 = vld [vmem:[%s4054_s3 + $0xe0] sm:$0xff]  ;;  %v861_v32 = vld [vmem:[%s4054_s3 + $0xe8] sm:$0xff] }
  0xd2   : > { %1023 = vperm.xlu0 %3442, %v4405_v33   ;;  %v844_v54 = vld [vmem:[%s4054_s3 + $0x60] sm:$0xff]  ;;  %v845_v53 = vld [vmem:[%s4054_s3 + $0x68] sm:$0xff]  ;;  %v862_v27 = vld [vmem:[%s4054_s3 + $0xf0] sm:$0xff] }
  0xd3   : > { %1028 = vperm.xlu1 %3443, %v4408_v28   ;;  %v863_v26 = vld [vmem:[%s4054_s3 + $0xf8] sm:$0xff]  ;;  %v846_v21 = vld [vmem:[%s4054_s3 + $0x70] sm:$0xff]  ;;  %v4452_v14 = vld [vmem:[%s4049_s14 + $0x1] ss:$4 sm:$0x3] }
  0xd4   : > { %3231 = vmatpush3.bf16.msra.mxu0 %v3230_v48  ;;  %v839_v48 = vld [vmem:[%s4054_s3 + $0x38] sm:$0xff]  ;;  %v1298_v11 = vrot.slane %v4452_v14, %v4331_v56 }
  0xd5   : > { %v847_v20 = vld [vmem:[%s4054_s3 + $0x78] sm:$0xff] }
  0xd6   : > { %943 = vperm.xlu0 %3442, %v4416_v46   ;;  %1365 = vmatprep.mubr.f32.mxu1 %v1298_v11 }
  0xd7   : > { %948 = vperm.xlu1 %3443, %v4419_v35   ;;  %825 = vmatmul.mubr.f32.vlgmr.msra.gmra.mrb[0].mxu0 %v753_v60  ;;  %v856_v60 = vld [vmem:[%s4054_s3 + $0xc0] sm:$0xff] }
  0xda   : > { %1033 = vperm.xlu0 %3442, %v4425_v19  }
  0xdb   : > { %1038 = vperm.xlu1 %3443, %v853_v61  }
  0xde   : > { %953 = vperm.xlu0 %3442, %v836_v63  }
  0xdf   : > { %958 = vperm.xlu1 %3443, %v837_v23  }
  0xe2   : > { %1043 = vperm.xlu0 %3442, %v854_v52  }
  0xe3   : > { %1048 = vperm.xlu1 %3443, %v855_v25  }
  0xe6   : > { %963 = vperm.xlu0 %3442, %v838_v38  }
  0xe7   : > { %968 = vperm.xlu1 %3443, %v839_v48  }
  0xea   : > { %1053 = vperm.xlu0 %3442, %v856_v60  }
  0xeb   : > { %1058 = vperm.xlu1 %3443, %v857_v42  }
  0xee   : > { %973 = vperm.xlu0 %3442, %v840_v47  }
  0xef   : > { %978 = vperm.xlu1 %3443, %v841_v13  }
  0xf2   : > { %1063 = vperm.xlu0 %3442, %v858_v62  }
  0xf3   : > { %1068 = vperm.xlu1 %3443, %v859_v57  }
  0xf6   : > { %983 = vperm.xlu0 %3442, %v842_v29  }
  0xf7   : > { %988 = vperm.xlu1 %3443, %v843_v4  }
  0xfa   : > { %1073 = vperm.xlu0 %3442, %v860_v12  }
  0xfb   : > { %1078 = vperm.xlu1 %3443, %v861_v32  }
  0xfe   : > { %993 = vperm.xlu0 %3442, %v844_v54  }
  0xff   : > { %998 = vperm.xlu1 %3443, %v845_v53  }
 0x102   : > { %1083 = vperm.xlu0 %3442, %v862_v27  }
 0x103   : > { %1088 = vperm.xlu1 %3443, %v863_v26  }
 0x106   : > { %1003 = vperm.xlu0 %3442, %v846_v21  }
 0x107   : > { %1008 = vperm.xlu1 %3443, %v847_v20  }
 0x10a   : > { %3444 = vset.pattern.permute.xlu0 %v3680_v6 }
 0x10b   : > { %3445 = vset.pattern.permute.xlu1 %v3680_v6  ;;  %1552 = vperm.xlu0 %3444, %v4364_v34  }
 0x10c   : > { %1557 = vperm.xlu1 %3445, %v4383_v41  }
 0x10f   : > { %1477 = vperm.xlu0 %3444, %v4396_v55  }
 0x110   : > { %1472 = vperm.xlu1 %3445, %v4369_v39  }
 0x113   : > { %1567 = vperm.xlu0 %3444, %v4408_v28  }
 0x114   : > { %1562 = vperm.xlu1 %3445, %v4405_v33  }
 0x117   : > { %1487 = vperm.xlu0 %3444, %v4419_v35  }
 0x118   : > { %1482 = vperm.xlu1 %3445, %v4416_v46  }
 0x11b   : > { %1577 = vperm.xlu0 %3444, %v853_v61  }
 0x11c   : > { %1572 = vperm.xlu1 %3445, %v4425_v19  }
 0x11f   : > { %1497 = vperm.xlu0 %3444, %v837_v23  }
 0x120   : > { %1492 = vperm.xlu1 %3445, %v836_v63   ;;  %v748_v63 = vld [vmem:[%s4025_s19] sm:$0x1] }
 0x123   : > { %1587 = vperm.xlu0 %3444, %v855_v25  }
 0x124   : > { %1582 = vperm.xlu1 %3445, %v854_v52   ;;  %v4509_v52 = vstv %s650_s17 }
 0x125   : > { %6352 = vst [vmem:[#allocation66_spill] sm:$0xff] %v4509_v52 }
 0x127   : > { %1507 = vperm.xlu0 %3444, %v839_v48  }
 0x128   : > { %1502 = vperm.xlu1 %3445, %v838_v38  }
 0x12b   : > { %1597 = vperm.xlu0 %3444, %v857_v42  }
 0x12c   : > { %1592 = vperm.xlu1 %3445, %v856_v60   ;;  %v914_v60 = vmul.f32 %v4509_v52, %v4135_v3  ;;  %v917_v3 = vmul.f32 %v4509_v52, %v4196_v30  ;;  %v4553_v30 = vmul.f32 %v4509_v52, %v4247_v51  ;;  %v4573_v51 = vmul.f32 %v4509_v52, %v4276_v7 }
 0x12d   : > { %v4593_v7 = vmul.f32 %v4509_v52, %v4291_v18 }
 0x12f   : > { %1517 = vperm.xlu0 %3444, %v841_v13  }
 0x130   : > { %1512 = vperm.xlu1 %3445, %v840_v47  }
 0x133   : > { %1607 = vperm.xlu0 %3444, %v859_v57  }
 0x134   : > { %1602 = vperm.xlu1 %3445, %v858_v62  }
 0x137   : > { %1527 = vperm.xlu0 %3444, %v843_v4  }
 0x138   : > { %1522 = vperm.xlu1 %3445, %v842_v29  }
 0x13b   : > { %1617 = vperm.xlu0 %3444, %v861_v32  }
 0x13c   : > { %1612 = vperm.xlu1 %3445, %v860_v12  }
 0x13f   : > { %1537 = vperm.xlu0 %3444, %v845_v53  }
 0x140   : > { %1532 = vperm.xlu1 %3445, %v844_v54  }
 0x143   : > { %1627 = vperm.xlu0 %3444, %v863_v26  }
 0x144   : > { %1622 = vperm.xlu1 %3445, %v862_v27   ;;  %v4507_v27 = vstv %s649_s21 }
 0x145   : > { %6351 = vst [vmem:[#allocation65_spill] sm:$0xff] %v4507_v27 }
 0x147   : > { %1547 = vperm.xlu0 %3444, %v847_v20   ;;  %v913_v20 = vmul.f32 %v4509_v52, %v4132_v2  ;;  %v916_v2 = vmul.f32 %v4509_v52, %v4167_v16  ;;  %v919_v16 = vmul.f32 %v4509_v52, %v4228_v43 }
 0x148   : > { %1542 = vperm.xlu1 %3445, %v846_v21   ;;  %v897_v21 = vmul.f32 %v4509_v52, %v4148_v9  ;;  %v899_v9 = vmul.f32 %v4509_v52, %v4180_v22  ;;  %v920_v22 = vmul.f32 %v4509_v52, %v4231_v45 }
 0x149   : > { %v4464_v11 = vpop.permute.xlu0 %1013 }
 0x14a   : > { %v4467_v6 = vpop.permute.xlu1 %933 }
 0x14d   : > { %v4469_v41 = vpop.permute.xlu0 %1018 }
 0x14e   : > { %v4471_v55 = vpop.permute.xlu1 %938 }
 0x151   : > { %v4473_v33 = vpop.permute.xlu0 %1023 }
 0x152   : > { %v4475_v28 = vpop.permute.xlu1 %1028 }
 0x155   : > { %v4477_v34 = vpop.permute.xlu0 %943 }
 0x156   : > { %v4479_v39 = vpop.permute.xlu1 %948 }
 0x159   : > { %v4481_v46 = vpop.permute.xlu0 %1033 }
 0x15a   : > { %v4483_v35 = vpop.permute.xlu1 %1038 }
 0x15d   : > { %v4485_v19 = vpop.permute.xlu0 %953 }
 0x15e   : > { %v4487_v61 = vpop.permute.xlu1 %958 }
 0x161   : > { %v4489_v42 = vpop.permute.xlu0 %1043 }
 0x162   : > { %v4491_v47 = vpop.permute.xlu1 %1048 }
 0x165   : > { %v4494_v29 = vpop.permute.xlu0 %963 }
 0x166   : > { %v4496_v23 = vpop.permute.xlu1 %968 }
 0x169   : > { %v4498_v32 = vpop.permute.xlu0 %1053 }
 0x16a   : > { %v4500_v12 = vpop.permute.xlu1 %1058 }
 0x16d   : > { %v4503_v54 = vpop.permute.xlu0 %973 }
 0x16e   : > { %v4505_v26 = vpop.permute.xlu1 %978 }
 0x171   : > { %v4516_v38 = vpop.permute.xlu0 %1063 }
 0x172   : > { %v4518_v48 = vpop.permute.xlu1 %1068 }
 0x1aa   : > { %v3092_v13 = vpop.f32.mrb[0].mxu0 }
 0x1ab   : > { %v3093_v57 = vpop.f32.mrb[1].mxu0 }
 0x1ac   : > { %v3094_v62 = vadd.f32 %v3093_v57, %v3092_v13  ;;  %v898_v13 = vmul.f32 %v4509_v52, %v4151_v10  ;;  %v918_v10 = vmul.f32 %v4509_v52, %v4199_v31  ;;  %v4557_v31 = vmul.f32 %v4509_v52, %v4260_v58  ;;  %v4575_v58 = vpop.permute.xlu0 %983 }
 0x1ae   : > { %v827_v4 = vadd.f32 %v3094_v62, %v748_v63  ;;  %v915_v63 = vmul.f32 %v4509_v52, %v4164_v15  ;;  %v900_v62 = vmul.f32 %v4509_v52, %v4183_v24  ;;  %v901_v15 = vmul.f32 %v4509_v52, %v4212_v36 }
 0x1af   : > { %v4549_v24 = vmul.f32 %v4509_v52, %v4244_v50  ;;  %v4569_v50 = vmul.f32 %v4509_v52, %v4263_v59  ;;  %v4589_v59 = vmul.f32 %v4509_v52, %v4288_v17 }
 0x1b0   : > { %3450 = vtanh.f32 %v827_v4  ;;  %v902_v4 = vmul.f32 %v4509_v52, %v4215_v37 }
 0x1ba   : > { %v3451_v53 = vpop.eup %3450 }
 0x1bb   : > { %831 = vst [vmem:[%s4056_s4] sm:$0x1] %v3451_v53  ;;  %v930_v25 = vmul.f32 %v3451_v53, %v4507_v27  ;;  %v4597_v53 = vmul.f32 %v4509_v52, %v4310_v40 }
 0x1bd   : > { %v4527_v57 = vrot.slane %v930_v25, %v4411_v49 }
 0x1bf   : > { %v1095_v36 = vmul.f32 %v4527_v57, %v4467_v6  ;;  %v1096_v37 = vmul.f32 %v4527_v57, %v4471_v55  ;;  %v1111_v43 = vmul.f32 %v4527_v57, %v4464_v11  ;;  %v1112_v45 = vmul.f32 %v4527_v57, %v4469_v41  ;;  %v4577_v6 = vpop.permute.xlu1 %988 }
 0x1c0   : > { %v1113_v55 = vmul.f32 %v4527_v57, %v4473_v33  ;;  %v1114_v11 = vmul.f32 %v4527_v57, %v4475_v28  ;;  %v4585_v41 = vmul.f32 %v4509_v52, %v4279_v8  ;;  %v1097_v33 = vmul.f32 %v4527_v57, %v4477_v34 }
 0x1c1   : > { %v1098_v28 = vmul.f32 %v4527_v57, %v4479_v39  ;;  %v1115_v8 = vmul.f32 %v4527_v57, %v4481_v46  ;;  %v1116_v17 = vmul.f32 %v4527_v57, %v4483_v35  ;;  %v4607_v25 = vadd.f32 %v1095_v36, %v897_v21 }
 0x1c2   : > { %v4609_v18 = vadd.f32 %v1096_v37, %v898_v13  ;;  %v4611_v27 = vadd.f32 %v1111_v43, %v913_v20  ;;  %v4613_v40 = vadd.f32 %v1112_v45, %v914_v60  ;;  %v4617_v34 = vmul.f32 %v4509_v52, %v4313_v44  ;;  %v1074_v60 = vpop.permute.xlu0 %1073  ;;  %v6355_v43 = vld [vmem:[#allocation28_spill] sm:$0xff] }
 0x1c3   : > { %v1099_v39 = vmul.f32 %v4527_v57, %v4485_v19  ;;  %v4621_v56 = vadd.f32 %v1113_v55, %v915_v63  ;;  %v4623_v46 = vadd.f32 %v1114_v11, %v916_v2  ;;  %v1100_v35 = vmul.f32 %v4527_v57, %v4487_v61  ;;  %v1079_v13 = vpop.permute.xlu1 %1078 }
 0x1c4   : > { %v1101_v20 = vmul.f32 %v4527_v57, %v4494_v29  ;;  %v1117_v21 = vmul.f32 %v4527_v57, %v4489_v42  ;;  %v1118_v44 = vmul.f32 %v4527_v57, %v4491_v47  ;;  %v4633_v36 = vadd.f32 %v1097_v33, %v899_v9  ;;  %v6353_v47 = vld [vmem:[#allocation26_spill] sm:$0xff] }
 0x1c5   : > { %v4635_v19 = vadd.f32 %v1098_v28, %v900_v62  ;;  %v4637_v63 = vadd.f32 %v1115_v8, %v917_v3  ;;  %v4639_v2 = vadd.f32 %v1116_v17, %v918_v10  ;;  %v1273_v61 = vmul.f32 %v4611_v27, %v4126_v0  ;;  %v6354_v3 = vld [vmem:[#allocation27_spill] sm:$0xff]  ;;  %v6357_v28 = vld [vmem:[#allocation30_spill] sm:$0xff] }
 0x1c6   : > { %v1274_v29 = vmul.f32 %v4613_v40, %v4129_v1  ;;  %v1257_v42 = vmul.f32 %v4607_v25, %v4140_v5  ;;  %v1258_v37 = vmul.f32 %v4609_v18, %v6353_v47  ;;  %v1102_v9 = vmul.f32 %v4527_v57, %v4496_v23  ;;  %v6356_v23 = vld [vmem:[#allocation29_spill] sm:$0xff] }
 0x1c7   : > { %v1119_v62 = vmul.f32 %v4527_v57, %v4498_v32  ;;  %v1275_v10 = vmul.f32 %v4621_v56, %v6354_v3  ;;  %v1276_v0 = vmul.f32 %v4623_v46, %v6355_v43  ;;  %v1120_v1 = vmul.f32 %v4527_v57, %v4500_v12  ;;  %v6358_v3 = vld [vmem:[#allocation31_spill] sm:$0xff] }
 0x1c8   : > { %v4659_v45 = vadd.f32 %v1099_v39, %v901_v15  ;;  %v3232_v5 = vpack.c.bf16 %v1274_v29, %v1273_v61  ;;  %v3234_v55 = vpack.c.bf16 %v1258_v37, %v1257_v42  ;;  %v4661_v11 = vadd.f32 %v1100_v35, %v902_v4  ;;  %v6359_v15 = vld [vmem:[#allocation32_spill] sm:$0xff]  ;;  %v6360_v4 = vld [vmem:[#allocation49_spill] sm:$0xff]  ;;  %v6361_v35 = vld [vmem:[#allocation50_spill] sm:$0xff]  ;;  %v994_v61 = vpop.permute.xlu0 %993  ;;  %v999_v29 = vpop.permute.xlu1 %998 }
 0x1c9   : > { %v4663_v33 = vadd.f32 %v1117_v21, %v919_v16  ;;  %v1259_v32 = vmul.f32 %v4633_v36, %v6356_v23  ;;  %v1260_v8 = vmul.f32 %v4635_v19, %v6357_v28  ;;  %v4669_v17 = vadd.f32 %v1118_v44, %v920_v22  ;;  %v6366_v28 = vld [vmem:[#allocation54_spill] sm:$0xff] }
 0x1ca   : > { %3233 = vmatprep.subr.bf16.mxu1 %v3232_v5  ;;  %v3236_v47 = vpack.c.bf16 %v1276_v0, %v1275_v10  ;;  %v1277_v12 = vmul.f32 %v4637_v63, %v6358_v3  ;;  %v1278_v39 = vmul.f32 %v4639_v2, %v6359_v15  ;;  %v925_v16 = vmul.f32 %v4509_v52, %v6360_v4  ;;  %v6362_v5 = vld [vmem:[#allocation33_spill] sm:$0xff] }
 0x1cb   : > { %v926_v21 = vmul.f32 %v4509_v52, %v6361_v35  ;;  %v1103_v22 = vmul.f32 %v4527_v57, %v4503_v54  ;;  %v1104_v44 = vmul.f32 %v4527_v57, %v4505_v26  ;;  %3235 = vmatpush3.bf16.msra.mxu1 %v3234_v55  ;;  %v1121_v42 = vmul.f32 %v4527_v57, %v4516_v38  ;;  %v6363_v55 = vld [vmem:[#allocation34_spill] sm:$0xff]  ;;  %v6368_v35 = vld [vmem:[#allocation37_spill] sm:$0xff] }
 0x1cc   : > { %v1122_v37 = vmul.f32 %v4527_v57, %v4518_v48  ;;  %v4688_v10 = vadd.f32 %v1101_v20, %v4549_v24  ;;  %v4691_v43 = vadd.f32 %v1102_v9, %v4553_v30  ;;  %3237 = vmatprep.subr.bf16.mxu1 %v3236_v47  ;;  %v4694_v0 = vadd.f32 %v1119_v62, %v4557_v31  ;;  %v6364_v24 = vld [vmem:[#allocation35_spill] sm:$0xff]  ;;  %v6365_v30 = vld [vmem:[#allocation36_spill] sm:$0xff]  ;;  %v1084_v15 = vpop.permute.xlu0 %1083 }
 0x1cd   : > { %v3238_v54 = vpack.c.bf16 %v1260_v8, %v1259_v32  ;;  %v1261_v26 = vmul.f32 %v4659_v45, %v6362_v5  ;;  %v1262_v38 = vmul.f32 %v4661_v11, %v6363_v55  ;;  %v4701_v23 = vadd.f32 %v1120_v1, %v4569_v50  ;;  %v6367_v62 = vld [vmem:[#allocation55_spill] sm:$0xff]  ;;  %v6372_v55 = vld [vmem:[#allocation58_spill] sm:$0xff] }
 0x1ce   : > { %v3240_v48 = vpack.c.bf16 %v1278_v39, %v1277_v12  ;;  %v1279_v20 = vmul.f32 %v4663_v33, %v6364_v24  ;;  %v1280_v9 = vmul.f32 %v4669_v17, %v6365_v30  ;;  %v909_v31 = vmul.f32 %v4509_v52, %v6366_v28  ;;  %v1089_v39 = vpop.permute.xlu1 %1088  ;;  %v6374_v28 = vld [vmem:[#allocation41_spill] sm:$0xff] }
 0x1cf   : > { %v910_v32 = vmul.f32 %v4509_v52, %v6367_v62  ;;  %v1105_v8 = vmul.f32 %v4527_v57, %v4575_v58  ;;  %v1106_v50 = vmul.f32 %v4527_v57, %v4577_v6  ;;  %3239 = vmatpush3.bf16.msra.mxu1 %v3238_v54  ;;  %v1123_v1 = vmul.f32 %v4527_v57, %v1074_v60  ;;  %v6369_v54 = vld [vmem:[#allocation38_spill] sm:$0xff] }
 0x1d0   : > { %v1124_v47 = vmul.f32 %v4527_v57, %v1079_v13  ;;  %v4718_v3 = vadd.f32 %v1103_v22, %v4573_v51  ;;  %v4721_v12 = vadd.f32 %v1104_v44, %v4585_v41  ;;  %3241 = vmatprep.subr.bf16.mxu1 %v3240_v48  ;;  %v4724_v4 = vadd.f32 %v1121_v42, %v4589_v59  ;;  %v6370_v22 = vld [vmem:[#allocation39_spill] sm:$0xff]  ;;  %v6371_v44 = vld [vmem:[#allocation40_spill] sm:$0xff]  ;;  %v6375_v62 = vld [vmem:[#allocation42_spill] sm:$0xff] }
 0x1d1   : > { %v3242_v58 = vpack.c.bf16 %v1262_v38, %v1261_v26  ;;  %v1263_v6 = vmul.f32 %v4688_v10, %v6368_v35  ;;  %v1264_v60 = vmul.f32 %v4691_v43, %v6369_v54  ;;  %v4731_v13 = vadd.f32 %v1122_v37, %v4593_v7  ;;  %v6373_v42 = vld [vmem:[#allocation59_spill] sm:$0xff]  ;;  %v6378_v35 = vld [vmem:[#allocation62_spill] sm:$0xff] }
 0x1d2   : > { %v3244_v51 = vpack.c.bf16 %v1280_v9, %v1279_v20  ;;  %v1281_v41 = vmul.f32 %v4694_v0, %v6370_v22  ;;  %v1282_v5 = vmul.f32 %v4701_v23, %v6371_v44  ;;  %v927_v59 = vmul.f32 %v4509_v52, %v6372_v55  ;;  %v6380_v44 = vld [vmem:[#allocation45_spill] sm:$0xff]  ;;  %v6381_v55 = vld [vmem:[#allocation46_spill] sm:$0xff] }
 0x1d3   : > { %v928_v26 = vmul.f32 %v4509_v52, %v6373_v42  ;;  %v1107_v38 = vmul.f32 %v4527_v57, %v994_v61  ;;  %v1108_v48 = vmul.f32 %v4527_v57, %v999_v29  ;;  %3243 = vmatpush3.bf16.msra.mxu1 %v3242_v58  ;;  %v1125_v7 = vmul.f32 %v4527_v57, %v1084_v15 }
 0x1d4   : > { %v1126_v37 = vmul.f32 %v4527_v57, %v1089_v39  ;;  %v4746_v24 = vadd.f32 %v1105_v8, %v4597_v53  ;;  %v4749_v20 = vadd.f32 %v1106_v50, %v4617_v34  ;;  %3245 = vmatprep.subr.bf16.mxu1 %v3244_v51  ;;  %v4751_v30 = vadd.f32 %v1123_v1, %v925_v16  ;;  %v6376_v39 = vld [vmem:[#allocation43_spill] sm:$0xff]  ;;  %v6377_v8 = vld [vmem:[#allocation44_spill] sm:$0xff]  ;;  %v1004_v50 = vpop.permute.xlu0 %1003  ;;  %v1009_v1 = vpop.permute.xlu1 %1008 }
 0x1d5   : > { %v3246_v9 = vpack.c.bf16 %v1264_v60, %v1263_v6  ;;  %v1265_v61 = vmul.f32 %v4718_v3, %v6374_v28  ;;  %v1266_v29 = vmul.f32 %v4721_v12, %v6375_v62  ;;  %v4757_v58 = vadd.f32 %v1124_v47, %v926_v21  ;;  %v6379_v6 = vld [vmem:[#allocation63_spill] sm:$0xff] }
 0x1d6   : > { %v3248_v15 = vpack.c.bf16 %v1282_v5, %v1281_v41  ;;  %v1283_v53 = vmul.f32 %v4724_v4, %v6376_v39  ;;  %v1284_v34 = vmul.f32 %v4731_v13, %v6377_v8  ;;  %v911_v16 = vmul.f32 %v4509_v52, %v6378_v35  ;;  %v6382_v62 = vld [vmem:[#allocation47_spill] sm:$0xff] }
 0x1d7   : > { %v912_v54 = vmul.f32 %v4509_v52, %v6379_v6  ;;  %3247 = vmatpush3.bf16.msra.mxu1 %v3246_v9  ;;  %v1109_v60 = vmul.f32 %v4527_v57, %v1004_v50  ;;  %v1110_v21 = vmul.f32 %v4527_v57, %v1009_v1  ;;  %v4769_v47 = vadd.f32 %v1107_v38, %v909_v31  ;;  %v6383_v31 = vld [vmem:[#allocation48_spill] sm:$0xff] }
 0x1d8   : > { %v4771_v51 = vadd.f32 %v1108_v48, %v910_v32  ;;  %3249 = vmatprep.subr.bf16.mxu1 %v3248_v15  ;;  %v4773_v22 = vadd.f32 %v1125_v7, %v927_v59  ;;  %v3250_v41 = vpack.c.bf16 %v1266_v29, %v1265_v61  ;;  %v1267_v5 = vmul.f32 %v4746_v24, %v6380_v44  ;;  %v6384_v7 = vld [vmem:[#allocation51_spill] sm:$0xff]  ;;  %v6385_v29 = vld [vmem:[#allocation53_spill] sm:$0xff]  ;;  %v6386_v15 = vld [vmem:[#allocation56_spill] sm:$0xff] }
 0x1d9   : > { %v1268_v42 = vmul.f32 %v4749_v20, %v6381_v55  ;;  %v4779_v28 = vadd.f32 %v1126_v37, %v928_v26  ;;  %v3252_v9 = vpack.c.bf16 %v1284_v34, %v1283_v53  ;;  %v1285_v57 = vmul.f32 %v4751_v30, %v6382_v62  ;;  %v6387_v53 = vld [vmem:[#allocation57_spill] sm:$0xff]  ;;  %v6388_v50 = vld [vmem:[#allocation60_spill] sm:$0xff] }
 0x1da   : > { %v1286_v32 = vmul.f32 %v4757_v58, %v6383_v31  ;;  %v4785_v38 = vadd.f32 %v1109_v60, %v911_v16  ;;  %v4787_v59 = vadd.f32 %v1110_v21, %v912_v54  ;;  %v1269_v61 = vmul.f32 %v4769_v47, %v6384_v7  ;;  %v6389_v16 = vld [vmem:[#allocation61_spill] sm:$0xff]  ;;  %v4803_v21 = vpop.permute.xlu0 %1552  ;;  %v4812_v55 = vld [vmem:[%s4049_s14 + $0x2] ss:$4 sm:$0x3]  ;;  %v4832_v7 = vld [vmem:[%s4054_s3 + $0x90] sm:$0xff] }
 0x1db   : > { %3251 = vmatpush3.bf16.msra.mxu1 %v3250_v41  ;;  %v3254_v48 = vpack.c.bf16 %v1268_v42, %v1267_v5  ;;  %v1270_v26 = vmul.f32 %v4771_v51, %v6385_v29  ;;  %v1287_v39 = vmul.f32 %v4773_v22, %v6386_v15  ;;  %v1288_v8 = vmul.f32 %v4779_v28, %v6387_v53  ;;  %v4805_v41 = vpop.permute.xlu1 %1557  ;;  %v6391_v42 = vld [vmem:[#allocation52_spill] sm:$0xff]  ;;  %v4849_v15 = vld [vmem:[%s4054_s3 + $0x98] sm:$0xff] }
 0x1dc   : > { %3253 = vmatprep.subr.bf16.mxu1 %v3252_v9  ;;  %v3256_v37 = vpack.c.bf16 %v1286_v32, %v1285_v57  ;;  %v1271_v35 = vmul.f32 %v4785_v38, %v6388_v50  ;;  %v1272_v1 = vmul.f32 %v4787_v59, %v6389_v16  ;;  %v1294_v60 = vrot.slane %v4452_v14, %v4411_v49  ;;  %v4821_v57 = vld [vmem:[%s4054_s3 + $0x80] sm:$0xff]  ;;  %v4824_v32 = vld [vmem:[%s4054_s3 + $0x88] sm:$0xff] }
 0x1dd   : > { %v3258_v34 = vpack.c.bf16 %v1270_v26, %v1269_v61  ;;  %v3260_v6 = vpack.c.bf16 %v1288_v8, %v1287_v39  ;;  %6390 = vst [vmem:[#allocation26_spill] sm:$0xff] %v4812_v55  ;;  %v1837_v9 = vrot.slane %v4812_v55, %v6391_v42  ;;  %6392 = vst [vmem:[#allocation27_spill] sm:$0xff] %v4821_v57  ;;  %v3681_v31 = vmov 2   ;;  %v4841_v26 = vld [vmem:[%s4054_s3 + $0x8] sm:$0xff]  ;;  %v4852_v39 = vld [vmem:[%s4054_s3 + $0xa0] sm:$0xff] }
 0x1de   : > { %v3262_v54 = vpack.c.bf16 %v1272_v1, %v1271_v35  ;;  %v4807_v44 = vpop.permute.xlu0 %1477  ;;  %3446 = vset.pattern.permute.xlu1 %v3681_v31  ;;  %3447 = vset.pattern.permute.xlu0 %v3681_v31  ;;  %6393 = vst [vmem:[#allocation28_spill] sm:$0xff] %v4824_v32  ;;  %6395 = vst [vmem:[#allocation30_spill] sm:$0xff] %v4832_v7  ;;  %v4864_v50 = vld [vmem:[%s4054_s3 + $0x20] sm:$0xff]  ;;  %v4873_v1 = vld [vmem:[%s4054_s3 + $0xa8] sm:$0xff] }
 0x1df   : > { %3255 = vmatpush3.bf16.msra.mxu1 %v3254_v48  ;;  %v4809_v5 = vpop.permute.xlu1 %1472  ;;  %1904 = vmatprep.mubr.f32.mxu0 %v1837_v9  ;;  %v4829_v48 = vld [vmem:[%s4054_s3] sm:$0xff]  ;;  %6396 = vst [vmem:[#allocation31_spill] sm:$0xff] %v4841_v26  ;;  %6398 = vst [vmem:[#allocation49_spill] sm:$0xff] %v4849_v15  ;;  %v4916_v42 = vld [vmem:[%s4054_s3 + $0xd0] sm:$0xff] }
 0x1e0   : > { %3257 = vmatprep.subr.bf16.mxu1 %v3256_v37  ;;  %2091 = vperm.xlu1 %3446, %v4821_v57   ;;  %6394 = vst [vmem:[#allocation29_spill] sm:$0xff] %v4829_v48  ;;  %v4844_v37 = vld [vmem:[%s4054_s3 + $0x10] sm:$0xff]  ;;  %6399 = vst [vmem:[#allocation50_spill] sm:$0xff] %v4852_v39  ;;  %v4908_v57 = vld [vmem:[%s4054_s3 + $0x40] sm:$0xff] }
 0x1e1   : > { %2096 = vperm.xlu0 %3447, %v4824_v32   ;;  %6397 = vst [vmem:[#allocation32_spill] sm:$0xff] %v4844_v37  ;;  %6402 = vst [vmem:[#allocation35_spill] sm:$0xff] %v4864_v50  ;;  %v4913_v32 = vld [vmem:[%s4054_s3 + $0xc8] sm:$0xff] }
 0x1e2   : > { %v4816_v62 = vpop.permute.xlu0 %1567  ;;  %6403 = vst [vmem:[#allocation36_spill] sm:$0xff] %v4873_v1  ;;  %6412 = vst [vmem:[#allocation41_spill] sm:$0xff] %v4908_v57  ;;  %v4969_v55 = vld [vmem:[%s4054_s3 + $0x68] sm:$0xff] }
 0x1e3   : > { %3259 = vmatpush3.bf16.msra.mxu1 %v3258_v34  ;;  %v4818_v14 = vpop.permute.xlu1 %1562  ;;  %v4861_v34 = vld [vmem:[%s4054_s3 + $0x18] sm:$0xff]  ;;  %6413 = vst [vmem:[#allocation42_spill] sm:$0xff] %v4913_v32  ;;  %6414 = vst [vmem:[#allocation43_spill] sm:$0xff] %v4916_v42 }
 0x1e4   : > { %3261 = vmatprep.subr.bf16.mxu1 %v3260_v6  ;;  %2011 = vperm.xlu1 %3446, %v4829_v48   ;;  %6401 = vst [vmem:[#allocation34_spill] sm:$0xff] %v4861_v34  ;;  %v4876_v6 = vld [vmem:[%s4054_s3 + $0xb0] sm:$0xff]  ;;  %6427 = vst [vmem:[#allocation61_spill] sm:$0xff] %v4969_v55 }
 0x1e5   : > { %2101 = vperm.xlu0 %3447, %v4832_v7   ;;  %6404 = vst [vmem:[#allocation54_spill] sm:$0xff] %v4876_v6 }
 0x1e6   : > { %v4834_v61 = vpop.permute.xlu0 %1487 }
 0x1e7   : > { %3263 = vmatpush3.bf16.msra.mxu1 %v3262_v54  ;;  %v4836_v29 = vpop.permute.xlu1 %1482  ;;  %v4881_v54 = vld [vmem:[%s4054_s3 + $0x28] sm:$0xff] }
 0x1e8   : > { %2016 = vperm.xlu1 %3446, %v4841_v26   ;;  %6405 = vst [vmem:[#allocation55_spill] sm:$0xff] %v4881_v54 }
 0x1e9   : > { %2021 = vperm.xlu0 %3447, %v4844_v37   ;;  %v4940_v37 = vld [vmem:[%s4054_s3 + $0xe0] sm:$0xff] }
 0x1ea   : > { %1366 = vmatmul.mubr.f32.vlgmr.msra.gmra.mrb[0].mxu1 %v1294_v60  ;;  %v4854_v53 = vpop.permute.xlu0 %1577  ;;  %v4884_v60 = vld [vmem:[%s4054_s3 + $0x30] sm:$0xff]  ;;  %6420 = vst [vmem:[#allocation47_spill] sm:$0xff] %v4940_v37 }
 0x1eb   : > { %6400 = vst [vmem:[#allocation33_spill] sm:$0xff] %v4854_v53  ;;  %v4856_v8 = vpop.permute.xlu1 %1572  ;;  %6406 = vst [vmem:[#allocation37_spill] sm:$0xff] %v4884_v60 }
 0x1ec   : > { %2106 = vperm.xlu1 %3446, %v4849_v15   ;;  %v4905_v15 = vld [vmem:[%s4054_s3 + $0x38] sm:$0xff] }
 0x1ed   : > { %2111 = vperm.xlu0 %3447, %v4852_v39   ;;  %v4893_v39 = vld [vmem:[%s4054_s3 + $0xb8] sm:$0xff]  ;;  %6411 = vst [vmem:[#allocation59_spill] sm:$0xff] %v4905_v15 }
 0x1ee   : > { %v4866_v35 = vpop.permute.xlu0 %1497  ;;  %6409 = vst [vmem:[#allocation40_spill] sm:$0xff] %v4893_v39 }
 0x1ef   : > { %v4868_v16 = vpop.permute.xlu1 %1492 }
 0x1f0   : > { %2026 = vperm.xlu1 %3446, %v4861_v34  }
 0x1f1   : > { %2031 = vperm.xlu0 %3447, %v4864_v50  }
 0x1f2   : > { %v4886_v9 = vpop.permute.xlu0 %1587 }
 0x1f3   : > { %6407 = vst [vmem:[#allocation38_spill] sm:$0xff] %v4886_v9  ;;  %v4888_v31 = vpop.permute.xlu1 %1582 }
 0x1f4   : > { %2116 = vperm.xlu1 %3446, %v4873_v1   ;;  %6408 = vst [vmem:[#allocation39_spill] sm:$0xff] %v4888_v31  ;;  %v4896_v1 = vld [vmem:[%s4054_s3 + $0xc0] sm:$0xff] }
 0x1f5   : > { %2121 = vperm.xlu0 %3447, %v4876_v6   ;;  %6410 = vst [vmem:[#allocation58_spill] sm:$0xff] %v4896_v1 }
 0x1f6   : > { %v4898_v6 = vpop.permute.xlu0 %1507 }
 0x1f7   : > { %v4900_v7 = vpop.permute.xlu1 %1502 }
 0x1f8   : > { %2036 = vperm.xlu1 %3446, %v4881_v54   ;;  %v4937_v54 = vld [vmem:[%s4054_s3 + $0xd8] sm:$0xff] }
 0x1f9   : > { %2041 = vperm.xlu0 %3447, %v4884_v60   ;;  %6419 = vst [vmem:[#allocation46_spill] sm:$0xff] %v4937_v54 }
 0x1fa   : > { %v4918_v60 = vpop.permute.xlu0 %1597 }
 0x1fb   : > { %6415 = vst [vmem:[#allocation44_spill] sm:$0xff] %v4918_v60 }
 0x1fc   : > { %2126 = vperm.xlu1 %3446, %v4893_v39   ;;  %v4920_v39 = vpop.permute.xlu1 %1592 }
 0x1fd   : > { %2131 = vperm.xlu0 %3447, %v4896_v1   ;;  %6416 = vst [vmem:[#allocation62_spill] sm:$0xff] %v4920_v39  ;;  %v4925_v1 = vld [vmem:[%s4054_s3 + $0x48] sm:$0xff]  ;;  %v4978_v39 = vld [vmem:[%s4054_s3 + $0xf8] sm:$0xff] }
 0x1fe   : > { %6417 = vst [vmem:[#allocation63_spill] sm:$0xff] %v4925_v1  ;;  %6429 = vst [vmem:[#allocation68_spill] sm:$0xff] %v4978_v39 }
 0x200   : > { %2046 = vperm.xlu1 %3446, %v4905_v15   ;;  %v4928_v15 = vld [vmem:[%s4054_s3 + $0x50] sm:$0xff]  ;;  %v4932_v50 = vpop.permute.xlu1 %1512 }
 0x201   : > { %2051 = vperm.xlu0 %3447, %v4908_v57   ;;  %6418 = vst [vmem:[#allocation45_spill] sm:$0xff] %v4928_v15  ;;  %v4930_v57 = vpop.permute.xlu0 %1517 }
 0x204   : > { %2136 = vperm.xlu1 %3446, %v4913_v32   ;;  %v4948_v32 = vld [vmem:[%s4054_s3 + $0x60] sm:$0xff] }
 0x205   : > { %2141 = vperm.xlu0 %3447, %v4916_v42   ;;  %v4945_v42 = vld [vmem:[%s4054_s3 + $0x58] sm:$0xff]  ;;  %6422 = vst [vmem:[#allocation51_spill] sm:$0xff] %v4948_v32  ;;  %v4950_v34 = vpop.permute.xlu0 %1607 }
 0x206   : > { %6421 = vst [vmem:[#allocation48_spill] sm:$0xff] %v4945_v42  ;;  %6423 = vst [vmem:[#allocation53_spill] sm:$0xff] %v4950_v34 }
 0x208   : > { %2056 = vperm.xlu1 %3446, %v4925_v1   ;;  %v4952_v1 = vpop.permute.xlu1 %1602 }
 0x209   : > { %2061 = vperm.xlu0 %3447, %v4928_v15   ;;  %6424 = vst [vmem:[#allocation56_spill] sm:$0xff] %v4952_v1  ;;  %v4957_v15 = vld [vmem:[%s4054_s3 + $0xe8] sm:$0xff]  ;;  %v4962_v26 = vpop.permute.xlu0 %1527 }
 0x20a   : > { %6425 = vst [vmem:[#allocation57_spill] sm:$0xff] %v4957_v15 }
 0x20c   : > { %2146 = vperm.xlu1 %3446, %v4937_v54   ;;  %v4960_v54 = vld [vmem:[%s4054_s3 + $0xf0] sm:$0xff] }
 0x20d   : > { %2151 = vperm.xlu0 %3447, %v4940_v37   ;;  %6426 = vst [vmem:[#allocation60_spill] sm:$0xff] %v4960_v54  ;;  %v4964_v37 = vpop.permute.xlu1 %1522  ;;  %v4980_v9 = vpop.permute.xlu0 %1617 }
 0x210   : > { %2066 = vperm.xlu1 %3446, %v4945_v42   ;;  %v4972_v42 = vld [vmem:[%s4054_s3 + $0x70] sm:$0xff] }
 0x211   : > { %2071 = vperm.xlu0 %3447, %v4948_v32   ;;  %6428 = vst [vmem:[#allocation67_spill] sm:$0xff] %v4972_v42  ;;  %v1289_v32 = vld [vmem:[%s4025_s19 + $0x1] sm:$0x1]  ;;  %v1538_v31 = vpop.permute.xlu0 %1537 }
 0x214   : > { %2156 = vperm.xlu1 %3446, %v4957_v15   ;;  %v4982_v15 = vpop.permute.xlu1 %1612 }
 0x215   : > { %2161 = vperm.xlu0 %3447, %v4960_v54   ;;  %v4986_v54 = vld [vmem:[%s4054_s3 + $0x78] sm:$0xff]  ;;  %s3053_s3 = sshll.u32 %s3656_s0, 1 }
 0x216   : > { %6430 = vst [vmem:[#allocation69_spill] sm:$0xff] %v4986_v54 }
 0x218   : > { %2076 = vperm.xlu1 %3446, %v4969_v55   ;;  %v1533_v53 = vpop.permute.xlu1 %1532  ;;  %v6438_v55 = vld [vmem:[#allocation65_spill] sm:$0xff] }
 0x219   : > { %2081 = vperm.xlu0 %3447, %v4972_v42   ;;  %v1445_v42 = vmul.f32 %v4718_v3, %v4509_v52  ;;  %v5079_v3 = vmul.f32 %v4757_v58, %v4509_v52  ;;  %v1451_v58 = vmul.f32 %v4785_v38, %v4509_v52 }
 0x21b   : > { %6440 = vst [vmem:[#allocation78_spill] sm:$0xff] %v5079_v3 }
 0x21c   : > { %2166 = vperm.xlu1 %3446, %v4978_v39  }
 0x220   : > { %2086 = vperm.xlu1 %3446, %v4986_v54   ;;  %v1628_v54 = vpop.permute.xlu0 %1627 }
 0x2bd   : > { %v3127_v48 = vpop.f32.mrb[0].mxu1 }
 0x2be   : > { %v3128_v34 = vpop.f32.mrb[1].mxu1 }
 0x2bf   : > { %v3129_v1 = vadd.f32 %v3128_v34, %v3127_v48  ;;  %v4991_v48 = vmul.f32 %v4611_v27, %v4509_v52  ;;  %v4999_v34 = vmul.f32 %v4609_v18, %v4509_v52  ;;  %v5011_v27 = vmul.f32 %v4621_v56, %v4509_v52 }
 0x2c0   : > { %v5019_v18 = vmul.f32 %v4633_v36, %v4509_v52  ;;  %v5031_v56 = vmul.f32 %v4661_v11, %v4509_v52  ;;  %v5039_v36 = vmul.f32 %v4669_v17, %v4509_v52  ;;  %v1443_v11 = vmul.f32 %v4688_v10, %v4509_v52  ;;  %v1623_v10 = vpop.permute.xlu1 %1622 }
 0x2c1   : > { %v1368_v60 = vadd.f32 %v3129_v1, %v1289_v32  ;;  %v4995_v32 = vmul.f32 %v4613_v40, %v4509_v52  ;;  %v5003_v1 = vmul.f32 %v4607_v25, %v4509_v52  ;;  %v5015_v40 = vmul.f32 %v4635_v19, %v4509_v52 }
 0x2c2   : > { %v5023_v25 = vmul.f32 %v4639_v2, %v4509_v52  ;;  %v5035_v19 = vmul.f32 %v4659_v45, %v4509_v52  ;;  %6433 = vst [vmem:[#allocation72_spill] sm:$0xff] %v5039_v36  ;;  %v5043_v2 = vmul.f32 %v4663_v33, %v4509_v52  ;;  %v5053_v45 = vmul.f32 %v4701_v23, %v4509_v52 }
 0x2c3   : > { %3452 = vtanh.f32 %v1368_v60  ;;  %v5007_v60 = vmul.f32 %v4623_v46, %v4509_v52  ;;  %v5027_v46 = vmul.f32 %v4637_v63, %v4509_v52  ;;  %v5047_v63 = vmul.f32 %v4691_v43, %v4509_v52 }
 0x2c4   : > { %6431 = vst [vmem:[#allocation70_spill] sm:$0xff] %v5023_v25  ;;  %6434 = vst [vmem:[#allocation73_spill] sm:$0xff] %v5043_v2  ;;  %v5057_v17 = vmul.f32 %v4694_v0, %v4509_v52  ;;  %v1446_v33 = vmul.f32 %v4721_v12, %v4509_v52  ;;  %v5065_v43 = vmul.f32 %v4731_v13, %v4509_v52  ;;  %v1543_v3 = vpop.permute.xlu1 %1542  ;;  %v6449_v2 = vld [vmem:[#allocation56_spill] sm:$0xff]  ;;  %v6450_v25 = vld [vmem:[#allocation53_spill] sm:$0xff] }
 0x2c5   : > { %6432 = vst [vmem:[#allocation71_spill] sm:$0xff] %v5027_v46  ;;  %6435 = vst [vmem:[#allocation74_spill] sm:$0xff] %v5053_v45  ;;  %v5071_v23 = vmul.f32 %v4724_v4, %v4509_v52  ;;  %v1448_v0 = vmul.f32 %v4749_v20, %v4509_v52  ;;  %v1447_v12 = vmul.f32 %v4746_v24, %v4509_v52  ;;  %v6445_v45 = vld [vmem:[#allocation39_spill] sm:$0xff] }
 0x2c6   : > { %6436 = vst [vmem:[#allocation75_spill] sm:$0xff] %v5057_v17  ;;  %6437 = vst [vmem:[#allocation76_spill] sm:$0xff] %v5065_v43  ;;  %v5083_v13 = vmul.f32 %v4751_v30, %v4509_v52  ;;  %v1449_v4 = vmul.f32 %v4769_v47, %v4509_v52  ;;  %v5092_v20 = vmul.f32 %v4779_v28, %v4509_v52  ;;  %v6446_v17 = vld [vmem:[#allocation38_spill] sm:$0xff] }
 0x2c7   : > { %6439 = vst [vmem:[#allocation77_spill] sm:$0xff] %v5071_v23  ;;  %v5096_v24 = vmul.f32 %v4773_v22, %v4509_v52  ;;  %v1452_v30 = vmul.f32 %v4787_v59, %v4509_v52  ;;  %v1548_v59 = vpop.permute.xlu0 %1547  ;;  %v6444_v23 = vld [vmem:[#allocation33_spill] sm:$0xff] }
 0x2c8   : > { %6441 = vst [vmem:[#allocation79_spill] sm:$0xff] %v5083_v13  ;;  %6442 = vst [vmem:[#allocation80_spill] sm:$0xff] %v5092_v20 }
 0x2c9   : > { %6443 = vst [vmem:[#allocation81_spill] sm:$0xff] %v5096_v24 }
 0x2cd   : > { %v3453_v39 = vpop.eup %3452 }
 0x2ce   : > { %v1469_v36 = vmul.f32 %v3453_v39, %v6438_v55  ;;  %1372 = vst [vmem:[%s4056_s4 + $0x1] sm:$0x1] %v3453_v39  ;;  %v1450_v39 = vmul.f32 %v4771_v51, %v4509_v52 }
 0x2d0   : > { %v1633_v55 = vrot.slane %v1469_v36, %v4411_v49 }
 0x2d2   : > { %v1634_v51 = vmul.f32 %v1633_v55, %v4809_v5  ;;  %v1635_v47 = vmul.f32 %v1633_v55, %v4807_v44  ;;  %v1636_v36 = vmul.f32 %v1633_v55, %v4836_v29  ;;  %v1637_v49 = vmul.f32 %v1633_v55, %v4834_v61 }
 0x2d3   : > { %v1638_v28 = vmul.f32 %v1633_v55, %v4868_v16  ;;  %v1639_v20 = vmul.f32 %v1633_v55, %v4866_v35  ;;  %v1640_v22 = vmul.f32 %v1633_v55, %v4900_v7  ;;  %v1641_v24 = vmul.f32 %v1633_v55, %v4898_v6 }
 0x2d4   : > { %v1642_v38 = vmul.f32 %v1633_v55, %v4932_v50  ;;  %v1643_v5 = vmul.f32 %v1633_v55, %v4930_v57  ;;  %v1644_v44 = vmul.f32 %v1633_v55, %v4964_v37  ;;  %v1645_v29 = vmul.f32 %v1633_v55, %v4962_v26 }
 0x2d5   : > { %v1646_v52 = vmul.f32 %v1633_v55, %v1533_v53  ;;  %v1647_v61 = vmul.f32 %v1633_v55, %v1538_v31  ;;  %v1648_v13 = vmul.f32 %v1633_v55, %v1543_v3  ;;  %v1649_v16 = vmul.f32 %v1633_v55, %v1548_v59  ;;  %v6447_v53 = vld [vmem:[#allocation62_spill] sm:$0xff]  ;;  %v6448_v3 = vld [vmem:[#allocation44_spill] sm:$0xff] }
 0x2d6   : > { %v1650_v35 = vmul.f32 %v1633_v55, %v4803_v21  ;;  %v1651_v7 = vmul.f32 %v1633_v55, %v4805_v41  ;;  %v1652_v6 = vmul.f32 %v1633_v55, %v4818_v14  ;;  %v1653_v43 = vmul.f32 %v1633_v55, %v4816_v62 }
 0x2d7   : > { %v1654_v50 = vmul.f32 %v1633_v55, %v4856_v8  ;;  %v1655_v57 = vmul.f32 %v1633_v55, %v6444_v23  ;;  %v1656_v37 = vmul.f32 %v1633_v55, %v6445_v45  ;;  %v1657_v26 = vmul.f32 %v1633_v55, %v6446_v17 }
 0x2d8   : > { %v1658_v31 = vmul.f32 %v1633_v55, %v6447_v53  ;;  %v1659_v59 = vmul.f32 %v1633_v55, %v6448_v3  ;;  %v1660_v21 = vmul.f32 %v1633_v55, %v6449_v2  ;;  %v1661_v41 = vmul.f32 %v1633_v55, %v6450_v25 }
 0x2d9   : > { %v1662_v14 = vmul.f32 %v1633_v55, %v4982_v15  ;;  %v1663_v62 = vmul.f32 %v1633_v55, %v4980_v9  ;;  %v1664_v46 = vmul.f32 %v1633_v55, %v1623_v10  ;;  %v1665_v8 = vmul.f32 %v1633_v55, %v1628_v54  ;;  %v6453_v10 = vld [vmem:[#allocation71_spill] sm:$0xff] }
 0x2da   : > { %v5129_v23 = vadd.f32 %v1634_v51, %v5003_v1  ;;  %v5132_v45 = vadd.f32 %v1635_v47, %v4999_v34  ;;  %v5135_v17 = vadd.f32 %v1636_v36, %v5019_v18  ;;  %v5138_v53 = vadd.f32 %v1637_v49, %v5015_v40  ;;  %v6462_v51 = vld [vmem:[#allocation77_spill] sm:$0xff]  ;;  %v6463_v36 = vld [vmem:[#allocation76_spill] sm:$0xff] }
 0x2db   : > { %v5141_v25 = vadd.f32 %v1638_v28, %v5035_v19  ;;  %v5144_v15 = vadd.f32 %v1639_v20, %v5031_v56  ;;  %v5146_v55 = vadd.f32 %v1640_v22, %v1443_v11  ;;  %v5149_v54 = vadd.f32 %v1641_v24, %v5047_v63  ;;  %v5180_v11 = vld [vmem:[%s4035_s10 + $0x80] sm:$0xff]  ;;  %v6460_v20 = vld [vmem:[#allocation75_spill] sm:$0xff]  ;;  %v5219_v22 = vld [vmem:[%s4035_s10 + $0x98] sm:$0xff] }
 0x2dc   : > { %v5151_v9 = vadd.f32 %v1642_v38, %v1445_v42  ;;  %v5153_v34 = vadd.f32 %v1643_v5, %v1446_v33  ;;  %v5155_v1 = vadd.f32 %v1644_v44, %v1447_v12  ;;  %v5157_v49 = vadd.f32 %v1645_v29, %v1448_v0  ;;  %6451 = vst [vmem:[#allocation33_spill] sm:$0xff] %v5180_v11  ;;  %v5183_v33 = vld [vmem:[%s4035_s10 + $0x88] sm:$0xff]  ;;  %v5222_v38 = vld [vmem:[%s4035_s10 + $0x10] sm:$0xff]  ;;  %v5225_v5 = vld [vmem:[%s4035_s10 + $0x18] sm:$0xff] }
 0x2dd   : > { %v5159_v40 = vadd.f32 %v1646_v52, %v1449_v4  ;;  %v5161_v18 = vadd.f32 %v1647_v61, %v1450_v39  ;;  %v5163_v56 = vadd.f32 %v1648_v13, %v1451_v58  ;;  %v5165_v19 = vadd.f32 %v1649_v16, %v1452_v30  ;;  %6452 = vst [vmem:[#allocation39_spill] sm:$0xff] %v5183_v33  ;;  %v5204_v4 = vld [vmem:[%s4035_s10 + $0x90] sm:$0xff]  ;;  %v6461_v30 = vld [vmem:[#allocation74_spill] sm:$0xff] }
 0x2de   : > { %v5168_v42 = vadd.f32 %v1650_v35, %v4991_v48  ;;  %v5171_v2 = vadd.f32 %v1651_v7, %v4995_v32  ;;  %v5174_v63 = vadd.f32 %v1652_v6, %v5011_v27  ;;  %v5177_v52 = vadd.f32 %v1653_v43, %v5007_v60  ;;  %v6454_v48 = vld [vmem:[#allocation70_spill] sm:$0xff]  ;;  %v6455_v32 = vld [vmem:[#allocation73_spill] sm:$0xff]  ;;  %v6456_v27 = vld [vmem:[#allocation72_spill] sm:$0xff]  ;;  %6459 = vst [vmem:[#allocation44_spill] sm:$0xff] %v5204_v4 }
 0x2df   : > { %v5186_v0 = vadd.f32 %v1654_v50, %v6453_v10  ;;  %v5189_v12 = vadd.f32 %v1655_v57, %v6454_v48  ;;  %v5192_v13 = vadd.f32 %v1656_v37, %v6455_v32  ;;  %v5195_v39 = vadd.f32 %v1657_v26, %v6456_v27  ;;  %v5198_v60 = vld [vmem:[%s4035_s10] sm:$0xff]  ;;  %v5201_v43 = vld [vmem:[%s4035_s10 + $0x8] sm:$0xff]  ;;  %6464 = vst [vmem:[#allocation56_spill] sm:$0xff] %v5219_v22  ;;  %v6467_v44 = vld [vmem:[#allocation79_spill] sm:$0xff] }
 0x2e0   : > { %6457 = vst [vmem:[#allocation38_spill] sm:$0xff] %v5198_v60  ;;  %6458 = vst [vmem:[#allocation62_spill] sm:$0xff] %v5201_v43  ;;  %v5207_v24 = vadd.f32 %v1658_v31, %v6460_v20  ;;  %v5210_v58 = vadd.f32 %v1659_v59, %v6461_v30  ;;  %v5213_v47 = vadd.f32 %v1660_v21, %v6462_v51  ;;  %v6468_v61 = vld [vmem:[#allocation78_spill] sm:$0xff]  ;;  %v6469_v35 = vld [vmem:[#allocation81_spill] sm:$0xff] }
 0x2e1   : > { %v5216_v28 = vadd.f32 %v1661_v41, %v6463_v36  ;;  %6465 = vst [vmem:[#allocation53_spill] sm:$0xff] %v5222_v38  ;;  %6466 = vst [vmem:[#allocation71_spill] sm:$0xff] %v5225_v5  ;;  %v5228_v29 = vadd.f32 %v1662_v14, %v6467_v44  ;;  %v5231_v16 = vadd.f32 %v1663_v62, %v6468_v61  ;;  %v6470_v6 = vld [vmem:[#allocation80_spill] sm:$0xff]  ;;  %v5240_v57 = vld [vmem:[%s4035_s10 + $0xa0] sm:$0xff] }
 0x2e2   : > { %v5234_v7 = vadd.f32 %v1664_v46, %v6469_v35  ;;  %v5237_v50 = vadd.f32 %v1665_v8, %v6470_v6  ;;  %6471 = vst [vmem:[#allocation70_spill] sm:$0xff] %v5240_v57  ;;  %v5243_v37 = vld [vmem:[%s4035_s10 + $0xa8] sm:$0xff]  ;;  %v1812_v26 = vmul.f32 %v5180_v11, %v5168_v42  ;;  %v1813_v31 = vmul.f32 %v5183_v33, %v5171_v2  ;;  %v5254_v59 = vld [vmem:[%s4035_s10 + $0x20] sm:$0xff]  ;;  %v5268_v10 = vld [vmem:[%s4035_s10 + $0xb0] sm:$0xff] }
 0x2e3   : > { %6472 = vst [vmem:[#allocation73_spill] sm:$0xff] %v5243_v37  ;;  %v1796_v3 = vmul.f32 %v5198_v60, %v5129_v23  ;;  %v1797_v46 = vmul.f32 %v5201_v43, %v5132_v45  ;;  %6473 = vst [vmem:[#allocation72_spill] sm:$0xff] %v5254_v59  ;;  %v5257_v21 = vld [vmem:[%s4035_s10 + $0x28] sm:$0xff]  ;;  %v1814_v41 = vmul.f32 %v5204_v4, %v5174_v63  ;;  %v5271_v48 = vld [vmem:[%s4035_s10 + $0xb8] sm:$0xff] }
 0x2e4   : > { %6474 = vst [vmem:[#allocation75_spill] sm:$0xff] %v5257_v21  ;;  %v1815_v14 = vmul.f32 %v5219_v22, %v5177_v52  ;;  %v1798_v62 = vmul.f32 %v5222_v38, %v5135_v17  ;;  %v1799_v8 = vmul.f32 %v5225_v5, %v5138_v53  ;;  %6475 = vst [vmem:[#allocation74_spill] sm:$0xff] %v5268_v10  ;;  %v5274_v32 = vld [vmem:[%s4035_s10 + $0x30] sm:$0xff]  ;;  %v5281_v36 = vld [vmem:[%s4035_s10 + $0x38] sm:$0xff] }
 0x2e5   : > { %6476 = vst [vmem:[#allocation77_spill] sm:$0xff] %v5271_v48  ;;  %6477 = vst [vmem:[#allocation76_spill] sm:$0xff] %v5274_v32  ;;  %v3264_v27 = vpack.c.bf16 %v1813_v31, %v1812_v26  ;;  %v3266_v20 = vpack.c.bf16 %v1797_v46, %v1796_v3  ;;  %v1816_v30 = vmul.f32 %v5240_v57, %v5186_v0  ;;  %v5284_v44 = vld [vmem:[%s4035_s10 + $0xc0] sm:$0xff]  ;;  %v5287_v61 = vld [vmem:[%s4035_s10 + $0xc8] sm:$0xff] }
 0x2e6   : > { %v1817_v51 = vmul.f32 %v5243_v37, %v5189_v12  ;;  %6478 = vst [vmem:[#allocation79_spill] sm:$0xff] %v5281_v36  ;;  %6479 = vst [vmem:[#allocation78_spill] sm:$0xff] %v5284_v44  ;;  %v3268_v35 = vpack.c.bf16 %v1815_v14, %v1814_v41  ;;  %v3270_v6 = vpack.c.bf16 %v1799_v8, %v1798_v62  ;;  %v5294_v3 = vld [vmem:[%s4035_s10 + $0x40] sm:$0xff]  ;;  %v5297_v46 = vld [vmem:[%s4035_s10 + $0x48] sm:$0xff] }
 0x2e7   : > { %6480 = vst [vmem:[#allocation81_spill] sm:$0xff] %v5287_v61  ;;  %v1800_v26 = vmul.f32 %v5254_v59, %v5141_v25  ;;  %v1801_v31 = vmul.f32 %v5257_v21, %v5144_v15  ;;  %6481 = vst [vmem:[#allocation80_spill] sm:$0xff] %v5294_v3  ;;  %v5300_v37 = vld [vmem:[%s4035_s10 + $0xd0] sm:$0xff]  ;;  %3265 = vmatprep.subr.bf16.mxu0 %v3264_v27  ;;  %v1818_v41 = vmul.f32 %v5268_v10, %v5192_v13  ;;  %v5309_v8 = vld [vmem:[%s4035_s10 + $0xd8] sm:$0xff] }
 0x2e8   : > { %6482 = vst [vmem:[#allocation82_spill] sm:$0xff] %v5297_v46  ;;  %6483 = vst [vmem:[#allocation83_spill] sm:$0xff] %v5300_v37  ;;  %v3272_v57 = vpack.c.bf16 %v1817_v51, %v1816_v30  ;;  %v1819_v14 = vmul.f32 %v5271_v48, %v5195_v39  ;;  %v1802_v62 = vmul.f32 %v5274_v32, %v5146_v55  ;;  %v5312_v21 = vld [vmem:[%s4035_s10 + $0x50] sm:$0xff]  ;;  %3267 = vmatpush3.bf16.msra.mxu0 %v3266_v20  ;;  %v5321_v32 = vld [vmem:[%s4035_s10 + $0x58] sm:$0xff] }
 0x2e9   : > { %6484 = vst [vmem:[#allocation84_spill] sm:$0xff] %v5309_v8  ;;  %6485 = vst [vmem:[#allocation85_spill] sm:$0xff] %v5312_v21  ;;  %v3274_v59 = vpack.c.bf16 %v1801_v31, %v1800_v26  ;;  %v1803_v27 = vmul.f32 %v5281_v36, %v5149_v54  ;;  %v1820_v30 = vmul.f32 %v5284_v44, %v5207_v24  ;;  %v5324_v48 = vld [vmem:[%s4035_s10 + $0xe0] sm:$0xff]  ;;  %v5327_v10 = vld [vmem:[%s4035_s10 + $0xe8] sm:$0xff]  ;;  %3269 = vmatprep.subr.bf16.mxu0 %v3268_v35 }
 0x2ea   : > { %v1821_v51 = vmul.f32 %v5287_v61, %v5210_v58  ;;  %6486 = vst [vmem:[#allocation86_spill] sm:$0xff] %v5321_v32  ;;  %6487 = vst [vmem:[#allocation87_spill] sm:$0xff] %v5324_v48  ;;  %v3276_v20 = vpack.c.bf16 %v1819_v14, %v1818_v41  ;;  %v1804_v26 = vmul.f32 %v5294_v3, %v5151_v9  ;;  %v5336_v44 = vld [vmem:[%s4035_s10 + $0x60] sm:$0xff]  ;;  %v5339_v36 = vld [vmem:[%s4035_s10 + $0x68] sm:$0xff] }
 0x2eb   : > { %6488 = vst [vmem:[#allocation88_spill] sm:$0xff] %v5327_v10  ;;  %v1805_v31 = vmul.f32 %v5297_v46, %v5153_v34  ;;  %v1822_v61 = vmul.f32 %v5300_v37, %v5213_v47  ;;  %6489 = vst [vmem:[#allocation89_spill] sm:$0xff] %v5336_v44  ;;  %v5342_v5 = vld [vmem:[%s4035_s10 + $0xf0] sm:$0xff]  ;;  %v3278_v38 = vpack.c.bf16 %v1803_v27, %v1802_v62  ;;  %v5349_v14 = vld [vmem:[%s4035_s10 + $0xf8] sm:$0xff] }
 0x2ec   : > { %6490 = vst [vmem:[#allocation90_spill] sm:$0xff] %v5339_v36  ;;  %6491 = vst [vmem:[#allocation91_spill] sm:$0xff] %v5342_v5  ;;  %v3280_v22 = vpack.c.bf16 %v1821_v51, %v1820_v30  ;;  %v1823_v35 = vmul.f32 %v5309_v8, %v5216_v28  ;;  %v1806_v41 = vmul.f32 %v5312_v21, %v5155_v1  ;;  %v5352_v46 = vld [vmem:[%s4035_s10 + $0x70] sm:$0xff]  ;;  %v5361_v27 = vld [vmem:[%s4035_s10 + $0x78] sm:$0xff]  ;;  %3271 = vmatpush3.bf16.msra.mxu0 %v3270_v6  ;;  %s2825_s10 = sadd.s32 %s3660_s9, %s3053_s3 }
 0x2ed   : > { %6492 = vst [vmem:[#allocation92_spill] sm:$0xff] %v5349_v14  ;;  %6493 = vst [vmem:[#allocation93_spill] sm:$0xff] %v5352_v46  ;;  %v3282_v3 = vpack.c.bf16 %v1805_v31, %v1804_v26  ;;  %v1807_v37 = vmul.f32 %v5321_v32, %v5157_v49  ;;  %v1824_v4 = vmul.f32 %v5324_v48, %v5228_v29  ;;  %3273 = vmatprep.subr.bf16.mxu0 %v3272_v57  ;;  %v6496_v57 = vld [vmem:[#allocation26_spill] sm:$0xff]  ;;  %v1828_v33 = vld [vmem:[%s4025_s19 + $0x2] sm:$0x1] }
 0x2ee   : > { %v1825_v62 = vmul.f32 %v5327_v10, %v5231_v16  ;;  %6494 = vst [vmem:[#allocation94_spill] sm:$0xff] %v5361_v27  ;;  %v3284_v30 = vpack.c.bf16 %v1823_v35, %v1822_v61  ;;  %v1808_v51 = vmul.f32 %v5336_v44, %v5159_v40  ;;  %v1809_v21 = vmul.f32 %v5339_v36, %v5161_v18 }
 0x2ef   : > { %v1826_v26 = vmul.f32 %v5342_v5, %v5234_v7  ;;  %v3286_v31 = vpack.c.bf16 %v1807_v37, %v1806_v41  ;;  %v1827_v48 = vmul.f32 %v5349_v14, %v5237_v50  ;;  %v1810_v10 = vmul.f32 %v5352_v46, %v5163_v56  ;;  %v5389_v41 = vpop.permute.xlu0 %2096  ;;  %v6525_v46 = vld [vmem:[#allocation42_spill] sm:$0xff] }
 0x2f0   : > { %v3288_v32 = vpack.c.bf16 %v1825_v62, %v1824_v4  ;;  %v3290_v6 = vpack.c.bf16 %v1809_v21, %v1808_v51  ;;  %v1811_v61 = vmul.f32 %v5361_v27, %v5165_v19  ;;  %3275 = vmatpush3.bf16.msra.mxu0 %v3274_v59  ;;  %v6495_v4 = vld [vmem:[#allocation64_spill] sm:$0xff]  ;;  %v5377_v21 = vpop.permute.xlu1 %2091  ;;  %v6497_v59 = vld [vmem:[#allocation29_spill] sm:$0xff]  ;;  %v6503_v62 = vld [vmem:[#allocation59_spill] sm:$0xff] }
 0x2f1   : > { %v3292_v35 = vpack.c.bf16 %v1827_v48, %v1826_v26  ;;  %3277 = vmatprep.subr.bf16.mxu0 %v3276_v20  ;;  %v1833_v37 = vrot.slane %v6496_v57, %v6495_v4  ;;  %v3682_v48 = vmov 3   ;;  %v5394_v51 = vld [vmem:[%s4049_s14 + $0x3] ss:$4 sm:$0x3]  ;;  %v6508_v57 = vld [vmem:[#allocation41_spill] sm:$0xff] }
 0x2f2   : > { %v3294_v44 = vpack.c.bf16 %v1811_v61, %v1810_v10  ;;  %3448 = vset.pattern.permute.xlu0 %v3682_v48  ;;  %3449 = vset.pattern.permute.xlu1 %v3682_v48  ;;  %v6499_v10 = vld [vmem:[#allocation34_spill] sm:$0xff]  ;;  %6505 = vst [vmem:[#allocation26_spill] sm:$0xff] %v5394_v51  ;;  %v6506_v26 = vld [vmem:[#allocation52_spill] sm:$0xff]  ;;  %v6510_v48 = vld [vmem:[#allocation45_spill] sm:$0xff] }
 0x2f3   : > { %2550 = vperm.xlu0 %3448, %v6497_v59   ;;  %v5400_v61 = vpop.permute.xlu0 %2101 }
 0x2f4   : > { %3279 = vmatpush3.bf16.msra.mxu0 %v3278_v38  ;;  %v5381_v38 = vpop.permute.xlu1 %2011 }
 0x2f5   : > { %3281 = vmatprep.subr.bf16.mxu0 %v3280_v22  ;;  %v6498_v22 = vld [vmem:[#allocation31_spill] sm:$0xff] }
 0x2f6   : > { %2555 = vperm.xlu1 %3449, %v6498_v22  }
 0x2f7   : > { %2565 = vperm.xlu0 %3448, %v6499_v10   ;;  %v5408_v22 = vpop.permute.xlu0 %2021  ;;  %v6511_v10 = vld [vmem:[#allocation61_spill] sm:$0xff] }
 0x2f8   : > { %3283 = vmatpush3.bf16.msra.mxu0 %v3282_v3  ;;  %v6501_v3 = vld [vmem:[#allocation55_spill] sm:$0xff]  ;;  %v5387_v20 = vpop.permute.xlu1 %2016 }
 0x2f9   : > { %3285 = vmatprep.subr.bf16.mxu0 %v3284_v30  ;;  %v6504_v30 = vld [vmem:[#allocation37_spill] sm:$0xff] }
 0x2fb   : > { %2575 = vperm.xlu0 %3448, %v6501_v3  }
 0x2fc   : > { %3287 = vmatpush3.bf16.msra.mxu0 %v3286_v31  ;;  %v2376_v31 = vrot.slane %v5394_v51, %v6506_v26  ;;  %v6515_v26 = vld [vmem:[#allocation28_spill] sm:$0xff] }
 0x2fd   : > { %3289 = vmatprep.subr.bf16.mxu0 %v3288_v32  ;;  %v6500_v32 = vld [vmem:[#allocation32_spill] sm:$0xff] }
 0x2fe   : > { %2560 = vperm.xlu1 %3449, %v6500_v32   ;;  %2443 = vmatprep.mubr.f32.mxu1 %v2376_v31  ;;  %v6512_v32 = vld [vmem:[#allocation51_spill] sm:$0xff]  ;;  %v6521_v51 = vld [vmem:[#allocation36_spill] sm:$0xff] }
 0x2ff   : > { %2585 = vperm.xlu0 %3448, %v6503_v62   ;;  %v6513_v62 = vld [vmem:[#allocation69_spill] sm:$0xff]  ;;  %v6516_v31 = vld [vmem:[#allocation27_spill] sm:$0xff] }
 0x300   : > { %3291 = vmatpush3.bf16.msra.mxu0 %v3290_v6  ;;  %v5398_v6 = vpop.permute.xlu1 %2106 }
 0x301   : > { %3293 = vmatprep.subr.bf16.mxu0 %v3292_v35  ;;  %v6507_v35 = vld [vmem:[#allocation63_spill] sm:$0xff] }
 0x303   : > { %2595 = vperm.xlu0 %3448, %v6507_v35  }
 0x304   : > { %3295 = vmatpush3.bf16.msra.mxu0 %v3294_v44  ;;  %v6502_v44 = vld [vmem:[#allocation35_spill] sm:$0xff]  ;;  %v5406_v59 = vpop.permute.xlu1 %2026 }
 0x305   : > { %2570 = vperm.xlu1 %3449, %v6502_v44   ;;  %v5414_v44 = vpop.permute.xlu0 %2111 }
 0x307   : > { %1905 = vmatmul.mubr.f32.vlgmr.msra.gmra.mrb[2].mxu0 %v1833_v37  ;;  %v6509_v37 = vld [vmem:[#allocation48_spill] sm:$0xff] }
 0x308   : > { %2605 = vperm.xlu0 %3448, %v6509_v37   ;;  %v5412_v3 = vpop.permute.xlu1 %2116  ;;  %v6517_v37 = vld [vmem:[#allocation49_spill] sm:$0xff] }
 0x309   : > { %2580 = vperm.xlu1 %3449, %v6504_v30   ;;  %v6514_v30 = vld [vmem:[#allocation67_spill] sm:$0xff] }
 0x30c   : > { %2615 = vperm.xlu0 %3448, %v6511_v10   ;;  %v5420_v35 = vpop.permute.xlu1 %2036 }
 0x30d   : > { %2590 = vperm.xlu1 %3449, %v6508_v57   ;;  %v5422_v57 = vpop.permute.xlu0 %2031 }
 0x310   : > { %2625 = vperm.xlu0 %3448, %v6513_v62   ;;  %v5426_v10 = vpop.permute.xlu1 %2126  ;;  %v6522_v62 = vld [vmem:[#allocation50_spill] sm:$0xff] }
 0x311   : > { %2600 = vperm.xlu1 %3449, %v6510_v48   ;;  %v6518_v48 = vld [vmem:[#allocation30_spill] sm:$0xff]  ;;  %6519 = vst [vmem:[#allocation29_spill] sm:$0xff] %v5426_v10 }
 0x314   : > { %2635 = vperm.xlu0 %3448, %v6515_v26   ;;  %v6524_v26 = vld [vmem:[#allocation54_spill] sm:$0xff] }
 0x315   : > { %2610 = vperm.xlu1 %3449, %v6512_v32   ;;  %v5428_v32 = vpop.permute.xlu0 %2121 }
 0x316   : > { %6520 = vst [vmem:[#allocation31_spill] sm:$0xff] %v5428_v32 }
 0x318   : > { %2645 = vperm.xlu0 %3448, %v6517_v37   ;;  %v6526_v37 = vld [vmem:[#allocation58_spill] sm:$0xff] }
 0x319   : > { %2620 = vperm.xlu1 %3449, %v6514_v30   ;;  %v6523_v30 = vld [vmem:[#allocation40_spill] sm:$0xff]  ;;  %v5436_v27 = vpop.permute.xlu0 %2041 }
 0x31c   : > { %2655 = vperm.xlu0 %3448, %v6521_v51   ;;  %v6529_v51 = vld [vmem:[#allocation46_spill] sm:$0xff] }
 0x31d   : > { %2630 = vperm.xlu1 %3449, %v6516_v31   ;;  %v5434_v31 = vpop.permute.xlu1 %2046  ;;  %v5442_v14 = vpop.permute.xlu0 %2131 }
 0x31e   : > { %6528 = vst [vmem:[#allocation32_spill] sm:$0xff] %v5442_v14 }
 0x320   : > { %2665 = vperm.xlu0 %3448, %v6523_v30   ;;  %v6531_v30 = vld [vmem:[#allocation57_spill] sm:$0xff] }
 0x321   : > { %2640 = vperm.xlu1 %3449, %v6518_v48   ;;  %v5440_v48 = vpop.permute.xlu1 %2136  ;;  %v5450_v36 = vpop.permute.xlu0 %2051 }
 0x322   : > { %6527 = vst [vmem:[#allocation34_spill] sm:$0xff] %v5440_v48 }
 0x324   : > { %2675 = vperm.xlu0 %3448, %v6525_v46   ;;  %v6533_v46 = vld [vmem:[#allocation68_spill] sm:$0xff] }
 0x325   : > { %2650 = vperm.xlu1 %3449, %v6522_v62   ;;  %v6530_v62 = vld [vmem:[#allocation43_spill] sm:$0xff]  ;;  %v5448_v5 = vpop.permute.xlu1 %2056  ;;  %v5456_v43 = vpop.permute.xlu0 %2141 }
 0x326   : > { %6536 = vst [vmem:[#allocation35_spill] sm:$0xff] %v5456_v43 }
 0x328   : > { %2685 = vperm.xlu0 %3448, %v6529_v51  }
 0x329   : > { %2660 = vperm.xlu1 %3449, %v6524_v26   ;;  %v6532_v26 = vld [vmem:[#allocation47_spill] sm:$0xff]  ;;  %v5454_v8 = vpop.permute.xlu1 %2146  ;;  %v2062_v51 = vpop.permute.xlu0 %2061 }
 0x32a   : > { %6535 = vst [vmem:[#allocation55_spill] sm:$0xff] %v5454_v8 }
 0x32c   : > { %2695 = vperm.xlu0 %3448, %v6531_v30  }
 0x32d   : > { %2670 = vperm.xlu1 %3449, %v6526_v37   ;;  %v6534_v37 = vld [vmem:[#allocation60_spill] sm:$0xff]  ;;  %v5458_v60 = vpop.permute.xlu1 %2066  ;;  %v5463_v14 = vpop.permute.xlu0 %2151 }
 0x330   : > { %2705 = vperm.xlu0 %3448, %v6533_v46  }
 0x331   : > { %2680 = vperm.xlu1 %3449, %v6530_v62   ;;  %v5461_v48 = vpop.permute.xlu1 %2156  ;;  %v2072_v10 = vpop.permute.xlu0 %2071 }
 0x335   : > { %2690 = vperm.xlu1 %3449, %v6532_v26   ;;  %v2077_v46 = vpop.permute.xlu1 %2076 }
 0x339   : > { %2700 = vperm.xlu1 %3449, %v6534_v37   ;;  %v6537_v37 = vld [vmem:[#allocation66_spill] sm:$0xff] }
 0x33a   : > { %v5467_v8 = vmul.f32 %v5168_v42, %v6537_v37  ;;  %v5471_v43 = vmul.f32 %v5129_v23, %v6537_v37  ;;  %v5475_v32 = vmul.f32 %v5132_v45, %v6537_v37  ;;  %v5487_v42 = vmul.f32 %v5138_v53, %v6537_v37 }
 0x33b   : > { %v5491_v23 = vmul.f32 %v5174_v63, %v6537_v37  ;;  %v5495_v45 = vmul.f32 %v5189_v12, %v6537_v37  ;;  %v5507_v53 = vmul.f32 %v5186_v0, %v6537_v37  ;;  %v5511_v63 = vmul.f32 %v5195_v39, %v6537_v37 }
 0x33c   : > { %v5515_v12 = vmul.f32 %v5141_v25, %v6537_v37  ;;  %v5527_v0 = vmul.f32 %v5210_v58, %v6537_v37  ;;  %v1982_v39 = vmul.f32 %v5146_v55, %v6537_v37  ;;  %v5533_v25 = vmul.f32 %v5153_v34, %v6537_v37  ;;  %v2167_v58 = vpop.permute.xlu1 %2166 }
 0x33d   : > { %6538 = vst [vmem:[#allocation59_spill] sm:$0xff] %v5495_v45  ;;  %6539 = vst [vmem:[#allocation37_spill] sm:$0xff] %v5507_v53  ;;  %v1987_v55 = vmul.f32 %v5157_v49, %v6537_v37  ;;  %v5551_v34 = vmul.f32 %v5213_v47, %v6537_v37  ;;  %v5567_v49 = vmul.f32 %v5237_v50, %v6537_v37  ;;  %v6556_v45 = vld [vmem:[#allocation55_spill] sm:$0xff] }
 0x33e   : > { %6540 = vst [vmem:[#allocation52_spill] sm:$0xff] %v5511_v63  ;;  %6542 = vst [vmem:[#allocation41_spill] sm:$0xff] %v5527_v0  ;;  %v6545_v0 = vld [vmem:[#allocation65_spill] sm:$0xff] }
 0x33f   : > { %6546 = vst [vmem:[#allocation61_spill] sm:$0xff] %v5551_v34  ;;  %6549 = vst [vmem:[#allocation67_spill] sm:$0xff] %v5567_v49 }
 0x3da   : > { %v3162_v62 = vpop.f32.mrb[2].mxu0 }
 0x3db   : > { %v3163_v30 = vpop.f32.mrb[3].mxu0 }
 0x3dc   : > { %v3164_v11 = vadd.f32 %v3163_v30, %v3162_v62  ;;  %v5541_v30 = vmul.f32 %v5216_v28, %v6537_v37  ;;  %v1986_v28 = vmul.f32 %v5155_v1, %v6537_v37  ;;  %v5576_v1 = vmul.f32 %v5234_v7, %v6537_v37 }
 0x3de   : > { %v1907_v26 = vadd.f32 %v3164_v11, %v1828_v33  ;;  %v5479_v11 = vmul.f32 %v5177_v52, %v6537_v37  ;;  %v5483_v33 = vmul.f32 %v5171_v2, %v6537_v37  ;;  %v5499_v52 = vmul.f32 %v5135_v17, %v6537_v37  ;;  %6544 = vst [vmem:[#allocation45_spill] sm:$0xff] %v5541_v30 }
 0x3df   : > { %v5503_v2 = vmul.f32 %v5144_v15, %v6537_v37  ;;  %v5519_v17 = vmul.f32 %v5149_v54, %v6537_v37  ;;  %v5523_v15 = vmul.f32 %v5192_v13, %v6537_v37  ;;  %v5537_v54 = vmul.f32 %v5207_v24, %v6537_v37  ;;  %6550 = vst [vmem:[#allocation28_spill] sm:$0xff] %v5576_v1  ;;  %v2087_v1 = vpop.permute.xlu1 %2086 }
 0x3e0   : > { %3454 = vtanh.f32 %v1907_v26  ;;  %v1984_v13 = vmul.f32 %v5151_v9, %v6537_v37  ;;  %v2162_v26 = vpop.permute.xlu0 %2161  ;;  %v5555_v24 = vmul.f32 %v5231_v16, %v6537_v37  ;;  %v1989_v9 = vmul.f32 %v5161_v18, %v6537_v37 }
 0x3e1   : > { %6541 = vst [vmem:[#allocation63_spill] sm:$0xff] %v5523_v15  ;;  %6543 = vst [vmem:[#allocation48_spill] sm:$0xff] %v5537_v54  ;;  %v1988_v16 = vmul.f32 %v5159_v40, %v6537_v37  ;;  %v1990_v18 = vmul.f32 %v5163_v56, %v6537_v37  ;;  %v6552_v54 = vld [vmem:[#allocation29_spill] sm:$0xff]  ;;  %v6555_v15 = vld [vmem:[#allocation35_spill] sm:$0xff] }
 0x3e2   : > { %6547 = vst [vmem:[#allocation51_spill] sm:$0xff] %v5555_v24 }
 0x3e4   : > { %v2082_v24 = vpop.permute.xlu0 %2081 }
 0x3ea   : > { %v3455_v62 = vpop.eup %3454 }
 0x3eb   : > { %v2008_v63 = vmul.f32 %v3455_v62, %v6545_v0  ;;  %1911 = vst [vmem:[%s4056_s4 + $0x2] sm:$0x1] %v3455_v62  ;;  %v5563_v62 = vmul.f32 %v5228_v29, %v6537_v37  ;;  %v1991_v0 = vmul.f32 %v5165_v19, %v6537_v37 }
 0x3ed   : > { %6548 = vst [vmem:[#allocation69_spill] sm:$0xff] %v5563_v62  ;;  %v2172_v47 = vrot.slane %v2008_v63, %v6495_v4 }
 0x3ef   : > { %v2173_v29 = vmul.f32 %v2172_v47, %v5381_v38  ;;  %v2174_v50 = vmul.f32 %v2172_v47, %v5387_v20  ;;  %v2175_v49 = vmul.f32 %v2172_v47, %v5408_v22  ;;  %v2176_v63 = vmul.f32 %v2172_v47, %v5406_v59 }
 0x3f0   : > { %v2177_v40 = vmul.f32 %v2172_v47, %v5422_v57  ;;  %v2178_v4 = vmul.f32 %v2172_v47, %v5420_v35  ;;  %v2179_v19 = vmul.f32 %v2172_v47, %v5436_v27  ;;  %v2180_v7 = vmul.f32 %v2172_v47, %v5434_v31 }
 0x3f1   : > { %v2181_v56 = vmul.f32 %v2172_v47, %v5450_v36  ;;  %v2182_v38 = vmul.f32 %v2172_v47, %v5448_v5  ;;  %v2183_v37 = vmul.f32 %v2172_v47, %v2062_v51  ;;  %v2184_v20 = vmul.f32 %v2172_v47, %v5458_v60  ;;  %v6551_v5 = vld [vmem:[#allocation31_spill] sm:$0xff] }
 0x3f2   : > { %v2185_v22 = vmul.f32 %v2172_v47, %v2072_v10  ;;  %v2186_v62 = vmul.f32 %v2172_v47, %v2077_v46  ;;  %v2187_v59 = vmul.f32 %v2172_v47, %v2082_v24  ;;  %v2188_v30 = vmul.f32 %v2172_v47, %v2087_v1  ;;  %v6553_v10 = vld [vmem:[#allocation32_spill] sm:$0xff]  ;;  %v6554_v24 = vld [vmem:[#allocation34_spill] sm:$0xff] }
 0x3f3   : > { %v2189_v57 = vmul.f32 %v2172_v47, %v5377_v21  ;;  %v2190_v35 = vmul.f32 %v2172_v47, %v5389_v41  ;;  %v2191_v27 = vmul.f32 %v2172_v47, %v5400_v61  ;;  %v2192_v31 = vmul.f32 %v2172_v47, %v5398_v6 }
 0x3f4   : > { %v2193_v34 = vmul.f32 %v2172_v47, %v5414_v44  ;;  %v2194_v36 = vmul.f32 %v2172_v47, %v5412_v3  ;;  %v2195_v51 = vmul.f32 %v2172_v47, %v6551_v5  ;;  %v2196_v60 = vmul.f32 %v2172_v47, %v6552_v54 }
 0x3f5   : > { %v2197_v46 = vmul.f32 %v2172_v47, %v6553_v10  ;;  %v2198_v1 = vmul.f32 %v2172_v47, %v6554_v24  ;;  %v2199_v21 = vmul.f32 %v2172_v47, %v6555_v15  ;;  %v2200_v41 = vmul.f32 %v2172_v47, %v6556_v45 }
 0x3f6   : > { %v2201_v61 = vmul.f32 %v2172_v47, %v5463_v14  ;;  %v2202_v6 = vmul.f32 %v2172_v47, %v5461_v48  ;;  %v2203_v53 = vmul.f32 %v2172_v47, %v2162_v26  ;;  %v2204_v44 = vmul.f32 %v2172_v47, %v2167_v58 }
 0x3f7   : > { %v5606_v3 = vadd.f32 %v2173_v29, %v5471_v43  ;;  %v5609_v5 = vadd.f32 %v2174_v50, %v5475_v32  ;;  %v5612_v54 = vadd.f32 %v2175_v49, %v5499_v52  ;;  %v5615_v10 = vadd.f32 %v2176_v63, %v5487_v42  ;;  %v6566_v50 = vld [vmem:[#allocation51_spill] sm:$0xff] }
 0x3f8   : > { %v5618_v45 = vadd.f32 %v2177_v40, %v5515_v12  ;;  %v5621_v14 = vadd.f32 %v2178_v4, %v5503_v2  ;;  %v5623_v48 = vadd.f32 %v2179_v19, %v1982_v39  ;;  %v5626_v43 = vadd.f32 %v2180_v7, %v5519_v17  ;;  %v6567_v40 = vld [vmem:[#allocation28_spill] sm:$0xff]  ;;  %v6568_v7 = vld [vmem:[#allocation67_spill] sm:$0xff] }
 0x3f9   : > { %v5628_v15 = vadd.f32 %v2181_v56, %v1984_v13  ;;  %v5631_v32 = vadd.f32 %v2182_v38, %v5533_v25  ;;  %v5633_v52 = vadd.f32 %v2183_v37, %v1986_v28  ;;  %v5635_v42 = vadd.f32 %v2184_v20, %v1987_v55  ;;  %v6557_v13 = vld [vmem:[#allocation37_spill] sm:$0xff]  ;;  %v6558_v55 = vld [vmem:[#allocation59_spill] sm:$0xff] }
 0x3fa   : > { %v5637_v58 = vadd.f32 %v2185_v22, %v1988_v16  ;;  %v5639_v12 = vadd.f32 %v2186_v62, %v1989_v9  ;;  %v5641_v4 = vadd.f32 %v2187_v59, %v1990_v18  ;;  %v5643_v2 = vadd.f32 %v2188_v30, %v1991_v0  ;;  %v6559_v0 = vld [vmem:[#allocation63_spill] sm:$0xff]  ;;  %v6565_v18 = vld [vmem:[#allocation69_spill] sm:$0xff] }
 0x3fb   : > { %v5646_v17 = vadd.f32 %v2189_v57, %v5467_v8  ;;  %v5649_v39 = vadd.f32 %v2190_v35, %v5483_v33  ;;  %v5652_v25 = vadd.f32 %v2191_v27, %v5491_v23  ;;  %v5655_v37 = vadd.f32 %v2192_v31, %v5479_v11  ;;  %v6560_v8 = vld [vmem:[#allocation52_spill] sm:$0xff]  ;;  %v6562_v23 = vld [vmem:[#allocation41_spill] sm:$0xff]  ;;  %v6570_v22 = vld [vmem:[#allocation39_spill] sm:$0xff] }
 0x3fc   : > { %v5658_v26 = vadd.f32 %v2193_v34, %v6557_v13  ;;  %v5661_v28 = vadd.f32 %v2194_v36, %v6558_v55  ;;  %v5664_v30 = vadd.f32 %v2195_v51, %v6559_v0  ;;  %v5667_v9 = vadd.f32 %v2196_v60, %v6560_v8  ;;  %v6561_v33 = vld [vmem:[#allocation48_spill] sm:$0xff]  ;;  %v6563_v11 = vld [vmem:[#allocation61_spill] sm:$0xff]  ;;  %v6571_v57 = vld [vmem:[#allocation38_spill] sm:$0xff] }
 0x3fd   : > { %v5670_v62 = vadd.f32 %v2197_v46, %v6561_v33  ;;  %v5673_v49 = vadd.f32 %v2198_v1, %v6562_v23  ;;  %v5676_v47 = vadd.f32 %v2199_v21, %v6563_v11  ;;  %v6564_v34 = vld [vmem:[#allocation45_spill] sm:$0xff]  ;;  %v5682_v29 = vadd.f32 %v2201_v61, %v6565_v18  ;;  %v6572_v27 = vld [vmem:[#allocation62_spill] sm:$0xff]  ;;  %v6573_v36 = vld [vmem:[#allocation44_spill] sm:$0xff] }
 0x3fe   : > { %v5679_v16 = vadd.f32 %v2200_v41, %v6564_v34  ;;  %v5685_v63 = vadd.f32 %v2202_v6, %v6566_v50  ;;  %v5688_v19 = vadd.f32 %v2203_v53, %v6567_v40  ;;  %v5691_v56 = vadd.f32 %v2204_v44, %v6568_v7  ;;  %v6569_v38 = vld [vmem:[#allocation33_spill] sm:$0xff]  ;;  %v6574_v53 = vld [vmem:[#allocation56_spill] sm:$0xff]  ;;  %v6576_v1 = vld [vmem:[#allocation71_spill] sm:$0xff] }
 0x3ff   : > { %v2351_v20 = vmul.f32 %v5646_v17, %v6569_v38  ;;  %v2352_v59 = vmul.f32 %v5649_v39, %v6570_v22  ;;  %v2335_v35 = vmul.f32 %v5606_v3, %v6571_v57  ;;  %v2336_v31 = vmul.f32 %v5609_v5, %v6572_v27  ;;  %v6575_v46 = vld [vmem:[#allocation53_spill] sm:$0xff]  ;;  %v6577_v6 = vld [vmem:[#allocation70_spill] sm:$0xff]  ;;  %v6579_v33 = vld [vmem:[#allocation72_spill] sm:$0xff] }
 0x400   : > { %v2353_v51 = vmul.f32 %v5652_v25, %v6573_v36  ;;  %v2354_v60 = vmul.f32 %v5655_v37, %v6574_v53  ;;  %v2337_v24 = vmul.f32 %v5612_v54, %v6575_v46  ;;  %v2338_v21 = vmul.f32 %v5615_v10, %v6576_v1  ;;  %v6578_v13 = vld [vmem:[#allocation73_spill] sm:$0xff]  ;;  %v6580_v11 = vld [vmem:[#allocation75_spill] sm:$0xff]  ;;  %v6581_v50 = vld [vmem:[#allocation74_spill] sm:$0xff] }
 0x401   : > { %v3296_v41 = vpack.c.bf16 %v2352_v59, %v2351_v20  ;;  %v3298_v61 = vpack.c.bf16 %v2336_v31, %v2335_v35  ;;  %v2355_v44 = vmul.f32 %v5658_v26, %v6577_v6  ;;  %v2356_v55 = vmul.f32 %v5661_v28, %v6578_v13  ;;  %v6582_v7 = vld [vmem:[#allocation77_spill] sm:$0xff]  ;;  %v6583_v20 = vld [vmem:[#allocation76_spill] sm:$0xff]  ;;  %v6584_v57 = vld [vmem:[#allocation79_spill] sm:$0xff] }
 0x402   : > { %v3300_v0 = vpack.c.bf16 %v2354_v60, %v2353_v51  ;;  %v3302_v8 = vpack.c.bf16 %v2338_v21, %v2337_v24  ;;  %v2339_v23 = vmul.f32 %v5618_v45, %v6579_v33  ;;  %v2340_v34 = vmul.f32 %v5621_v14, %v6580_v11  ;;  %v6585_v27 = vld [vmem:[#allocation78_spill] sm:$0xff]  ;;  %v6586_v36 = vld [vmem:[#allocation81_spill] sm:$0xff]  ;;  %v6587_v60 = vld [vmem:[#allocation80_spill] sm:$0xff] }
 0x403   : > { %3297 = vmatprep.subr.bf16.mxu1 %v3296_v41  ;;  %v3304_v18 = vpack.c.bf16 %v2356_v55, %v2355_v44  ;;  %v2357_v40 = vmul.f32 %v5664_v30, %v6581_v50  ;;  %v2358_v38 = vmul.f32 %v5667_v9, %v6582_v7  ;;  %v2341_v22 = vmul.f32 %v5623_v48, %v6583_v20  ;;  %v6588_v24 = vld [vmem:[#allocation82_spill] sm:$0xff]  ;;  %v6589_v21 = vld [vmem:[#allocation83_spill] sm:$0xff]  ;;  %v6590_v44 = vld [vmem:[#allocation84_spill] sm:$0xff] }
 0x404   : > { %3299 = vmatpush3.bf16.msra.mxu1 %v3298_v61  ;;  %v3306_v59 = vpack.c.bf16 %v2340_v34, %v2339_v23  ;;  %v2342_v35 = vmul.f32 %v5626_v43, %v6584_v57  ;;  %v2359_v31 = vmul.f32 %v5670_v62, %v6585_v27  ;;  %v2360_v51 = vmul.f32 %v5673_v49, %v6586_v36  ;;  %v6591_v55 = vld [vmem:[#allocation85_spill] sm:$0xff]  ;;  %v6593_v34 = vld [vmem:[#allocation87_spill] sm:$0xff]  ;;  %v6596_v57 = vld [vmem:[#allocation90_spill] sm:$0xff] }
 0x405   : > { %3301 = vmatprep.subr.bf16.mxu1 %v3300_v0  ;;  %v3308_v53 = vpack.c.bf16 %v2358_v38, %v2357_v40  ;;  %v2343_v46 = vmul.f32 %v5628_v15, %v6587_v60  ;;  %v2344_v1 = vmul.f32 %v5631_v32, %v6588_v24  ;;  %v2361_v41 = vmul.f32 %v5676_v47, %v6589_v21  ;;  %v6592_v0 = vld [vmem:[#allocation86_spill] sm:$0xff]  ;;  %v6594_v40 = vld [vmem:[#allocation88_spill] sm:$0xff]  ;;  %v6595_v20 = vld [vmem:[#allocation89_spill] sm:$0xff] }
 0x406   : > { %v3310_v61 = vpack.c.bf16 %v2342_v35, %v2341_v22  ;;  %v3312_v6 = vpack.c.bf16 %v2360_v51, %v2359_v31  ;;  %v2362_v13 = vmul.f32 %v5679_v16, %v6590_v44  ;;  %v2345_v33 = vmul.f32 %v5633_v52, %v6591_v55  ;;  %v6597_v27 = vld [vmem:[#allocation91_spill] sm:$0xff]  ;;  %v6598_v60 = vld [vmem:[#allocation92_spill] sm:$0xff]  ;;  %v6599_v24 = vld [vmem:[#allocation93_spill] sm:$0xff] }
 0x407   : > { %v3314_v23 = vpack.c.bf16 %v2344_v1, %v2343_v46  ;;  %v2346_v11 = vmul.f32 %v5635_v42, %v6592_v0  ;;  %v2363_v50 = vmul.f32 %v5682_v29, %v6593_v34  ;;  %v2364_v7 = vmul.f32 %v5685_v63, %v6594_v40  ;;  %v6600_v21 = vld [vmem:[#allocation94_spill] sm:$0xff]  ;;  %v5759_v0 = vpop.permute.xlu0 %2550 }
 0x408   : > { %3303 = vmatpush3.bf16.msra.mxu1 %v3302_v8  ;;  %v3316_v38 = vpack.c.bf16 %v2362_v13, %v2361_v41  ;;  %v2347_v22 = vmul.f32 %v5637_v58, %v6595_v20  ;;  %v2348_v35 = vmul.f32 %v5639_v12, %v6596_v57  ;;  %v2365_v31 = vmul.f32 %v5688_v19, %v6597_v27  ;;  %v6602_v55 = vld [vmem:[#allocation26_spill] sm:$0xff] }
 0x409   : > { %3305 = vmatprep.subr.bf16.mxu1 %v3304_v18  ;;  %v3318_v36 = vpack.c.bf16 %v2346_v11, %v2345_v33  ;;  %v3320_v51 = vpack.c.bf16 %v2364_v7, %v2363_v50  ;;  %v2366_v46 = vmul.f32 %v5691_v56, %v6598_v60  ;;  %v2349_v1 = vmul.f32 %v5641_v4, %v6599_v24  ;;  %v6601_v18 = vld [vmem:[#allocation64_spill] sm:$0xff]  ;;  %v5761_v11 = vpop.permute.xlu1 %2555 }
 0x40a   : > { %v3322_v8 = vpack.c.bf16 %v2348_v35, %v2347_v22  ;;  %v2350_v41 = vmul.f32 %v5643_v2, %v6600_v21  ;;  %v2372_v33 = vrot.slane %v6602_v55, %v6601_v18 }
 0x40b   : > { %v3324_v44 = vpack.c.bf16 %v2366_v46, %v2365_v31 }
 0x40c   : > { %3307 = vmatpush3.bf16.msra.mxu1 %v3306_v59  ;;  %v3326_v13 = vpack.c.bf16 %v2350_v41, %v2349_v1  ;;  %v5763_v59 = vpop.permute.xlu0 %2565  ;;  %v2367_v1 = vld [vmem:[%s4025_s19 + $0x3] sm:$0x1]  ;;  %s3054_s19 = sshll.u32 %s2825_s10, 6 }
 0x40d   : > { %3309 = vmatprep.subr.bf16.mxu1 %v3308_v53  ;;  %v5765_v53 = vpop.permute.xlu1 %2560  ;;  %s5878_s20 = scalar_lea.hbm %s6608_s22, %s3054_s19 }
 0x410   : > { %3311 = vmatpush3.bf16.msra.mxu1 %v3310_v61  ;;  %v5767_v61 = vpop.permute.xlu0 %2575 }
 0x411   : > { %3313 = vmatprep.subr.bf16.mxu1 %v3312_v6  ;;  %v5769_v6 = vpop.permute.xlu1 %2570 }
 0x414   : > { %3315 = vmatpush3.bf16.msra.mxu1 %v3314_v23  ;;  %v5771_v23 = vpop.permute.xlu0 %2585 }
 0x415   : > { %3317 = vmatprep.subr.bf16.mxu1 %v3316_v38  ;;  %v5773_v34 = vpop.permute.xlu1 %2580 }
 0x418   : > { %3319 = vmatpush3.bf16.msra.mxu1 %v3318_v36  ;;  %v5775_v50 = vpop.permute.xlu0 %2595 }
 0x419   : > { %3321 = vmatprep.subr.bf16.mxu1 %v3320_v51  ;;  %v5777_v40 = vpop.permute.xlu1 %2590 }
 0x41c   : > { %3323 = vmatpush3.bf16.msra.mxu1 %v3322_v8  ;;  %v5779_v7 = vpop.permute.xlu0 %2605 }
 0x41d   : > { %3325 = vmatprep.subr.bf16.mxu1 %v3324_v44  ;;  %v5781_v38 = vpop.permute.xlu1 %2600 }
 0x420   : > { %3327 = vmatpush3.bf16.msra.mxu1 %v3326_v13  ;;  %v5783_v20 = vpop.permute.xlu0 %2615 }
 0x421   : > { %v5785_v22 = vpop.permute.xlu1 %2610 }
 0x423   : > { %2444 = vmatmul.mubr.f32.vlgmr.msra.gmra.mrb[2].mxu1 %v2372_v33 }
 0x424   : > { %v5787_v57 = vpop.permute.xlu0 %2625 }
 0x425   : > { %v5789_v35 = vpop.permute.xlu1 %2620 }
 0x428   : > { %v5791_v27 = vpop.permute.xlu0 %2635 }
 0x429   : > { %v5793_v31 = vpop.permute.xlu1 %2630 }
 0x42c   : > { %v5795_v36 = vpop.permute.xlu0 %2645 }
 0x42d   : > { %6603 = vst [vmem:[#allocation27_spill] sm:$0xff] %v5795_v36  ;;  %v5797_v51 = vpop.permute.xlu1 %2640 }
 0x430   : > { %v5799_v60 = vpop.permute.xlu0 %2655 }
 0x431   : > { %6604 = vst [vmem:[#allocation49_spill] sm:$0xff] %v5799_v60  ;;  %v5801_v46 = vpop.permute.xlu1 %2650  ;;  %v6606_v60 = vld [vmem:[#allocation66_spill] sm:$0xff] }
 0x432   : > { %6605 = vst [vmem:[#allocation30_spill] sm:$0xff] %v5801_v46  ;;  %v5816_v46 = vmul.f32 %v5606_v3, %v6606_v60  ;;  %v5820_v36 = vmul.f32 %v5609_v5, %v6606_v60  ;;  %v5837_v3 = vmul.f32 %v5618_v45, %v6606_v60  ;;  %v5841_v5 = vmul.f32 %v5626_v43, %v6606_v60 }
 0x433   : > { %v5857_v45 = vmul.f32 %v5635_v42, %v6606_v60  ;;  %v5861_v43 = vmul.f32 %v5633_v52, %v6606_v60  ;;  %v5884_v42 = vmul.f32 %v5643_v2, %v6606_v60  ;;  %v5904_v2 = vmul.f32 %v5652_v25, %v6606_v60 }
 0x434   : > { %v5804_v41 = vpop.permute.xlu0 %2665  ;;  %v5922_v25 = vmul.f32 %v5664_v30, %v6606_v60 }
 0x435   : > { %v5806_v44 = vpop.permute.xlu1 %2660  ;;  %6609 = vst [vmem:[#allocation50_spill] sm:$0xff] %v5884_v42  ;;  %v6610_v42 = vld [vmem:[#allocation65_spill] sm:$0xff] }
 0x438   : > { %v5809_v55 = vpop.permute.xlu0 %2675 }
 0x439   : > { %v5811_v33 = vpop.permute.xlu1 %2670 }
 0x4f6   : > { %v3197_v24 = vpop.f32.mrb[2].mxu1 }
 0x4f7   : > { %v3198_v8 = vpop.f32.mrb[3].mxu1 }
 0x4f8   : > { %v3199_v21 = vadd.f32 %v3198_v8, %v3197_v24  ;;  %v5825_v24 = vmul.f32 %v5615_v10, %v6606_v60  ;;  %v5833_v8 = vmul.f32 %v5621_v14, %v6606_v60  ;;  %v5845_v10 = vmul.f32 %v5623_v48, %v6606_v60 }
 0x4f9   : > { %v5853_v14 = vmul.f32 %v5628_v15, %v6606_v60  ;;  %v5865_v48 = vmul.f32 %v5639_v12, %v6606_v60  ;;  %v5873_v15 = vpop.permute.xlu1 %2680  ;;  %v5892_v12 = vmul.f32 %v5649_v39, %v6606_v60 }
 0x4fa   : > { %v2446_v13 = vadd.f32 %v3199_v21, %v2367_v1  ;;  %v5829_v1 = vmul.f32 %v5612_v54, %v6606_v60  ;;  %v5849_v54 = vmul.f32 %v5631_v32, %v6606_v60  ;;  %v5869_v32 = vmul.f32 %v5637_v58, %v6606_v60  ;;  %v5871_v21 = vpop.permute.xlu0 %2685 }
 0x4fb   : > { %6607 = vst [vmem:[#allocation36_spill] sm:$0xff] %v5865_v48  ;;  %v5888_v58 = vmul.f32 %v5641_v4, %v6606_v60  ;;  %v5900_v48 = vmul.f32 %v5655_v37, %v6606_v60  ;;  %v5908_v4 = vmul.f32 %v5661_v28, %v6606_v60  ;;  %v5918_v37 = vmul.f32 %v5667_v9, %v6606_v60 }
 0x4fc   : > { %3456 = vtanh.f32 %v2446_v13  ;;  %v5896_v13 = vmul.f32 %v5646_v17, %v6606_v60  ;;  %v5914_v17 = vmul.f32 %v5658_v26, %v6606_v60  ;;  %v5926_v28 = vmul.f32 %v5673_v49, %v6606_v60 }
 0x4fd   : > { %6611 = vst [vmem:[#allocation40_spill] sm:$0xff] %v5918_v37 }
 0x4fe   : > { %6612 = vst [vmem:[#allocation54_spill] sm:$0xff] %v5926_v28 }
 0x506   : > { %v3457_v52 = vpop.eup %3456 }
 0x507   : > { %v2547_v39 = vmul.f32 %v3457_v52, %v6610_v42  ;;  %2450 = vst [vmem:[%s4056_s4 + $0x3] sm:$0x1] %v3457_v52  ;;  %s3683_s4 = smov [#allocation9]  }
 0x508   : > { %s3518_s13 = sshll.u32 %s3683_s4, 4  ;;  %s3519_s13 = int_to_ptr.vmem [resolvable:$false] %s3518_s13 }
 0x509   : > { %s3520_s14 = scalar_lea.vmem %s3519_s13, 128  ;;  %p3521_p3 = scmp.lt.s32.totalorder %s5880_s23, %s3519_s13 }
 0x50a   : > { %p3522_p7 = scmp.lt.s32.totalorder %s3520_s14, %s3514_s16 }
 0x50c   : > { %p3523_p13 = por %p3522_p7, %p3521_p3 }
 0x50e   : > { %p3524_p12 = pnand %p3523_p13, %p3517_p2 }
 0x510   : > { %3527 = shalt.err (!%p3524_p12)
}
 0x511   : > { %s3528_s7 = scalar_lea.hbm %s5878_s20, 64  ;;  %s3532_s21 = scalar_lea.hbm %s6608_s22, 256 }
 0x512   : > { %p3529_p11 = scmp.ne.s32.totalorder %s5878_s20, %s3528_s7  ;;  %p3533_p5 = scmp.lt.u32.totalorder %s5878_s20, %s6608_s22 }
 0x513   : > { %p3534_p10 = scmp.lt.u32.totalorder %s3532_s21, %s3528_s7  ;;  %p3536_p8 = scmp.lt.u32.totalorder %s3528_s7, %s5878_s20 }
 0x514   : > { %p3530_p6 = pnand %p3529_p11, %p6613_p9 }
 0x515   : > { %p3535_p1 = por %p3534_p10, %p3533_p5 }
 0x516   : > { %p3531_p0 = pneg %p3530_p6 }
 0x517   : > { %p3537_p4 = por %p3536_p8, %p3535_p1 }
 0x519   : > { %p3538_p2 = pnand %p3537_p4, %p3531_p0 }
 0x51b   : > { %3541 = shalt.err (!%p3538_p2)
}
 0x51c   : > { %3332 = dma.vmem_to_hbm [thread:$0]  (%p6613_p9), %s5880_s23, 64, %s5878_s20, %s2809_s26   ;;  %v5952_v26 = vmul.f32 %v5670_v62, %v6606_v60  ;;  %v5956_v30 = vmul.f32 %v5679_v16, %v6606_v60  ;;  %v5960_v9 = vmul.f32 %v5676_v47, %v6606_v60  ;;  %v2711_v49 = vrot.slane %v2547_v39, %v6601_v18  ;;  %v2696_v47 = vpop.permute.xlu0 %2695  ;;  %v6623_v28 = vld [vmem:[#allocation49_spill] sm:$0xff] }
 0x51d   : > { %v5965_v52 = vmul.f32 %v5685_v63, %v6606_v60  ;;  %v5969_v42 = vmul.f32 %v5682_v29, %v6606_v60  ;;  %v5973_v62 = vmul.f32 %v5691_v56, %v6606_v60  ;;  %v5977_v16 = vmul.f32 %v5688_v19, %v6606_v60  ;;  %s3055_s18 = sshll.u32 %s3660_s9, 7  ;;  %s2841_s10 = sshll.u32 %s4058_s6, 4  ;;  %s6062_s10 = int_to_ptr.vmem [resolvable:$true] %s2841_s10 }
 0x51e   : > { %6614 = vst [vmem:[#allocation42_spill] sm:$0xff] %v5952_v26  ;;  %6615 = vst [vmem:[#allocation58_spill] sm:$0xff] %v5956_v30  ;;  %v2691_v30 = vpop.permute.xlu1 %2690  ;;  %v2712_v18 = vmul.f32 %v2711_v49, %v5759_v0  ;;  %v2713_v39 = vmul.f32 %v2711_v49, %v5761_v11  ;;  %v2714_v63 = vmul.f32 %v2711_v49, %v5765_v53  ;;  %s6627_s23 = sld [smem:[#allocation98_spill]]  ;;  %s2814_s20 = scalar_lea.sflag [#allocation11], %s4032_s25 }
 0x51f   : > { %6616 = vst [vmem:[#allocation46_spill] sm:$0xff] %v5960_v9  ;;  %6617 = vst [vmem:[#allocation43_spill] sm:$0xff] %v5965_v52  ;;  %v2715_v52 = vmul.f32 %v2711_v49, %v5763_v59  ;;  %v2716_v29 = vmul.f32 %v2711_v49, %v5769_v6  ;;  %v2718_v56 = vmul.f32 %v2711_v49, %v5773_v34  ;;  %v6622_v9 = vld [vmem:[#allocation30_spill] sm:$0xff]  ;;  %s6636_s15 = sld [smem:[#allocation23_spill]]  ;;  %s3542_s26 = scalar_lea.vmem %s6062_s10, 4096 }
 0x520   : > { %6618 = vst [vmem:[#allocation57_spill] sm:$0xff] %v5969_v42  ;;  %6619 = vst [vmem:[#allocation47_spill] sm:$0xff] %v5973_v62  ;;  %v2717_v42 = vmul.f32 %v2711_v49, %v5767_v61  ;;  %v2719_v62 = vmul.f32 %v2711_v49, %v5771_v23  ;;  %v2720_v19 = vmul.f32 %v2711_v49, %v5777_v40  ;;  %v2706_v26 = vpop.permute.xlu0 %2705  ;;  %p3543_p9 = scmp.ne.s32.totalorder %s6062_s10, %s3542_s26  ;;  %s3684_s16 = smov [#allocation10]  }
 0x521   : > { %6620 = vst [vmem:[#allocation68_spill] sm:$0xff] %v5977_v16  ;;  %v2721_v60 = vmul.f32 %v2711_v49, %v5775_v50  ;;  %v2722_v0 = vmul.f32 %v2711_v49, %v5781_v38  ;;  %v2723_v11 = vmul.f32 %v2711_v49, %v5779_v7  ;;  %v2724_v53 = vmul.f32 %v2711_v49, %v5785_v22  ;;  %v6621_v16 = vld [vmem:[#allocation27_spill] sm:$0xff]  ;;  %s3546_s4 = sshll.u32 %s3684_s16, 4  ;;  %s3547_s4 = int_to_ptr.vmem [resolvable:$false] %s3546_s4 }
 0x522   : > { %v2725_v59 = vmul.f32 %v2711_v49, %v5783_v20  ;;  %v2726_v6 = vmul.f32 %v2711_v49, %v5789_v35  ;;  %v2727_v61 = vmul.f32 %v2711_v49, %v5787_v57  ;;  %v2728_v34 = vmul.f32 %v2711_v49, %v5793_v31  ;;  %v2701_v35 = vpop.permute.xlu1 %2700  ;;  %s3548_s13 = scalar_lea.vmem %s3547_s4, 8192  ;;  %p3549_p12 = scmp.lt.s32.totalorder %s6062_s10, %s3547_s4 }
 0x523   : > { %v2729_v23 = vmul.f32 %v2711_v49, %v5791_v27  ;;  %v2730_v40 = vmul.f32 %v2711_v49, %v5797_v51  ;;  %v2731_v50 = vmul.f32 %v2711_v49, %v6621_v16  ;;  %v2732_v38 = vmul.f32 %v2711_v49, %v6622_v9  ;;  %p3550_p11 = scmp.lt.s32.totalorder %s3548_s13, %s3542_s26 }
 0x524   : > { %v2733_v7 = vmul.f32 %v2711_v49, %v6623_v28  ;;  %v2734_v22 = vmul.f32 %v2711_v49, %v5806_v44  ;;  %v2735_v20 = vmul.f32 %v2711_v49, %v5804_v41  ;;  %v2736_v57 = vmul.f32 %v2711_v49, %v5811_v33  ;;  %s6052_s0 = scalar_lea.hbm %s6627_s23, %s3055_s18 }
 0x525   : > { %v2737_v31 = vmul.f32 %v2711_v49, %v5809_v55  ;;  %v2738_v27 = vmul.f32 %v2711_v49, %v5873_v15  ;;  %v2739_v51 = vmul.f32 %v2711_v49, %v5871_v21  ;;  %v2740_v37 = vmul.f32 %v2711_v49, %v2691_v30  ;;  %p6637_p3 = scmp.ne.s32.totalorder %s6636_s15, 0  ;;  %p3551_p6 = por %p3550_p11, %p3549_p12 }
 0x526   : > { %v2741_v16 = vmul.f32 %v2711_v49, %v2696_v47  ;;  %v2742_v9 = vmul.f32 %v2711_v49, %v2701_v35  ;;  %v2743_v28 = vmul.f32 %v2711_v49, %v2706_v26  ;;  %v2744_v41 = vadd.f32 %v2712_v18, %v5816_v46  ;;  %v6631_v47 = vld [vmem:[#allocation58_spill] sm:$0xff] }
 0x527   : > { %v2745_v44 = vadd.f32 %v2713_v39, %v5820_v36  ;;  %v2746_v33 = vadd.f32 %v2714_v63, %v5829_v1  ;;  %v2747_v55 = vadd.f32 %v2715_v52, %v5825_v24  ;;  %v2748_v15 = vadd.f32 %v2716_v29, %v5837_v3  ;;  %v6624_v3 = vld [vmem:[#allocation36_spill] sm:$0xff]  ;;  %v6632_v39 = vld [vmem:[#allocation57_spill] sm:$0xff]  ;;  %v6633_v29 = vld [vmem:[#allocation43_spill] sm:$0xff]  ;;  %p3544_p7 = pnand %p3543_p9, %p6637_p3 }
 0x528   : > { %v2749_v21 = vadd.f32 %v2717_v42, %v5833_v8  ;;  %v2750_v30 = vadd.f32 %v2718_v56, %v5845_v10  ;;  %v2751_v26 = vadd.f32 %v2719_v62, %v5841_v5  ;;  %v2752_v46 = vadd.f32 %v2720_v19, %v5853_v14  ;;  %2776 = vst [vmem:[%s4058_s6] sm:$0xff] %v2744_v41  ;;  %v6626_v42 = vld [vmem:[#allocation40_spill] sm:$0xff] }
 0x529   : > { %v2753_v36 = vadd.f32 %v2721_v60, %v5849_v54  ;;  %v2754_v1 = vadd.f32 %v2722_v0, %v5861_v43  ;;  %v2755_v24 = vadd.f32 %v2723_v11, %v5857_v45  ;;  %2777 = vst [vmem:[%s4058_s6 + $0x8] sm:$0xff] %v2745_v44  ;;  %2778 = vst [vmem:[%s4058_s6 + $0x10] sm:$0xff] %v2746_v33  ;;  %v6625_v54 = vld [vmem:[#allocation50_spill] sm:$0xff]  ;;  %v6634_v19 = vld [vmem:[#allocation68_spill] sm:$0xff]  ;;  %p3545_p13 = pneg %p3544_p7 }
 0x52a   : > { %2779 = vst [vmem:[%s4058_s6 + $0x18] sm:$0xff] %v2747_v55  ;;  %v2756_v8 = vadd.f32 %v2724_v53, %v5869_v32  ;;  %v2757_v5 = vadd.f32 %v2725_v59, %v6624_v3  ;;  %v2758_v10 = vadd.f32 %v2726_v6, %v5888_v58  ;;  %v2759_v14 = vadd.f32 %v2727_v61, %v6625_v54  ;;  %v6635_v0 = vld [vmem:[#allocation47_spill] sm:$0xff] }
 0x52b   : > { %2780 = vst [vmem:[%s4058_s6 + $0x20] sm:$0xff] %v2748_v15  ;;  %2781 = vst [vmem:[%s4058_s6 + $0x28] sm:$0xff] %v2749_v21  ;;  %v2760_v45 = vadd.f32 %v2728_v34, %v5896_v13  ;;  %v2761_v43 = vadd.f32 %v2729_v23, %v5892_v12  ;;  %v2762_v32 = vadd.f32 %v2730_v40, %v5904_v2  ;;  %p3552_p0 = pnand %p3551_p6, %p3545_p13 }
 0x52c   : > { %2782 = vst [vmem:[%s4058_s6 + $0x30] sm:$0xff] %v2750_v30  ;;  %2783 = vst [vmem:[%s4058_s6 + $0x38] sm:$0xff] %v2751_v26  ;;  %v2763_v49 = vadd.f32 %v2731_v50, %v5900_v48  ;;  %v2764_v58 = vadd.f32 %v2732_v38, %v5914_v17  ;;  %v2765_v52 = vadd.f32 %v2733_v7, %v5908_v4  ;;  %v6628_v48 = vld [vmem:[#allocation42_spill] sm:$0xff] }
 0x52d   : > { %2784 = vst [vmem:[%s4058_s6 + $0x40] sm:$0xff] %v2752_v46  ;;  %2785 = vst [vmem:[%s4058_s6 + $0x48] sm:$0xff] %v2753_v36  ;;  %v2766_v13 = vadd.f32 %v2734_v22, %v5922_v25  ;;  %v2767_v12 = vadd.f32 %v2735_v20, %v6626_v42  ;;  %v2768_v2 = vadd.f32 %v2736_v57, %v6628_v48  ;;  %v6629_v17 = vld [vmem:[#allocation54_spill] sm:$0xff] }
 0x52e   : > { %2786 = vst [vmem:[%s4058_s6 + $0x50] sm:$0xff] %v2754_v1  ;;  %2787 = vst [vmem:[%s4058_s6 + $0x58] sm:$0xff] %v2755_v24  ;;  %v2769_v4 = vadd.f32 %v2737_v31, %v6629_v17  ;;  %v6630_v25 = vld [vmem:[#allocation46_spill] sm:$0xff]  ;;  %v2771_v18 = vadd.f32 %v2739_v51, %v6631_v47  ;;  %v2772_v63 = vadd.f32 %v2740_v37, %v6632_v39 }
 0x52f   : > { %2788 = vst [vmem:[%s4058_s6 + $0x60] sm:$0xff] %v2756_v8  ;;  %2789 = vst [vmem:[%s4058_s6 + $0x68] sm:$0xff] %v2757_v5  ;;  %v2770_v62 = vadd.f32 %v2738_v27, %v6630_v25  ;;  %v2773_v56 = vadd.f32 %v2741_v16, %v6633_v29  ;;  %v2774_v60 = vadd.f32 %v2742_v9, %v6634_v19 }
 0x530   : > { %2790 = vst [vmem:[%s4058_s6 + $0x70] sm:$0xff] %v2758_v10  ;;  %2791 = vst [vmem:[%s4058_s6 + $0x78] sm:$0xff] %v2759_v14  ;;  %v2775_v11 = vadd.f32 %v2743_v28, %v6635_v0 }
 0x531   : > { %2792 = vst [vmem:[%s4058_s6 + $0x80] sm:$0xff] %v2760_v45  ;;  %2793 = vst [vmem:[%s4058_s6 + $0x88] sm:$0xff] %v2761_v43 }
 0x532   : > { %2794 = vst [vmem:[%s4058_s6 + $0x90] sm:$0xff] %v2762_v32  ;;  %2795 = vst [vmem:[%s4058_s6 + $0x98] sm:$0xff] %v2763_v49 }
 0x533   : > { %2796 = vst [vmem:[%s4058_s6 + $0xa0] sm:$0xff] %v2764_v58  ;;  %2797 = vst [vmem:[%s4058_s6 + $0xa8] sm:$0xff] %v2765_v52 }
 0x534   : > { %2798 = vst [vmem:[%s4058_s6 + $0xb0] sm:$0xff] %v2766_v13  ;;  %2799 = vst [vmem:[%s4058_s6 + $0xb8] sm:$0xff] %v2767_v12 }
 0x535   : > { %2800 = vst [vmem:[%s4058_s6 + $0xc0] sm:$0xff] %v2768_v2  ;;  %2801 = vst [vmem:[%s4058_s6 + $0xc8] sm:$0xff] %v2769_v4 }
 0x536   : > { %2802 = vst [vmem:[%s4058_s6 + $0xd0] sm:$0xff] %v2770_v62  ;;  %2803 = vst [vmem:[%s4058_s6 + $0xd8] sm:$0xff] %v2771_v18 }
 0x537   : > { %2804 = vst [vmem:[%s4058_s6 + $0xe0] sm:$0xff] %v2772_v63  ;;  %2805 = vst [vmem:[%s4058_s6 + $0xe8] sm:$0xff] %v2773_v56 }
 0x538   : > { %2806 = vst [vmem:[%s4058_s6 + $0xf0] sm:$0xff] %v2774_v60  ;;  %2807 = vst [vmem:[%s4058_s6 + $0xf8] sm:$0xff] %v2775_v11 }
 0x539   : > { %3555 = shalt.err (!%p3552_p0)
}
 0x53a   : > { %s3556_s6 = scalar_lea.hbm %s6052_s0, 4096  ;;  %s3560_s24 = scalar_lea.hbm %s6627_s23, 8192 }
 0x53b   : > { %p3557_p5 = scmp.ne.s32.totalorder %s6052_s0, %s3556_s6  ;;  %p3561_p8 = scmp.lt.u32.totalorder %s6052_s0, %s6627_s23 }
 0x53c   : > { %p3562_p4 = scmp.lt.u32.totalorder %s3560_s24, %s3556_s6  ;;  %p3564_p9 = scmp.lt.u32.totalorder %s3556_s6, %s6052_s0 }
 0x53d   : > { %p3558_p10 = pnand %p3557_p5, %p6637_p3 }
 0x53e   : > { %p3563_p2 = por %p3562_p4, %p3561_p8 }
 0x53f   : > { %p3559_p1 = pneg %p3558_p10 }
 0x540   : > { %p3565_p7 = por %p3564_p9, %p3563_p2 }
 0x542   : > { %p3566_p13 = pnand %p3565_p7, %p3559_p1 }
 0x544   : > { %3569 = shalt.err (!%p3566_p13)
}
 0x545   : > { %s3685_s17 = smov 128   ;;  %s3686_s3 = smov 256  }
 0x546   : > { %s3687_s18 = smov 8  }
 0x547   : > { %3333 = dma.vmem_to_hbm [thread:$0]  (%p6637_p3), %s6062_s10, 4096, %s6052_s0, %s2814_s20, %s3685_s17, %s3686_s3, %s3687_s18  }
 0x548 PF: > { %s6638_s9 = sld [smem:[#allocation17_spill]]  ;;  %s6639_s19 = sld [smem:[#allocation24_spill]] }
 0x549   : > { %p3343_p12 = scmp.ge.s32.totalorder %s3672_s12, 2 }
 0x54e   : > { %s2856_s26 = sand.u32 1, %s6638_s9   ;;  %p6640_p11 = scmp.ne.s32.totalorder %s6639_s19, 0 }
 0x54f   : > { %s2857_s16 = scalar_lea.sflag [#allocation5], %s2856_s26 }
 0x550   : > { %p3337_p6 = pnand %p3343_p12, %p6640_p11 }
 0x552   : > { %3623 = dma.done.wait (!%p3337_p6), %s2857_s16, 64  }
 0x553   : > { %3625 = vsyncadd (!%p3337_p6), %s2857_s16, 4294967232  ;;  %s6641_s4 = sld [smem:[#allocation16_spill]]  ;;  %s6642_s13 = sld [smem:[#allocation25_spill]] }
 0x559   : > { %s2865_s6 = sand.u32 1, %s6641_s4   ;;  %p6643_p0 = scmp.ne.s32.totalorder %s6642_s13, 0 }
 0x55a   : > { %s2866_s14 = scalar_lea.sflag [#allocation11], %s2865_s6 }
 0x55b   : > { %p3340_p5 = pnand %p3343_p12, %p6643_p0 }
 0x55d   : > { %3627 = dma.done.wait (!%p3340_p5), %s2866_s14, 4096  }
 0x55e   : > { %3629 = vsyncadd (!%p3340_p5), %s2866_s14, 4294963200  ;;  %s31_s12 = sadd.s32 1, %s3672_s12   ;;  %s6644_s25 = sld [smem:[#allocation21_spill]] }
 0x55f   : > { %p28_p3 = scmp.ge.s32.totalorder %s31_s12, 6   ;;  %s6645_s10 = sld [smem:[#allocation22_spill]] }
 0x560   : > { %s6646_s0 = sld [smem:[#allocation18_spill]]  ;;  %s6647_s15 = sld [smem:[#allocation19_spill]] }
 0x561   : > { %s6648_s20 = sld [smem:[#allocation20_spill]]  ;;  %s6649_s26 = smov %s3636_s27 }
 0x562   : > { %s6650_s27 = smov %s3640_s28  ;;  %s6652_s29 = smov %s3648_s30 }
 0x563   : > { %s6653_s30 = smov %s3652_s8  ;;  %s6655_s9 = smov %s3668_s11 }
 0x564   : > { %s6651_s28 = smov %s6644_s25  ;;  %30 = sbr.rel (!%p28_p3) target bundleno = 19 (0x13), region = 178 }
 0x565   : > { %s6654_s8 = smov %s6645_s10 }
 0x566   : > { %s6656_s10 = smov %s6647_s15 }
 0x567   : > { %s6657_s11 = smov %s6648_s20 }
 0x56b   :  { %2871 = vsyncpa [#allocation4], 1 }
 0x56c   :  { %2873 = vsyncpa [#allocation4 + $0x1], 1 }
 0x56d   :  { %2874 = vsyncpa [#allocation8], 1 }
 0x56e   :  { %2876 = vsyncpa [#allocation8 + $0x1], 1 }
 0x56f   :  { %2877 = vsyncpa [#allocation5], 1 }
 0x570   :  { %2879 = vsyncpa [#allocation5 + $0x1], 1 }
 0x571   :  { %2880 = vsyncpa [#allocation11], 1 }
 0x572   :  { %2882 = vsyncpa [#allocation11 + $0x1], 1 }

</bundles_post_ra>
